<compile_context>
chip_gen: v6e
topology: v6e:2x2x1
jax: 0.10.0
libtpu: 0.0.40
codegen_flags: <defaults>
</compile_context>

<pallas_src>
import math
from functools import partial

import jax
import jax.numpy as jnp
from jax.experimental import pallas as pl
from jax.experimental.pallas import tpu as pltpu


# ----------------------------------------------------------------------------
# In-kernel helpers (operate on values, not refs)
# ----------------------------------------------------------------------------
def _ln(y, g, b):
    """LayerNorm over the last dim, f32 math, eps=1e-5 (PyTorch default)."""
    mu = jnp.mean(y, axis=-1, keepdims=True)
    var = jnp.mean((y - mu) ** 2, axis=-1, keepdims=True)
    return (y - mu) * jax.lax.rsqrt(var + 1e-5) * g + b


def _mm(x, w):
    """MXU matmul: bf16 operands, f32 accumulation."""
    return jnp.dot(x.astype(jnp.bfloat16), w.astype(jnp.bfloat16),
                   preferred_element_type=jnp.float32)


def _qkt(q, k):
    """[Lq, Dh] x [Lk, Dh] -> [Lq, Lk]; contract last dims (no transpose op)."""
    return jax.lax.dot_general(
        q.astype(jnp.bfloat16), k.astype(jnp.bfloat16),
        (((1,), (1,)), ((), ())), preferred_element_type=jnp.float32)


# ----------------------------------------------------------------------------
# Fused encoder-stack kernel: one grid step == one batch element, all layers.
# ----------------------------------------------------------------------------
def _encoder_kernel(n_layers, H,
                    x_ref, wqkv_ref, bqkv_ref, wout_ref, bout_ref,
                    ln1g_ref, ln1b_ref,
                    w1_ref, b1_ref, w2_ref, b2_ref,
                    ln2g_ref, ln2b_ref,
                    o_ref):
    E = x_ref.shape[-1]
    Dh = E // H
    scale = 1.0 / math.sqrt(Dh)

    x = x_ref[0].astype(jnp.float32)                     # [S, E]
    wqkv = wqkv_ref[...]; bqkv = bqkv_ref[...]
    wout = wout_ref[...]; bout = bout_ref[...]
    g1 = ln1g_ref[...]; bn1 = ln1b_ref[...]
    w1 = w1_ref[...]; bf1 = b1_ref[...]
    w2 = w2_ref[...]; bf2 = b2_ref[...]
    g2 = ln2g_ref[...]; bn2 = ln2b_ref[...]

    # Layers share identical (deepcopy'd) parameters -> weights stay VMEM-resident.
    for _ in range(n_layers):
        # ---- self-attention (heads split on VMEM-resident values only) ----
        qkv = _mm(x, wqkv) + bqkv                        # [S, 3E]
        heads = []
        for h in range(H):
            qh = qkv[:, h * Dh:(h + 1) * Dh]
            kh = qkv[:, E + h * Dh:E + (h + 1) * Dh]
            vh = qkv[:, 2 * E + h * Dh:2 * E + (h + 1) * Dh]
            s = _qkt(qh, kh) * scale                     # [S, S]
            s = s - jnp.max(s, axis=-1, keepdims=True)
            p = jnp.exp(s)
            p = p * pl.reciprocal(jnp.sum(p, axis=-1, keepdims=True), approx=True)
            heads.append(_mm(p, vh))                     # [S, Dh]
        attn = jnp.concatenate(heads, axis=-1)           # [S, E]
        x = _ln(_mm(attn, wout) + bout + x, g1, bn1)

        # ---- position-wise FFN (Conv1d k=1 == matmul) + residual + LN ----
        hid = jnp.maximum(_mm(x, w1) + bf1, 0.0)
        x = _ln(_mm(hid, w2) + bf2 + x, g2, bn2)

    o_ref[0] = x.astype(o_ref.dtype)


# ----------------------------------------------------------------------------
# Fused decoder-stack (+ predictor) kernel: one grid step == one batch element.
# ----------------------------------------------------------------------------
def _decoder_kernel(n_layers, H,
                    y_ref, enc_ref, pad_ref,
                    sa_wqkv_ref, sa_bqkv_ref, sa_wout_ref, sa_bout_ref,
                    ln1g_ref, ln1b_ref,
                    ca_wq_ref, ca_bq_ref, ca_wkv_ref, ca_bkv_ref,
                    ca_wout_ref, ca_bout_ref, ln2g_ref, ln2b_ref,
                    w1_ref, b1_ref, w2_ref, b2_ref, ln3g_ref, ln3b_ref,
                    wpred_ref,
                    logits_ref, attnw_ref):
    E = y_ref.shape[-1]
    Dh = E // H
    scale = 1.0 / math.sqrt(Dh)
    T = y_ref.shape[1]

    y = y_ref[0].astype(jnp.float32)                     # [T, E]
    enc = enc_ref[0].astype(jnp.float32)                 # [S, E]
    pad = pad_ref[0]                                     # [1, T] additive 0 / -1e9

    # Causal + key-padding bias built ONCE per grid step (single add per head).
    row = jax.lax.broadcasted_iota(jnp.int32, (T, T), 0)
    col = jax.lax.broadcasted_iota(jnp.int32, (T, T), 1)
    bias_self = jnp.where(col > row, jnp.float32(-1e9), jnp.float32(0.0)) + pad

    # Cross-attention K/V hoisted out of the layer loop: decoder layers share
    # identical weights and the encoder output is layer-invariant.
    kv = _mm(enc, ca_wkv_ref[...]) + ca_bkv_ref[...]     # [S, 2E]

    for li in range(n_layers):
        # ---- masked self-attention ----
        qkv = _mm(y, sa_wqkv_ref[...]) + sa_bqkv_ref[...]
        heads = []
        for h in range(H):
            qh = qkv[:, h * Dh:(h + 1) * Dh]
            kh = qkv[:, E + h * Dh:E + (h + 1) * Dh]
            vh = qkv[:, 2 * E + h * Dh:2 * E + (h + 1) * Dh]
            s = _qkt(qh, kh) * scale + bias_self
            s = s - jnp.max(s, axis=-1, keepdims=True)
            p = jnp.exp(s)
            p = p * pl.reciprocal(jnp.sum(p, axis=-1, keepdims=True), approx=True)
            heads.append(_mm(p, vh))
        attn = jnp.concatenate(heads, axis=-1)
        y = _ln(_mm(attn, sa_wout_ref[...]) + sa_bout_ref[...] + y,
                ln1g_ref[...], ln1b_ref[...])

        # ---- cross-attention (per-head weights returned to the caller) ----
        q = _mm(y, ca_wq_ref[...]) + ca_bq_ref[...]      # [T, E]
        heads = []
        wcols = []
        for h in range(H):
            qh = q[:, h * Dh:(h + 1) * Dh]
            kh = kv[:, h * Dh:(h + 1) * Dh]
            vh = kv[:, E + h * Dh:E + (h + 1) * Dh]
            s = _qkt(qh, kh) * scale                     # [T, S]
            s = s - jnp.max(s, axis=-1, keepdims=True)
            p = jnp.exp(s)
            p = p / jnp.sum(p, axis=-1, keepdims=True)   # exact softmax for weights
            wcols.append(p)
            heads.append(_mm(p, vh))
        # Lane-denser single store: [T, H*S] instead of H separate [T, S] stores.
        attnw_ref[li, 0] = jnp.concatenate(wcols, axis=-1)
        attn = jnp.concatenate(heads, axis=-1)
        y = _ln(_mm(attn, ca_wout_ref[...]) + ca_bout_ref[...] + y,
                ln2g_ref[...], ln2b_ref[...])

        # ---- feed-forward ----
        hid = jnp.maximum(_mm(y, w1_ref[...]) + b1_ref[...], 0.0)
        y = _ln(_mm(hid, w2_ref[...]) + b2_ref[...] + y,
                ln3g_ref[...], ln3b_ref[...])

    # ---- fused predictor (vocab padded to a lane-dense multiple of 128) ----
    logits_ref[0] = _mm(y, wpred_ref[...]).astype(logits_ref.dtype)


# ----------------------------------------------------------------------------
# Pallas-call wrappers
# ----------------------------------------------------------------------------
def _full_spec(shape):
    """Grid-invariant block covering the whole (small) parameter array."""
    n = len(shape)
    return pl.BlockSpec(shape, lambda b, _n=n: (0,) * _n)


def encoder_forward(x, p, n_layers, H):
    """x: [B, S, E] f32 -> [B, S, E] f32.  grid=(B,) 'parallel'."""
    B, S, E = x.shape
    params = [p["attn"]["w_qkv"], p["attn"]["b_qkv"],
              p["attn"]["w_out"], p["attn"]["b_out"],
              p["ln1_g"], p["ln1_b"],
              p["w1"], p["b1"], p["w2"], p["b2"],
              p["ln2_g"], p["ln2_b"]]
    return pl.pallas_call(
        partial(_encoder_kernel, n_layers, H),
        out_shape=jax.ShapeDtypeStruct((B, S, E), jnp.float32),
        grid=(B,),
        in_specs=[pl.BlockSpec((1, S, E), lambda b: (b, 0, 0))]
                 + [_full_spec(a.shape) for a in params],
        out_specs=pl.BlockSpec((1, S, E), lambda b: (b, 0, 0)),
        compiler_params=pltpu.CompilerParams(dimension_semantics=("parallel",)),
    )(x, *params)


def decoder_forward(y_in, enc_out, pad_add, p, pred_w, n_layers, H):
    """y_in: [B, T, E], enc_out: [B, S, E], pad_add: [B, 1, T].
    Returns (padded logits [B, T, Vpad], attn weights [n_layers, B, T, H*S])."""
    B, T, E = y_in.shape
    S = enc_out.shape[1]
    Vpad = pred_w.shape[1]
    sa, ca = p["self_attn"], p["cross_attn"]
    params = [sa["w_qkv"], sa["b_qkv"], sa["w_out"], sa["b_out"],
              p["ln1_g"], p["ln1_b"],
              ca["w_q"], ca["b_q"], ca["w_kv"], ca["b_kv"],
              ca["w_out"], ca["b_out"], p["ln2_g"], p["ln2_b"],
              p["w1"], p["b1"], p["w2"], p["b2"], p["ln3_g"], p["ln3_b"],
              pred_w]
    return pl.pallas_call(
        partial(_decoder_kernel, n_layers, H),
        out_shape=(
            jax.ShapeDtypeStruct((B, T, Vpad), jnp.float32),
            jax.ShapeDtypeStruct((n_layers, B, T, H * S), jnp.float32),
        ),
        grid=(B,),
        in_specs=[pl.BlockSpec((1, T, E), lambda b: (b, 0, 0)),
                  pl.BlockSpec((1, S, E), lambda b: (b, 0, 0)),
                  pl.BlockSpec((1, 1, T), lambda b: (b, 0, 0))]
                 + [_full_spec(a.shape) for a in params],
        out_specs=(
            pl.BlockSpec((1, T, Vpad), lambda b: (b, 0, 0)),
            pl.BlockSpec((n_layers, 1, T, H * S), lambda b: (0, b, 0, 0)),
        ),
        compiler_params=pltpu.CompilerParams(dimension_semantics=("parallel",)),
    )(y_in, enc_out, pad_add, *params)


# ----------------------------------------------------------------------------
# Whole-model forward (2 pallas_calls total), batch-major throughout.
# ----------------------------------------------------------------------------
def transformer_forward(params, images, captions, cfg):
    """images: [B, S, E] f32, captions: [B, T] int32.
    Returns (predictions [B, T, vocab],
             attn_all    [dec_n_layers, B, dec_n_heads, T, S])."""
    B, S, E = images.shape
    T = captions.shape[1]
    Hd = cfg["dec_n_heads"]
    V = cfg["vocab_size"]

    # ---------------- Encoder (one fused pallas_call) ----------------
    enc_out = encoder_forward(images, params["enc_layer"],
                              cfg["enc_n_layers"], cfg["enc_n_heads"])

    # ---------------- Decoder inputs (tiny host-side glue) ----------------
    # TODO(synk): embedding gather stays as jnp.take; no Pallas win at these shapes.
    emb = jnp.take(params["emb"], captions, axis=0)                  # [B, T, E]
    y_in = emb + params["pe"][None, :T, :]                           # + positional enc
    # dropout: identity (eval)
    pad_add = jnp.where(captions == cfg["pad_id"], -1e9, 0.0).astype(jnp.float32)
    pad_add = pad_add[:, None, :]                                    # [B, 1, T]

    # ---------------- Decoder stack + predictor (one fused pallas_call) ----
    logits_p, attn_flat = decoder_forward(
        y_in, enc_out, pad_add, params["dec_layer"], params["pred_w"],
        cfg["dec_n_layers"], Hd)

    predictions = logits_p[:, :, :V]                                 # drop vocab padding
    attns = attn_flat.reshape(cfg["dec_n_layers"], B, T, Hd, S)
    attns = jnp.transpose(attns, (0, 1, 3, 2, 4))                    # [L, B, H, T, S]
    return predictions, attns


# ----------------------------------------------------------------------------
# Positional encoding + deterministic parameter init (weights pre-packed, bf16)
# ----------------------------------------------------------------------------
def positional_encoding_table(max_len, d_model):
    pos = jnp.arange(max_len, dtype=jnp.float32)[:, None]
    div = jnp.exp(jnp.arange(0, d_model, 2, dtype=jnp.float32)
                  * (-math.log(10000.0) / d_model))
    pe = jnp.zeros((max_len, d_model), jnp.float32)
    pe = pe.at[:, 0::2].set(jnp.sin(pos * div))
    pe = pe.at[:, 1::2].set(jnp.cos(pos * div))
    return pe


def _init_mha(key, e, with_cross_split=False):
    k1, k2 = jax.random.split(key)
    # packed + pre-transposed in-projection: x @ w_qkv, columns = [q | k | v]
    w_qkv = (0.02 * jax.random.normal(k1, (e, 3 * e), jnp.float32)).astype(jnp.bfloat16)
    b_qkv = jnp.zeros((1, 3 * e), jnp.float32)
    d = dict(
        w_qkv=w_qkv, b_qkv=b_qkv,
        w_out=(0.02 * jax.random.normal(k2, (e, e), jnp.float32)).astype(jnp.bfloat16),
        b_out=jnp.zeros((1, e), jnp.float32),
    )
    if with_cross_split:          # cross-attn: q from decoder, packed k/v from encoder
        d.update(w_q=w_qkv[:, :e], b_q=b_qkv[:, :e],
                 w_kv=w_qkv[:, e:], b_kv=b_qkv[:, e:])
    return d


def _init_encoder_layer(key, e, f):
    k1, k2, k3 = jax.random.split(key, 3)
    return dict(
        attn=_init_mha(k1, e),
        ln1_g=jnp.ones((1, e), jnp.float32), ln1_b=jnp.zeros((1, e), jnp.float32),
        # Conv1d(kernel_size=1) weights stored as matmul operands
        w1=(0.02 * jax.random.normal(k2, (e, f), jnp.float32)).astype(jnp.bfloat16),
        b1=jnp.zeros((1, f), jnp.float32),
        w2=(0.02 * jax.random.normal(k3, (f, e), jnp.float32)).astype(jnp.bfloat16),
        b2=jnp.zeros((1, e), jnp.float32),
        ln2_g=jnp.ones((1, e), jnp.float32), ln2_b=jnp.zeros((1, e), jnp.float32),
    )


def _init_decoder_layer(key, e, f):
    k1, k2, k3, k4 = jax.random.split(key, 4)
    return dict(
        self_attn=_init_mha(k1, e),
        cross_attn=_init_mha(k2, e, with_cross_split=True),
        ln1_g=jnp.ones((1, e), jnp.float32), ln1_b=jnp.zeros((1, e), jnp.float32),
        ln2_g=jnp.ones((1, e), jnp.float32), ln2_b=jnp.zeros((1, e), jnp.float32),
        w1=(0.02 * jax.random.normal(k3, (e, f), jnp.float32)).astype(jnp.bfloat16),
        b1=jnp.zeros((1, f), jnp.float32),
        w2=(0.02 * jax.random.normal(k4, (f, e), jnp.float32)).astype(jnp.bfloat16),
        b2=jnp.zeros((1, e), jnp.float32),
        ln3_g=jnp.ones((1, e), jnp.float32), ln3_b=jnp.zeros((1, e), jnp.float32),
    )


def init_transformer_params(key, cfg):
    k_enc, k_dec, k_emb, k_pred = jax.random.split(key, 4)
    emb = 0.02 * jax.random.normal(k_emb, (cfg["vocab_size"], cfg["d_model"]),
                                   jnp.float32)
    emb = emb.at[cfg["pad_id"]].set(0.0)          # padding_idx row is zero
    # predictor weight pre-transposed [E, V] and zero-padded to a lane-dense
    # multiple of 128 columns (sliced back to V on the host).
    v = cfg["vocab_size"]
    vpad = ((v + 127) // 128) * 128
    pred_w = 0.02 * jax.random.normal(k_pred, (cfg["d_model"], v), jnp.float32)
    pred_w = jnp.pad(pred_w, ((0, 0), (0, vpad - v))).astype(jnp.bfloat16)
    return dict(
        enc_layer=_init_encoder_layer(k_enc, cfg["d_model"], cfg["enc_ff_dim"]),
        dec_layer=_init_decoder_layer(k_dec, cfg["d_model"], cfg["dec_ff_dim"]),
        emb=emb,
        pe=positional_encoding_table(cfg["max_len"], cfg["d_model"]),
        pred_w=pred_w,
    )


# ----------------------------------------------------------------------------
if __name__ == "__main__":
    cfg = dict(
        vocab_size=50,
        d_model=32,
        img_encode_size=4,      # encode_size^2 = 16 image tokens
        enc_ff_dim=64,
        dec_ff_dim=64,
        enc_n_layers=2,
        dec_n_layers=2,
        enc_n_heads=4,
        dec_n_heads=4,
        max_len=9,              # captions are [B, max_len-1] = [B, 8]
        pad_id=0,
    )

    key = jax.random.PRNGKey(0)
    k_param, k_img, k_cap = jax.random.split(key, 3)

    params = init_transformer_params(k_param, cfg)

    B = 2
    S = cfg["img_encode_size"] ** 2
    T = cfg["max_len"] - 1
    images = jax.random.normal(k_img, (B, S, cfg["d_model"]), jnp.float32)
    captions = jax.random.randint(k_cap, (B, T), 1, cfg["vocab_size"])
    captions = captions.at[1, -2:].set(cfg["pad_id"])   # exercise key_padding_mask
    captions = captions.astype(jnp.int32)

    fwd = jax.jit(lambda p, im, cap: transformer_forward(p, im, cap, cfg))

    preds, attns = fwd(params, images, captions)
    preds = jax.block_until_ready(preds)
    attns = jax.block_until_ready(attns)

    assert preds.shape == (B, T, cfg["vocab_size"])
    assert attns.shape == (cfg["dec_n_layers"], B, cfg["dec_n_heads"], T, S)
    assert bool(jnp.all(jnp.isfinite(preds)))
    assert bool(jnp.all(jnp.isfinite(attns)))
    print("KERNEL_OK")
</pallas_src>

<mosaic_0001>
module attributes {stable_mosaic.version = 11 : i64} {
  func.func @_encoder_kernel(%arg0: i32, %arg1: memref<1x16x32xf32, #tpu.memory_space<vmem>>, %arg2: memref<32x96xbf16, #tpu.memory_space<vmem>>, %arg3: memref<1x96xf32, #tpu.memory_space<vmem>>, %arg4: memref<32x32xbf16, #tpu.memory_space<vmem>>, %arg5: memref<1x32xf32, #tpu.memory_space<vmem>>, %arg6: memref<1x32xf32, #tpu.memory_space<vmem>>, %arg7: memref<1x32xf32, #tpu.memory_space<vmem>>, %arg8: memref<32x64xbf16, #tpu.memory_space<vmem>>, %arg9: memref<1x64xf32, #tpu.memory_space<vmem>>, %arg10: memref<64x32xbf16, #tpu.memory_space<vmem>>, %arg11: memref<1x32xf32, #tpu.memory_space<vmem>>, %arg12: memref<1x32xf32, #tpu.memory_space<vmem>>, %arg13: memref<1x32xf32, #tpu.memory_space<vmem>>, %arg14: memref<1x16x32xf32, #tpu.memory_space<vmem>>) attributes {dimension_semantics = [#tpu.dimension_semantics<parallel>], iteration_bounds = array<i64: 2>, scalar_prefetch = 0 : i64, scratch_operands = 0 : i64, tpu.core_type = #tpu.core_type<tc>, window_params = [{transform_indices = @transform_0, window_bounds = array<i64: 1, 16, 32>}, {pipeline_mode = #tpu.pipeline_mode<synchronous>, transform_indices = @transform_1, window_bounds = array<i64: 32, 96>}, {pipeline_mode = #tpu.pipeline_mode<synchronous>, transform_indices = @transform_2, window_bounds = array<i64: 1, 96>}, {pipeline_mode = #tpu.pipeline_mode<synchronous>, transform_indices = @transform_3, window_bounds = array<i64: 32, 32>}, {pipeline_mode = #tpu.pipeline_mode<synchronous>, transform_indices = @transform_4, window_bounds = array<i64: 1, 32>}, {pipeline_mode = #tpu.pipeline_mode<synchronous>, transform_indices = @transform_5, window_bounds = array<i64: 1, 32>}, {pipeline_mode = #tpu.pipeline_mode<synchronous>, transform_indices = @transform_6, window_bounds = array<i64: 1, 32>}, {pipeline_mode = #tpu.pipeline_mode<synchronous>, transform_indices = @transform_7, window_bounds = array<i64: 32, 64>}, {pipeline_mode = #tpu.pipeline_mode<synchronous>, transform_indices = @transform_8, window_bounds = array<i64: 1, 64>}, {pipeline_mode = #tpu.pipeline_mode<synchronous>, transform_indices = @transform_9, window_bounds = array<i64: 64, 32>}, {pipeline_mode = #tpu.pipeline_mode<synchronous>, transform_indices = @transform_10, window_bounds = array<i64: 1, 32>}, {pipeline_mode = #tpu.pipeline_mode<synchronous>, transform_indices = @transform_11, window_bounds = array<i64: 1, 32>}, {pipeline_mode = #tpu.pipeline_mode<synchronous>, transform_indices = @transform_12, window_bounds = array<i64: 1, 32>}, {transform_indices = @transform_13, window_bounds = array<i64: 1, 16, 32>}]} {
    %c0 = arith.constant 0 : index
    %c0_0 = arith.constant 0 : index
    %c0_1 = arith.constant 0 : index
    %0 = vector.load %arg1[%c0, %c0_0, %c0_1] : memref<1x16x32xf32, #tpu.memory_space<vmem>>, vector<1x16x32xf32>
    %1 = vector.shape_cast %0 : vector<1x16x32xf32> to vector<16x32xf32>
    %c0_2 = arith.constant 0 : index
    %c0_3 = arith.constant 0 : index
    %2 = vector.load %arg2[%c0_2, %c0_3] : memref<32x96xbf16, #tpu.memory_space<vmem>>, vector<32x96xbf16>
    %c0_4 = arith.constant 0 : index
    %c0_5 = arith.constant 0 : index
    %3 = vector.load %arg3[%c0_4, %c0_5] : memref<1x96xf32, #tpu.memory_space<vmem>>, vector<1x96xf32>
    %c0_6 = arith.constant 0 : index
    %c0_7 = arith.constant 0 : index
    %4 = vector.load %arg4[%c0_6, %c0_7] : memref<32x32xbf16, #tpu.memory_space<vmem>>, vector<32x32xbf16>
    %c0_8 = arith.constant 0 : index
    %c0_9 = arith.constant 0 : index
    %5 = vector.load %arg5[%c0_8, %c0_9] : memref<1x32xf32, #tpu.memory_space<vmem>>, vector<1x32xf32>
    %c0_10 = arith.constant 0 : index
    %c0_11 = arith.constant 0 : index
    %6 = vector.load %arg6[%c0_10, %c0_11] : memref<1x32xf32, #tpu.memory_space<vmem>>, vector<1x32xf32>
    %c0_12 = arith.constant 0 : index
    %c0_13 = arith.constant 0 : index
    %7 = vector.load %arg7[%c0_12, %c0_13] : memref<1x32xf32, #tpu.memory_space<vmem>>, vector<1x32xf32>
    %c0_14 = arith.constant 0 : index
    %c0_15 = arith.constant 0 : index
    %8 = vector.load %arg8[%c0_14, %c0_15] : memref<32x64xbf16, #tpu.memory_space<vmem>>, vector<32x64xbf16>
    %c0_16 = arith.constant 0 : index
    %c0_17 = arith.constant 0 : index
    %9 = vector.load %arg9[%c0_16, %c0_17] : memref<1x64xf32, #tpu.memory_space<vmem>>, vector<1x64xf32>
    %c0_18 = arith.constant 0 : index
    %c0_19 = arith.constant 0 : index
    %10 = vector.load %arg10[%c0_18, %c0_19] : memref<64x32xbf16, #tpu.memory_space<vmem>>, vector<64x32xbf16>
    %c0_20 = arith.constant 0 : index
    %c0_21 = arith.constant 0 : index
    %11 = vector.load %arg11[%c0_20, %c0_21] : memref<1x32xf32, #tpu.memory_space<vmem>>, vector<1x32xf32>
    %c0_22 = arith.constant 0 : index
    %c0_23 = arith.constant 0 : index
    %12 = vector.load %arg12[%c0_22, %c0_23] : memref<1x32xf32, #tpu.memory_space<vmem>>, vector<1x32xf32>
    %c0_24 = arith.constant 0 : index
    %c0_25 = arith.constant 0 : index
    %13 = vector.load %arg13[%c0_24, %c0_25] : memref<1x32xf32, #tpu.memory_space<vmem>>, vector<1x32xf32>
    %14 = arith.truncf %1 : vector<16x32xf32> to vector<16x32xbf16>
    %cst = arith.constant dense<0.000000e+00> : vector<16x96xf32>
    %15 = tpu.matmul %14, %2, %cst {dimension_numbers = #tpu.dot_dimension_numbers<[1], [0], [0], [1], [0, 0, 1, 1], [], []>} : vector<16x32xbf16>, vector<32x96xbf16>, vector<16x96xf32> -> vector<16x96xf32>
    %16 = vector.broadcast %3 : vector<1x96xf32> to vector<16x96xf32>
    %17 = arith.addf %15, %16 : vector<16x96xf32>
    %18 = vector.extract_strided_slice %17 {offsets = [0, 0], sizes = [16, 8], strides = [1, 1]} : vector<16x96xf32> to vector<16x8xf32>
    %19 = vector.extract_strided_slice %17 {offsets = [0, 32], sizes = [16, 8], strides = [1, 1]} : vector<16x96xf32> to vector<16x8xf32>
    %20 = vector.extract_strided_slice %17 {offsets = [0, 64], sizes = [16, 8], strides = [1, 1]} : vector<16x96xf32> to vector<16x8xf32>
    %21 = arith.truncf %18 : vector<16x8xf32> to vector<16x8xbf16>
    %22 = arith.truncf %19 : vector<16x8xf32> to vector<16x8xbf16>
    %cst_26 = arith.constant dense<0.000000e+00> : vector<16x16xf32>
    %23 = tpu.matmul %21, %22, %cst_26 {dimension_numbers = #tpu.dot_dimension_numbers<[1], [1], [0], [0], [0, 0, 1, 0], [], []>} : vector<16x8xbf16>, vector<16x8xbf16>, vector<16x16xf32> -> vector<16x16xf32>
    %cst_27 = arith.constant 0.353553385 : f32
    %24 = vector.broadcast %cst_27 : f32 to vector<16x16xf32>
    %25 = arith.mulf %23, %24 : vector<16x16xf32>
    %cst_28 = arith.constant dense<0xFF800000> : vector<16xf32>
    %26 = vector.multi_reduction <maximumf>, %25, %cst_28 [1] : vector<16x16xf32> to vector<16xf32>
    %27 = vector.shape_cast %26 : vector<16xf32> to vector<16x1xf32>
    %28 = vector.broadcast %27 : vector<16x1xf32> to vector<16x16xf32>
    %29 = arith.subf %25, %28 : vector<16x16xf32>
    %30 = math.exp %29 : vector<16x16xf32>
    %cst_29 = arith.constant dense<0.000000e+00> : vector<16xf32>
    %31 = vector.multi_reduction <add>, %30, %cst_29 [1] : vector<16x16xf32> to vector<16xf32>
    %32 = vector.shape_cast %31 : vector<16xf32> to vector<16x1xf32>
    %33 = tpu.reciprocal %32 {approx = true} : vector<16x1xf32> -> vector<16x1xf32>
    %34 = vector.broadcast %33 : vector<16x1xf32> to vector<16x16xf32>
    %35 = arith.mulf %30, %34 : vector<16x16xf32>
    %36 = arith.truncf %35 : vector<16x16xf32> to vector<16x16xbf16>
    %37 = arith.truncf %20 : vector<16x8xf32> to vector<16x8xbf16>
    %cst_30 = arith.constant dense<0.000000e+00> : vector<16x8xf32>
    %38 = tpu.matmul %36, %37, %cst_30 {dimension_numbers = #tpu.dot_dimension_numbers<[1], [0], [0], [1], [0, 0, 1, 1], [], []>} : vector<16x16xbf16>, vector<16x8xbf16>, vector<16x8xf32> -> vector<16x8xf32>
    %39 = vector.extract_strided_slice %17 {offsets = [0, 8], sizes = [16, 8], strides = [1, 1]} : vector<16x96xf32> to vector<16x8xf32>
    %40 = vector.extract_strided_slice %17 {offsets = [0, 40], sizes = [16, 8], strides = [1, 1]} : vector<16x96xf32> to vector<16x8xf32>
    %41 = vector.extract_strided_slice %17 {offsets = [0, 72], sizes = [16, 8], strides = [1, 1]} : vector<16x96xf32> to vector<16x8xf32>
    %42 = arith.truncf %39 : vector<16x8xf32> to vector<16x8xbf16>
    %43 = arith.truncf %40 : vector<16x8xf32> to vector<16x8xbf16>
    %cst_31 = arith.constant dense<0.000000e+00> : vector<16x16xf32>
    %44 = tpu.matmul %42, %43, %cst_31 {dimension_numbers = #tpu.dot_dimension_numbers<[1], [1], [0], [0], [0, 0, 1, 0], [], []>} : vector<16x8xbf16>, vector<16x8xbf16>, vector<16x16xf32> -> vector<16x16xf32>
    %cst_32 = arith.constant 0.353553385 : f32
    %45 = vector.broadcast %cst_32 : f32 to vector<16x16xf32>
    %46 = arith.mulf %44, %45 : vector<16x16xf32>
    %cst_33 = arith.constant dense<0xFF800000> : vector<16xf32>
    %47 = vector.multi_reduction <maximumf>, %46, %cst_33 [1] : vector<16x16xf32> to vector<16xf32>
    %48 = vector.shape_cast %47 : vector<16xf32> to vector<16x1xf32>
    %49 = vector.broadcast %48 : vector<16x1xf32> to vector<16x16xf32>
    %50 = arith.subf %46, %49 : vector<16x16xf32>
    %51 = math.exp %50 : vector<16x16xf32>
    %cst_34 = arith.constant dense<0.000000e+00> : vector<16xf32>
    %52 = vector.multi_reduction <add>, %51, %cst_34 [1] : vector<16x16xf32> to vector<16xf32>
    %53 = vector.shape_cast %52 : vector<16xf32> to vector<16x1xf32>
    %54 = tpu.reciprocal %53 {approx = true} : vector<16x1xf32> -> vector<16x1xf32>
    %55 = vector.broadcast %54 : vector<16x1xf32> to vector<16x16xf32>
    %56 = arith.mulf %51, %55 : vector<16x16xf32>
    %57 = arith.truncf %56 : vector<16x16xf32> to vector<16x16xbf16>
    %58 = arith.truncf %41 : vector<16x8xf32> to vector<16x8xbf16>
    %cst_35 = arith.constant dense<0.000000e+00> : vector<16x8xf32>
    %59 = tpu.matmul %57, %58, %cst_35 {dimension_numbers = #tpu.dot_dimension_numbers<[1], [0], [0], [1], [0, 0, 1, 1], [], []>} : vector<16x16xbf16>, vector<16x8xbf16>, vector<16x8xf32> -> vector<16x8xf32>
    %60 = vector.extract_strided_slice %17 {offsets = [0, 16], sizes = [16, 8], strides = [1, 1]} : vector<16x96xf32> to vector<16x8xf32>
    %61 = vector.extract_strided_slice %17 {offsets = [0, 48], sizes = [16, 8], strides = [1, 1]} : vector<16x96xf32> to vector<16x8xf32>
    %62 = vector.extract_strided_slice %17 {offsets = [0, 80], sizes = [16, 8], strides = [1, 1]} : vector<16x96xf32> to vector<16x8xf32>
    %63 = arith.truncf %60 : vector<16x8xf32> to vector<16x8xbf16>
    %64 = arith.truncf %61 : vector<16x8xf32> to vector<16x8xbf16>
    %cst_36 = arith.constant dense<0.000000e+00> : vector<16x16xf32>
    %65 = tpu.matmul %63, %64, %cst_36 {dimension_numbers = #tpu.dot_dimension_numbers<[1], [1], [0], [0], [0, 0, 1, 0], [], []>} : vector<16x8xbf16>, vector<16x8xbf16>, vector<16x16xf32> -> vector<16x16xf32>
    %cst_37 = arith.constant 0.353553385 : f32
    %66 = vector.broadcast %cst_37 : f32 to vector<16x16xf32>
    %67 = arith.mulf %65, %66 : vector<16x16xf32>
    %cst_38 = arith.constant dense<0xFF800000> : vector<16xf32>
    %68 = vector.multi_reduction <maximumf>, %67, %cst_38 [1] : vector<16x16xf32> to vector<16xf32>
    %69 = vector.shape_cast %68 : vector<16xf32> to vector<16x1xf32>
    %70 = vector.broadcast %69 : vector<16x1xf32> to vector<16x16xf32>
    %71 = arith.subf %67, %70 : vector<16x16xf32>
    %72 = math.exp %71 : vector<16x16xf32>
    %cst_39 = arith.constant dense<0.000000e+00> : vector<16xf32>
    %73 = vector.multi_reduction <add>, %72, %cst_39 [1] : vector<16x16xf32> to vector<16xf32>
    %74 = vector.shape_cast %73 : vector<16xf32> to vector<16x1xf32>
    %75 = tpu.reciprocal %74 {approx = true} : vector<16x1xf32> -> vector<16x1xf32>
    %76 = vector.broadcast %75 : vector<16x1xf32> to vector<16x16xf32>
    %77 = arith.mulf %72, %76 : vector<16x16xf32>
    %78 = arith.truncf %77 : vector<16x16xf32> to vector<16x16xbf16>
    %79 = arith.truncf %62 : vector<16x8xf32> to vector<16x8xbf16>
    %cst_40 = arith.constant dense<0.000000e+00> : vector<16x8xf32>
    %80 = tpu.matmul %78, %79, %cst_40 {dimension_numbers = #tpu.dot_dimension_numbers<[1], [0], [0], [1], [0, 0, 1, 1], [], []>} : vector<16x16xbf16>, vector<16x8xbf16>, vector<16x8xf32> -> vector<16x8xf32>
    %81 = vector.extract_strided_slice %17 {offsets = [0, 24], sizes = [16, 8], strides = [1, 1]} : vector<16x96xf32> to vector<16x8xf32>
    %82 = vector.extract_strided_slice %17 {offsets = [0, 56], sizes = [16, 8], strides = [1, 1]} : vector<16x96xf32> to vector<16x8xf32>
    %83 = vector.extract_strided_slice %17 {offsets = [0, 88], sizes = [16, 8], strides = [1, 1]} : vector<16x96xf32> to vector<16x8xf32>
    %84 = arith.truncf %81 : vector<16x8xf32> to vector<16x8xbf16>
    %85 = arith.truncf %82 : vector<16x8xf32> to vector<16x8xbf16>
    %cst_41 = arith.constant dense<0.000000e+00> : vector<16x16xf32>
    %86 = tpu.matmul %84, %85, %cst_41 {dimension_numbers = #tpu.dot_dimension_numbers<[1], [1], [0], [0], [0, 0, 1, 0], [], []>} : vector<16x8xbf16>, vector<16x8xbf16>, vector<16x16xf32> -> vector<16x16xf32>
    %cst_42 = arith.constant 0.353553385 : f32
    %87 = vector.broadcast %cst_42 : f32 to vector<16x16xf32>
    %88 = arith.mulf %86, %87 : vector<16x16xf32>
    %cst_43 = arith.constant dense<0xFF800000> : vector<16xf32>
    %89 = vector.multi_reduction <maximumf>, %88, %cst_43 [1] : vector<16x16xf32> to vector<16xf32>
    %90 = vector.shape_cast %89 : vector<16xf32> to vector<16x1xf32>
    %91 = vector.broadcast %90 : vector<16x1xf32> to vector<16x16xf32>
    %92 = arith.subf %88, %91 : vector<16x16xf32>
    %93 = math.exp %92 : vector<16x16xf32>
    %cst_44 = arith.constant dense<0.000000e+00> : vector<16xf32>
    %94 = vector.multi_reduction <add>, %93, %cst_44 [1] : vector<16x16xf32> to vector<16xf32>
    %95 = vector.shape_cast %94 : vector<16xf32> to vector<16x1xf32>
    %96 = tpu.reciprocal %95 {approx = true} : vector<16x1xf32> -> vector<16x1xf32>
    %97 = vector.broadcast %96 : vector<16x1xf32> to vector<16x16xf32>
    %98 = arith.mulf %93, %97 : vector<16x16xf32>
    %99 = arith.truncf %98 : vector<16x16xf32> to vector<16x16xbf16>
    %100 = arith.truncf %83 : vector<16x8xf32> to vector<16x8xbf16>
    %cst_45 = arith.constant dense<0.000000e+00> : vector<16x8xf32>
    %101 = tpu.matmul %99, %100, %cst_45 {dimension_numbers = #tpu.dot_dimension_numbers<[1], [0], [0], [1], [0, 0, 1, 1], [], []>} : vector<16x16xbf16>, vector<16x8xbf16>, vector<16x8xf32> -> vector<16x8xf32>
    %102 = tpu.concatenate %38, %59, %80, %101 in 1 : vector<16x8xf32>, vector<16x8xf32>, vector<16x8xf32>, vector<16x8xf32> -> vector<16x32xf32>
    %103 = arith.truncf %102 : vector<16x32xf32> to vector<16x32xbf16>
    %cst_46 = arith.constant dense<0.000000e+00> : vector<16x32xf32>
    %104 = tpu.matmul %103, %4, %cst_46 {dimension_numbers = #tpu.dot_dimension_numbers<[1], [0], [0], [1], [0, 0, 1, 1], [], []>} : vector<16x32xbf16>, vector<32x32xbf16>, vector<16x32xf32> -> vector<16x32xf32>
    %105 = vector.broadcast %5 : vector<1x32xf32> to vector<16x32xf32>
    %106 = arith.addf %104, %105 : vector<16x32xf32>
    %107 = arith.addf %106, %1 : vector<16x32xf32>
    %cst_47 = arith.constant dense<0.000000e+00> : vector<16xf32>
    %108 = vector.multi_reduction <add>, %107, %cst_47 [1] : vector<16x32xf32> to vector<16xf32>
    %109 = vector.shape_cast %108 : vector<16xf32> to vector<16x1xf32>
    %cst_48 = arith.constant 3.200000e+01 : f32
    %110 = vector.broadcast %cst_48 : f32 to vector<16x1xf32>
    %111 = arith.divf %109, %110 : vector<16x1xf32>
    %112 = vector.broadcast %111 : vector<16x1xf32> to vector<16x32xf32>
    %113 = arith.subf %107, %112 : vector<16x32xf32>
    %114 = arith.mulf %113, %113 : vector<16x32xf32>
    %cst_49 = arith.constant dense<0.000000e+00> : vector<16xf32>
    %115 = vector.multi_reduction <add>, %114, %cst_49 [1] : vector<16x32xf32> to vector<16xf32>
    %116 = vector.shape_cast %115 : vector<16xf32> to vector<16x1xf32>
    %cst_50 = arith.constant 3.200000e+01 : f32
    %117 = vector.broadcast %cst_50 : f32 to vector<16x1xf32>
    %118 = arith.divf %116, %117 : vector<16x1xf32>
    %119 = vector.broadcast %111 : vector<16x1xf32> to vector<16x32xf32>
    %120 = arith.subf %107, %119 : vector<16x32xf32>
    %cst_51 = arith.constant 9.99999974E-6 : f32
    %121 = vector.broadcast %cst_51 : f32 to vector<16x1xf32>
    %122 = arith.addf %118, %121 : vector<16x1xf32>
    %123 = math.rsqrt %122 : vector<16x1xf32>
    %124 = vector.broadcast %123 : vector<16x1xf32> to vector<16x32xf32>
    %125 = arith.mulf %120, %124 : vector<16x32xf32>
    %126 = vector.broadcast %6 : vector<1x32xf32> to vector<16x32xf32>
    %127 = arith.mulf %125, %126 : vector<16x32xf32>
    %128 = vector.broadcast %7 : vector<1x32xf32> to vector<16x32xf32>
    %129 = arith.addf %127, %128 : vector<16x32xf32>
    %130 = arith.truncf %129 : vector<16x32xf32> to vector<16x32xbf16>
    %cst_52 = arith.constant dense<0.000000e+00> : vector<16x64xf32>
    %131 = tpu.matmul %130, %8, %cst_52 {dimension_numbers = #tpu.dot_dimension_numbers<[1], [0], [0], [1], [0, 0, 1, 1], [], []>} : vector<16x32xbf16>, vector<32x64xbf16>, vector<16x64xf32> -> vector<16x64xf32>
    %132 = vector.broadcast %9 : vector<1x64xf32> to vector<16x64xf32>
    %133 = arith.addf %131, %132 : vector<16x64xf32>
    %cst_53 = arith.constant 0.000000e+00 : f32
    %134 = vector.broadcast %cst_53 : f32 to vector<16x64xf32>
    %135 = arith.maximumf %133, %134 : vector<16x64xf32>
    %136 = arith.truncf %135 : vector<16x64xf32> to vector<16x64xbf16>
    %cst_54 = arith.constant dense<0.000000e+00> : vector<16x32xf32>
    %137 = tpu.matmul %136, %10, %cst_54 {dimension_numbers = #tpu.dot_dimension_numbers<[1], [0], [0], [1], [0, 0, 1, 1], [], []>} : vector<16x64xbf16>, vector<64x32xbf16>, vector<16x32xf32> -> vector<16x32xf32>
    %138 = vector.broadcast %11 : vector<1x32xf32> to vector<16x32xf32>
    %139 = arith.addf %137, %138 : vector<16x32xf32>
    %140 = arith.addf %139, %129 : vector<16x32xf32>
    %cst_55 = arith.constant dense<0.000000e+00> : vector<16xf32>
    %141 = vector.multi_reduction <add>, %140, %cst_55 [1] : vector<16x32xf32> to vector<16xf32>
    %142 = vector.shape_cast %141 : vector<16xf32> to vector<16x1xf32>
    %cst_56 = arith.constant 3.200000e+01 : f32
    %143 = vector.broadcast %cst_56 : f32 to vector<16x1xf32>
    %144 = arith.divf %142, %143 : vector<16x1xf32>
    %145 = vector.broadcast %144 : vector<16x1xf32> to vector<16x32xf32>
    %146 = arith.subf %140, %145 : vector<16x32xf32>
    %147 = arith.mulf %146, %146 : vector<16x32xf32>
    %cst_57 = arith.constant dense<0.000000e+00> : vector<16xf32>
    %148 = vector.multi_reduction <add>, %147, %cst_57 [1] : vector<16x32xf32> to vector<16xf32>
    %149 = vector.shape_cast %148 : vector<16xf32> to vector<16x1xf32>
    %cst_58 = arith.constant 3.200000e+01 : f32
    %150 = vector.broadcast %cst_58 : f32 to vector<16x1xf32>
    %151 = arith.divf %149, %150 : vector<16x1xf32>
    %152 = vector.broadcast %144 : vector<16x1xf32> to vector<16x32xf32>
    %153 = arith.subf %140, %152 : vector<16x32xf32>
    %cst_59 = arith.constant 9.99999974E-6 : f32
    %154 = vector.broadcast %cst_59 : f32 to vector<16x1xf32>
    %155 = arith.addf %151, %154 : vector<16x1xf32>
    %156 = math.rsqrt %155 : vector<16x1xf32>
    %157 = vector.broadcast %156 : vector<16x1xf32> to vector<16x32xf32>
    %158 = arith.mulf %153, %157 : vector<16x32xf32>
    %159 = vector.broadcast %12 : vector<1x32xf32> to vector<16x32xf32>
    %160 = arith.mulf %158, %159 : vector<16x32xf32>
    %161 = vector.broadcast %13 : vector<1x32xf32> to vector<16x32xf32>
    %162 = arith.addf %160, %161 : vector<16x32xf32>
    %163 = arith.truncf %162 : vector<16x32xf32> to vector<16x32xbf16>
    %cst_60 = arith.constant dense<0.000000e+00> : vector<16x96xf32>
    %164 = tpu.matmul %163, %2, %cst_60 {dimension_numbers = #tpu.dot_dimension_numbers<[1], [0], [0], [1], [0, 0, 1, 1], [], []>} : vector<16x32xbf16>, vector<32x96xbf16>, vector<16x96xf32> -> vector<16x96xf32>
    %165 = vector.broadcast %3 : vector<1x96xf32> to vector<16x96xf32>
    %166 = arith.addf %164, %165 : vector<16x96xf32>
    %167 = vector.extract_strided_slice %166 {offsets = [0, 0], sizes = [16, 8], strides = [1, 1]} : vector<16x96xf32> to vector<16x8xf32>
    %168 = vector.extract_strided_slice %166 {offsets = [0, 32], sizes = [16, 8], strides = [1, 1]} : vector<16x96xf32> to vector<16x8xf32>
    %169 = vector.extract_strided_slice %166 {offsets = [0, 64], sizes = [16, 8], strides = [1, 1]} : vector<16x96xf32> to vector<16x8xf32>
    %170 = arith.truncf %167 : vector<16x8xf32> to vector<16x8xbf16>
    %171 = arith.truncf %168 : vector<16x8xf32> to vector<16x8xbf16>
    %cst_61 = arith.constant dense<0.000000e+00> : vector<16x16xf32>
    %172 = tpu.matmul %170, %171, %cst_61 {dimension_numbers = #tpu.dot_dimension_numbers<[1], [1], [0], [0], [0, 0, 1, 0], [], []>} : vector<16x8xbf16>, vector<16x8xbf16>, vector<16x16xf32> -> vector<16x16xf32>
    %cst_62 = arith.constant 0.353553385 : f32
    %173 = vector.broadcast %cst_62 : f32 to vector<16x16xf32>
    %174 = arith.mulf %172, %173 : vector<16x16xf32>
    %cst_63 = arith.constant dense<0xFF800000> : vector<16xf32>
    %175 = vector.multi_reduction <maximumf>, %174, %cst_63 [1] : vector<16x16xf32> to vector<16xf32>
    %176 = vector.shape_cast %175 : vector<16xf32> to vector<16x1xf32>
    %177 = vector.broadcast %176 : vector<16x1xf32> to vector<16x16xf32>
    %178 = arith.subf %174, %177 : vector<16x16xf32>
    %179 = math.exp %178 : vector<16x16xf32>
    %cst_64 = arith.constant dense<0.000000e+00> : vector<16xf32>
    %180 = vector.multi_reduction <add>, %179, %cst_64 [1] : vector<16x16xf32> to vector<16xf32>
    %181 = vector.shape_cast %180 : vector<16xf32> to vector<16x1xf32>
    %182 = tpu.reciprocal %181 {approx = true} : vector<16x1xf32> -> vector<16x1xf32>
    %183 = vector.broadcast %182 : vector<16x1xf32> to vector<16x16xf32>
    %184 = arith.mulf %179, %183 : vector<16x16xf32>
    %185 = arith.truncf %184 : vector<16x16xf32> to vector<16x16xbf16>
    %186 = arith.truncf %169 : vector<16x8xf32> to vector<16x8xbf16>
    %cst_65 = arith.constant dense<0.000000e+00> : vector<16x8xf32>
    %187 = tpu.matmul %185, %186, %cst_65 {dimension_numbers = #tpu.dot_dimension_numbers<[1], [0], [0], [1], [0, 0, 1, 1], [], []>} : vector<16x16xbf16>, vector<16x8xbf16>, vector<16x8xf32> -> vector<16x8xf32>
    %188 = vector.extract_strided_slice %166 {offsets = [0, 8], sizes = [16, 8], strides = [1, 1]} : vector<16x96xf32> to vector<16x8xf32>
    %189 = vector.extract_strided_slice %166 {offsets = [0, 40], sizes = [16, 8], strides = [1, 1]} : vector<16x96xf32> to vector<16x8xf32>
    %190 = vector.extract_strided_slice %166 {offsets = [0, 72], sizes = [16, 8], strides = [1, 1]} : vector<16x96xf32> to vector<16x8xf32>
    %191 = arith.truncf %188 : vector<16x8xf32> to vector<16x8xbf16>
    %192 = arith.truncf %189 : vector<16x8xf32> to vector<16x8xbf16>
    %cst_66 = arith.constant dense<0.000000e+00> : vector<16x16xf32>
    %193 = tpu.matmul %191, %192, %cst_66 {dimension_numbers = #tpu.dot_dimension_numbers<[1], [1], [0], [0], [0, 0, 1, 0], [], []>} : vector<16x8xbf16>, vector<16x8xbf16>, vector<16x16xf32> -> vector<16x16xf32>
    %cst_67 = arith.constant 0.353553385 : f32
    %194 = vector.broadcast %cst_67 : f32 to vector<16x16xf32>
    %195 = arith.mulf %193, %194 : vector<16x16xf32>
    %cst_68 = arith.constant dense<0xFF800000> : vector<16xf32>
    %196 = vector.multi_reduction <maximumf>, %195, %cst_68 [1] : vector<16x16xf32> to vector<16xf32>
    %197 = vector.shape_cast %196 : vector<16xf32> to vector<16x1xf32>
    %198 = vector.broadcast %197 : vector<16x1xf32> to vector<16x16xf32>
    %199 = arith.subf %195, %198 : vector<16x16xf32>
    %200 = math.exp %199 : vector<16x16xf32>
    %cst_69 = arith.constant dense<0.000000e+00> : vector<16xf32>
    %201 = vector.multi_reduction <add>, %200, %cst_69 [1] : vector<16x16xf32> to vector<16xf32>
    %202 = vector.shape_cast %201 : vector<16xf32> to vector<16x1xf32>
    %203 = tpu.reciprocal %202 {approx = true} : vector<16x1xf32> -> vector<16x1xf32>
    %204 = vector.broadcast %203 : vector<16x1xf32> to vector<16x16xf32>
    %205 = arith.mulf %200, %204 : vector<16x16xf32>
    %206 = arith.truncf %205 : vector<16x16xf32> to vector<16x16xbf16>
    %207 = arith.truncf %190 : vector<16x8xf32> to vector<16x8xbf16>
    %cst_70 = arith.constant dense<0.000000e+00> : vector<16x8xf32>
    %208 = tpu.matmul %206, %207, %cst_70 {dimension_numbers = #tpu.dot_dimension_numbers<[1], [0], [0], [1], [0, 0, 1, 1], [], []>} : vector<16x16xbf16>, vector<16x8xbf16>, vector<16x8xf32> -> vector<16x8xf32>
    %209 = vector.extract_strided_slice %166 {offsets = [0, 16], sizes = [16, 8], strides = [1, 1]} : vector<16x96xf32> to vector<16x8xf32>
    %210 = vector.extract_strided_slice %166 {offsets = [0, 48], sizes = [16, 8], strides = [1, 1]} : vector<16x96xf32> to vector<16x8xf32>
    %211 = vector.extract_strided_slice %166 {offsets = [0, 80], sizes = [16, 8], strides = [1, 1]} : vector<16x96xf32> to vector<16x8xf32>
    %212 = arith.truncf %209 : vector<16x8xf32> to vector<16x8xbf16>
    %213 = arith.truncf %210 : vector<16x8xf32> to vector<16x8xbf16>
    %cst_71 = arith.constant dense<0.000000e+00> : vector<16x16xf32>
    %214 = tpu.matmul %212, %213, %cst_71 {dimension_numbers = #tpu.dot_dimension_numbers<[1], [1], [0], [0], [0, 0, 1, 0], [], []>} : vector<16x8xbf16>, vector<16x8xbf16>, vector<16x16xf32> -> vector<16x16xf32>
    %cst_72 = arith.constant 0.353553385 : f32
    %215 = vector.broadcast %cst_72 : f32 to vector<16x16xf32>
    %216 = arith.mulf %214, %215 : vector<16x16xf32>
    %cst_73 = arith.constant dense<0xFF800000> : vector<16xf32>
    %217 = vector.multi_reduction <maximumf>, %216, %cst_73 [1] : vector<16x16xf32> to vector<16xf32>
    %218 = vector.shape_cast %217 : vector<16xf32> to vector<16x1xf32>
    %219 = vector.broadcast %218 : vector<16x1xf32> to vector<16x16xf32>
    %220 = arith.subf %216, %219 : vector<16x16xf32>
    %221 = math.exp %220 : vector<16x16xf32>
    %cst_74 = arith.constant dense<0.000000e+00> : vector<16xf32>
    %222 = vector.multi_reduction <add>, %221, %cst_74 [1] : vector<16x16xf32> to vector<16xf32>
    %223 = vector.shape_cast %222 : vector<16xf32> to vector<16x1xf32>
    %224 = tpu.reciprocal %223 {approx = true} : vector<16x1xf32> -> vector<16x1xf32>
    %225 = vector.broadcast %224 : vector<16x1xf32> to vector<16x16xf32>
    %226 = arith.mulf %221, %225 : vector<16x16xf32>
    %227 = arith.truncf %226 : vector<16x16xf32> to vector<16x16xbf16>
    %228 = arith.truncf %211 : vector<16x8xf32> to vector<16x8xbf16>
    %cst_75 = arith.constant dense<0.000000e+00> : vector<16x8xf32>
    %229 = tpu.matmul %227, %228, %cst_75 {dimension_numbers = #tpu.dot_dimension_numbers<[1], [0], [0], [1], [0, 0, 1, 1], [], []>} : vector<16x16xbf16>, vector<16x8xbf16>, vector<16x8xf32> -> vector<16x8xf32>
    %230 = vector.extract_strided_slice %166 {offsets = [0, 24], sizes = [16, 8], strides = [1, 1]} : vector<16x96xf32> to vector<16x8xf32>
    %231 = vector.extract_strided_slice %166 {offsets = [0, 56], sizes = [16, 8], strides = [1, 1]} : vector<16x96xf32> to vector<16x8xf32>
    %232 = vector.extract_strided_slice %166 {offsets = [0, 88], sizes = [16, 8], strides = [1, 1]} : vector<16x96xf32> to vector<16x8xf32>
    %233 = arith.truncf %230 : vector<16x8xf32> to vector<16x8xbf16>
    %234 = arith.truncf %231 : vector<16x8xf32> to vector<16x8xbf16>
    %cst_76 = arith.constant dense<0.000000e+00> : vector<16x16xf32>
    %235 = tpu.matmul %233, %234, %cst_76 {dimension_numbers = #tpu.dot_dimension_numbers<[1], [1], [0], [0], [0, 0, 1, 0], [], []>} : vector<16x8xbf16>, vector<16x8xbf16>, vector<16x16xf32> -> vector<16x16xf32>
    %cst_77 = arith.constant 0.353553385 : f32
    %236 = vector.broadcast %cst_77 : f32 to vector<16x16xf32>
    %237 = arith.mulf %235, %236 : vector<16x16xf32>
    %cst_78 = arith.constant dense<0xFF800000> : vector<16xf32>
    %238 = vector.multi_reduction <maximumf>, %237, %cst_78 [1] : vector<16x16xf32> to vector<16xf32>
    %239 = vector.shape_cast %238 : vector<16xf32> to vector<16x1xf32>
    %240 = vector.broadcast %239 : vector<16x1xf32> to vector<16x16xf32>
    %241 = arith.subf %237, %240 : vector<16x16xf32>
    %242 = math.exp %241 : vector<16x16xf32>
    %cst_79 = arith.constant dense<0.000000e+00> : vector<16xf32>
    %243 = vector.multi_reduction <add>, %242, %cst_79 [1] : vector<16x16xf32> to vector<16xf32>
    %244 = vector.shape_cast %243 : vector<16xf32> to vector<16x1xf32>
    %245 = tpu.reciprocal %244 {approx = true} : vector<16x1xf32> -> vector<16x1xf32>
    %246 = vector.broadcast %245 : vector<16x1xf32> to vector<16x16xf32>
    %247 = arith.mulf %242, %246 : vector<16x16xf32>
    %248 = arith.truncf %247 : vector<16x16xf32> to vector<16x16xbf16>
    %249 = arith.truncf %232 : vector<16x8xf32> to vector<16x8xbf16>
    %cst_80 = arith.constant dense<0.000000e+00> : vector<16x8xf32>
    %250 = tpu.matmul %248, %249, %cst_80 {dimension_numbers = #tpu.dot_dimension_numbers<[1], [0], [0], [1], [0, 0, 1, 1], [], []>} : vector<16x16xbf16>, vector<16x8xbf16>, vector<16x8xf32> -> vector<16x8xf32>
    %251 = tpu.concatenate %187, %208, %229, %250 in 1 : vector<16x8xf32>, vector<16x8xf32>, vector<16x8xf32>, vector<16x8xf32> -> vector<16x32xf32>
    %252 = arith.truncf %251 : vector<16x32xf32> to vector<16x32xbf16>
    %cst_81 = arith.constant dense<0.000000e+00> : vector<16x32xf32>
    %253 = tpu.matmul %252, %4, %cst_81 {dimension_numbers = #tpu.dot_dimension_numbers<[1], [0], [0], [1], [0, 0, 1, 1], [], []>} : vector<16x32xbf16>, vector<32x32xbf16>, vector<16x32xf32> -> vector<16x32xf32>
    %254 = vector.broadcast %5 : vector<1x32xf32> to vector<16x32xf32>
    %255 = arith.addf %253, %254 : vector<16x32xf32>
    %256 = arith.addf %255, %162 : vector<16x32xf32>
    %cst_82 = arith.constant dense<0.000000e+00> : vector<16xf32>
    %257 = vector.multi_reduction <add>, %256, %cst_82 [1] : vector<16x32xf32> to vector<16xf32>
    %258 = vector.shape_cast %257 : vector<16xf32> to vector<16x1xf32>
    %cst_83 = arith.constant 3.200000e+01 : f32
    %259 = vector.broadcast %cst_83 : f32 to vector<16x1xf32>
    %260 = arith.divf %258, %259 : vector<16x1xf32>
    %261 = vector.broadcast %260 : vector<16x1xf32> to vector<16x32xf32>
    %262 = arith.subf %256, %261 : vector<16x32xf32>
    %263 = arith.mulf %262, %262 : vector<16x32xf32>
    %cst_84 = arith.constant dense<0.000000e+00> : vector<16xf32>
    %264 = vector.multi_reduction <add>, %263, %cst_84 [1] : vector<16x32xf32> to vector<16xf32>
    %265 = vector.shape_cast %264 : vector<16xf32> to vector<16x1xf32>
    %cst_85 = arith.constant 3.200000e+01 : f32
    %266 = vector.broadcast %cst_85 : f32 to vector<16x1xf32>
    %267 = arith.divf %265, %266 : vector<16x1xf32>
    %268 = vector.broadcast %260 : vector<16x1xf32> to vector<16x32xf32>
    %269 = arith.subf %256, %268 : vector<16x32xf32>
    %cst_86 = arith.constant 9.99999974E-6 : f32
    %270 = vector.broadcast %cst_86 : f32 to vector<16x1xf32>
    %271 = arith.addf %267, %270 : vector<16x1xf32>
    %272 = math.rsqrt %271 : vector<16x1xf32>
    %273 = vector.broadcast %272 : vector<16x1xf32> to vector<16x32xf32>
    %274 = arith.mulf %269, %273 : vector<16x32xf32>
    %275 = vector.broadcast %6 : vector<1x32xf32> to vector<16x32xf32>
    %276 = arith.mulf %274, %275 : vector<16x32xf32>
    %277 = vector.broadcast %7 : vector<1x32xf32> to vector<16x32xf32>
    %278 = arith.addf %276, %277 : vector<16x32xf32>
    %279 = arith.truncf %278 : vector<16x32xf32> to vector<16x32xbf16>
    %cst_87 = arith.constant dense<0.000000e+00> : vector<16x64xf32>
    %280 = tpu.matmul %279, %8, %cst_87 {dimension_numbers = #tpu.dot_dimension_numbers<[1], [0], [0], [1], [0, 0, 1, 1], [], []>} : vector<16x32xbf16>, vector<32x64xbf16>, vector<16x64xf32> -> vector<16x64xf32>
    %281 = vector.broadcast %9 : vector<1x64xf32> to vector<16x64xf32>
    %282 = arith.addf %280, %281 : vector<16x64xf32>
    %cst_88 = arith.constant 0.000000e+00 : f32
    %283 = vector.broadcast %cst_88 : f32 to vector<16x64xf32>
    %284 = arith.maximumf %282, %283 : vector<16x64xf32>
    %285 = arith.truncf %284 : vector<16x64xf32> to vector<16x64xbf16>
    %cst_89 = arith.constant dense<0.000000e+00> : vector<16x32xf32>
    %286 = tpu.matmul %285, %10, %cst_89 {dimension_numbers = #tpu.dot_dimension_numbers<[1], [0], [0], [1], [0, 0, 1, 1], [], []>} : vector<16x64xbf16>, vector<64x32xbf16>, vector<16x32xf32> -> vector<16x32xf32>
    %287 = vector.broadcast %11 : vector<1x32xf32> to vector<16x32xf32>
    %288 = arith.addf %286, %287 : vector<16x32xf32>
    %289 = arith.addf %288, %278 : vector<16x32xf32>
    %cst_90 = arith.constant dense<0.000000e+00> : vector<16xf32>
    %290 = vector.multi_reduction <add>, %289, %cst_90 [1] : vector<16x32xf32> to vector<16xf32>
    %291 = vector.shape_cast %290 : vector<16xf32> to vector<16x1xf32>
    %cst_91 = arith.constant 3.200000e+01 : f32
    %292 = vector.broadcast %cst_91 : f32 to vector<16x1xf32>
    %293 = arith.divf %291, %292 : vector<16x1xf32>
    %294 = vector.broadcast %293 : vector<16x1xf32> to vector<16x32xf32>
    %295 = arith.subf %289, %294 : vector<16x32xf32>
    %296 = arith.mulf %295, %295 : vector<16x32xf32>
    %cst_92 = arith.constant dense<0.000000e+00> : vector<16xf32>
    %297 = vector.multi_reduction <add>, %296, %cst_92 [1] : vector<16x32xf32> to vector<16xf32>
    %298 = vector.shape_cast %297 : vector<16xf32> to vector<16x1xf32>
    %cst_93 = arith.constant 3.200000e+01 : f32
    %299 = vector.broadcast %cst_93 : f32 to vector<16x1xf32>
    %300 = arith.divf %298, %299 : vector<16x1xf32>
    %301 = vector.broadcast %293 : vector<16x1xf32> to vector<16x32xf32>
    %302 = arith.subf %289, %301 : vector<16x32xf32>
    %cst_94 = arith.constant 9.99999974E-6 : f32
    %303 = vector.broadcast %cst_94 : f32 to vector<16x1xf32>
    %304 = arith.addf %300, %303 : vector<16x1xf32>
    %305 = math.rsqrt %304 : vector<16x1xf32>
    %306 = vector.broadcast %305 : vector<16x1xf32> to vector<16x32xf32>
    %307 = arith.mulf %302, %306 : vector<16x32xf32>
    %308 = vector.broadcast %12 : vector<1x32xf32> to vector<16x32xf32>
    %309 = arith.mulf %307, %308 : vector<16x32xf32>
    %310 = vector.broadcast %13 : vector<1x32xf32> to vector<16x32xf32>
    %311 = arith.addf %309, %310 : vector<16x32xf32>
    %c0_95 = arith.constant 0 : index
    %c0_96 = arith.constant 0 : index
    %c0_97 = arith.constant 0 : index
    %312 = vector.load %arg14[%c0_95, %c0_96, %c0_97] : memref<1x16x32xf32, #tpu.memory_space<vmem>>, vector<1x16x32xf32>
    %313 = vector.shape_cast %312 : vector<1x16x32xf32> to vector<16x32xf32>
    %314 = vector.shape_cast %311 : vector<16x32xf32> to vector<1x16x32xf32>
    tpu.vector_store %arg14[%c0_95, %c0_96, %c0_97], %314 {strides = array<i32>} : memref<1x16x32xf32, #tpu.memory_space<vmem>>, vector<1x16x32xf32>,
    return
  }
  func.func @transform_0(%arg0: i32) -> (i32, i32, i32) {
    %c0_i32 = arith.constant 0 : i32
    %c0_i32_0 = arith.constant 0 : i32
    %c0_i32_1 = arith.constant 0 : i32
    return %arg0, %c0_i32, %c0_i32_0 : i32, i32, i32
  }
  func.func @transform_1(%arg0: i32) -> (i32, i32) {
    %c0_i32 = arith.constant 0 : i32
    %c0_i32_0 = arith.constant 0 : i32
    %c0_i32_1 = arith.constant 0 : i32
    return %c0_i32, %c0_i32_0 : i32, i32
  }
  func.func @transform_2(%arg0: i32) -> (i32, i32) {
    %c0_i32 = arith.constant 0 : i32
    %c0_i32_0 = arith.constant 0 : i32
    %c0_i32_1 = arith.constant 0 : i32
    return %c0_i32, %c0_i32_0 : i32, i32
  }
  func.func @transform_3(%arg0: i32) -> (i32, i32) {
    %c0_i32 = arith.constant 0 : i32
    %c0_i32_0 = arith.constant 0 : i32
    %c0_i32_1 = arith.constant 0 : i32
    return %c0_i32, %c0_i32_0 : i32, i32
  }
  func.func @transform_4(%arg0: i32) -> (i32, i32) {
    %c0_i32 = arith.constant 0 : i32
    %c0_i32_0 = arith.constant 0 : i32
    %c0_i32_1 = arith.constant 0 : i32
    return %c0_i32, %c0_i32_0 : i32, i32
  }
  func.func @transform_5(%arg0: i32) -> (i32, i32) {
    %c0_i32 = arith.constant 0 : i32
    %c0_i32_0 = arith.constant 0 : i32
    %c0_i32_1 = arith.constant 0 : i32
    return %c0_i32, %c0_i32_0 : i32, i32
  }
  func.func @transform_6(%arg0: i32) -> (i32, i32) {
    %c0_i32 = arith.constant 0 : i32
    %c0_i32_0 = arith.constant 0 : i32
    %c0_i32_1 = arith.constant 0 : i32
    return %c0_i32, %c0_i32_0 : i32, i32
  }
  func.func @transform_7(%arg0: i32) -> (i32, i32) {
    %c0_i32 = arith.constant 0 : i32
    %c0_i32_0 = arith.constant 0 : i32
    %c0_i32_1 = arith.constant 0 : i32
    return %c0_i32, %c0_i32_0 : i32, i32
  }
  func.func @transform_8(%arg0: i32) -> (i32, i32) {
    %c0_i32 = arith.constant 0 : i32
    %c0_i32_0 = arith.constant 0 : i32
    %c0_i32_1 = arith.constant 0 : i32
    return %c0_i32, %c0_i32_0 : i32, i32
  }
  func.func @transform_9(%arg0: i32) -> (i32, i32) {
    %c0_i32 = arith.constant 0 : i32
    %c0_i32_0 = arith.constant 0 : i32
    %c0_i32_1 = arith.constant 0 : i32
    return %c0_i32, %c0_i32_0 : i32, i32
  }
  func.func @transform_10(%arg0: i32) -> (i32, i32) {
    %c0_i32 = arith.constant 0 : i32
    %c0_i32_0 = arith.constant 0 : i32
    %c0_i32_1 = arith.constant 0 : i32
    return %c0_i32, %c0_i32_0 : i32, i32
  }
  func.func @transform_11(%arg0: i32) -> (i32, i32) {
    %c0_i32 = arith.constant 0 : i32
    %c0_i32_0 = arith.constant 0 : i32
    %c0_i32_1 = arith.constant 0 : i32
    return %c0_i32, %c0_i32_0 : i32, i32
  }
  func.func @transform_12(%arg0: i32) -> (i32, i32) {
    %c0_i32 = arith.constant 0 : i32
    %c0_i32_0 = arith.constant 0 : i32
    %c0_i32_1 = arith.constant 0 : i32
    return %c0_i32, %c0_i32_0 : i32, i32
  }
  func.func @transform_13(%arg0: i32) -> (i32, i32, i32) {
    %c0_i32 = arith.constant 0 : i32
    %c0_i32_0 = arith.constant 0 : i32
    %c0_i32_1 = arith.constant 0 : i32
    return %arg0, %c0_i32, %c0_i32_0 : i32, i32, i32
  }
}

module attributes {stable_mosaic.version = 11 : i64} {
  func.func @_decoder_kernel(%arg0: i32, %arg1: memref<1x8x32xf32, #tpu.memory_space<vmem>>, %arg2: memref<1x16x32xf32, #tpu.memory_space<vmem>>, %arg3: memref<1x1x8xf32, #tpu.memory_space<vmem>>, %arg4: memref<32x96xbf16, #tpu.memory_space<vmem>>, %arg5: memref<1x96xf32, #tpu.memory_space<vmem>>, %arg6: memref<32x32xbf16, #tpu.memory_space<vmem>>, %arg7: memref<1x32xf32, #tpu.memory_space<vmem>>, %arg8: memref<1x32xf32, #tpu.memory_space<vmem>>, %arg9: memref<1x32xf32, #tpu.memory_space<vmem>>, %arg10: memref<32x32xbf16, #tpu.memory_space<vmem>>, %arg11: memref<1x32xf32, #tpu.memory_space<vmem>>, %arg12: memref<32x64xbf16, #tpu.memory_space<vmem>>, %arg13: memref<1x64xf32, #tpu.memory_space<vmem>>, %arg14: memref<32x32xbf16, #tpu.memory_space<vmem>>, %arg15: memref<1x32xf32, #tpu.memory_space<vmem>>, %arg16: memref<1x32xf32, #tpu.memory_space<vmem>>, %arg17: memref<1x32xf32, #tpu.memory_space<vmem>>, %arg18: memref<32x64xbf16, #tpu.memory_space<vmem>>, %arg19: memref<1x64xf32, #tpu.memory_space<vmem>>, %arg20: memref<64x32xbf16, #tpu.memory_space<vmem>>, %arg21: memref<1x32xf32, #tpu.memory_space<vmem>>, %arg22: memref<1x32xf32, #tpu.memory_space<vmem>>, %arg23: memref<1x32xf32, #tpu.memory_space<vmem>>, %arg24: memref<32x128xbf16, #tpu.memory_space<vmem>>, %arg25: memref<1x8x128xf32, #tpu.memory_space<vmem>>, %arg26: memref<2x1x8x64xf32, #tpu.memory_space<vmem>>) attributes {dimension_semantics = [#tpu.dimension_semantics<parallel>], iteration_bounds = array<i64: 2>, scalar_prefetch = 0 : i64, scratch_operands = 0 : i64, tpu.core_type = #tpu.core_type<tc>, window_params = [{transform_indices = @transform_0, window_bounds = array<i64: 1, 8, 32>}, {transform_indices = @transform_1, window_bounds = array<i64: 1, 16, 32>}, {transform_indices = @transform_2, window_bounds = array<i64: 1, 1, 8>}, {pipeline_mode = #tpu.pipeline_mode<synchronous>, transform_indices = @transform_3, window_bounds = array<i64: 32, 96>}, {pipeline_mode = #tpu.pipeline_mode<synchronous>, transform_indices = @transform_4, window_bounds = array<i64: 1, 96>}, {pipeline_mode = #tpu.pipeline_mode<synchronous>, transform_indices = @transform_5, window_bounds = array<i64: 32, 32>}, {pipeline_mode = #tpu.pipeline_mode<synchronous>, transform_indices = @transform_6, window_bounds = array<i64: 1, 32>}, {pipeline_mode = #tpu.pipeline_mode<synchronous>, transform_indices = @transform_7, window_bounds = array<i64: 1, 32>}, {pipeline_mode = #tpu.pipeline_mode<synchronous>, transform_indices = @transform_8, window_bounds = array<i64: 1, 32>}, {pipeline_mode = #tpu.pipeline_mode<synchronous>, transform_indices = @transform_9, window_bounds = array<i64: 32, 32>}, {pipeline_mode = #tpu.pipeline_mode<synchronous>, transform_indices = @transform_10, window_bounds = array<i64: 1, 32>}, {pipeline_mode = #tpu.pipeline_mode<synchronous>, transform_indices = @transform_11, window_bounds = array<i64: 32, 64>}, {pipeline_mode = #tpu.pipeline_mode<synchronous>, transform_indices = @transform_12, window_bounds = array<i64: 1, 64>}, {pipeline_mode = #tpu.pipeline_mode<synchronous>, transform_indices = @transform_13, window_bounds = array<i64: 32, 32>}, {pipeline_mode = #tpu.pipeline_mode<synchronous>, transform_indices = @transform_14, window_bounds = array<i64: 1, 32>}, {pipeline_mode = #tpu.pipeline_mode<synchronous>, transform_indices = @transform_15, window_bounds = array<i64: 1, 32>}, {pipeline_mode = #tpu.pipeline_mode<synchronous>, transform_indices = @transform_16, window_bounds = array<i64: 1, 32>}, {pipeline_mode = #tpu.pipeline_mode<synchronous>, transform_indices = @transform_17, window_bounds = array<i64: 32, 64>}, {pipeline_mode = #tpu.pipeline_mode<synchronous>, transform_indices = @transform_18, window_bounds = array<i64: 1, 64>}, {pipeline_mode = #tpu.pipeline_mode<synchronous>, transform_indices = @transform_19, window_bounds = array<i64: 64, 32>}, {pipeline_mode = #tpu.pipeline_mode<synchronous>, transform_indices = @transform_20, window_bounds = array<i64: 1, 32>}, {pipeline_mode = #tpu.pipeline_mode<synchronous>, transform_indices = @transform_21, window_bounds = array<i64: 1, 32>}, {pipeline_mode = #tpu.pipeline_mode<synchronous>, transform_indices = @transform_22, window_bounds = array<i64: 1, 32>}, {pipeline_mode = #tpu.pipeline_mode<synchronous>, transform_indices = @transform_23, window_bounds = array<i64: 32, 128>}, {transform_indices = @transform_24, window_bounds = array<i64: 1, 8, 128>}, {transform_indices = @transform_25, window_bounds = array<i64: 2, 1, 8, 64>}]} {
    %c0 = arith.constant 0 : index
    %c0_0 = arith.constant 0 : index
    %c0_1 = arith.constant 0 : index
    %0 = vector.load %arg1[%c0, %c0_0, %c0_1] : memref<1x8x32xf32, #tpu.memory_space<vmem>>, vector<1x8x32xf32>
    %1 = vector.shape_cast %0 : vector<1x8x32xf32> to vector<8x32xf32>
    %c0_2 = arith.constant 0 : index
    %c0_3 = arith.constant 0 : index
    %c0_4 = arith.constant 0 : index
    %2 = vector.load %arg2[%c0_2, %c0_3, %c0_4] : memref<1x16x32xf32, #tpu.memory_space<vmem>>, vector<1x16x32xf32>
    %3 = vector.shape_cast %2 : vector<1x16x32xf32> to vector<16x32xf32>
    %c0_5 = arith.constant 0 : index
    %c0_6 = arith.constant 0 : index
    %c0_7 = arith.constant 0 : index
    %4 = vector.load %arg3[%c0_5, %c0_6, %c0_7] : memref<1x1x8xf32, #tpu.memory_space<vmem>>, vector<1x1x8xf32>
    %5 = vector.shape_cast %4 : vector<1x1x8xf32> to vector<1x8xf32>
    %6 = tpu.iota {dimensions = array<i32: 0>} : vector<8x8xi32>
    %7 = tpu.iota {dimensions = array<i32: 1>} : vector<8x8xi32>
    %8 = arith.cmpi sgt, %7, %6 : vector<8x8xi32>
    %cst = arith.constant -1.000000e+09 : f32
    %cst_8 = arith.constant 0.000000e+00 : f32
    %9 = vector.broadcast %cst : f32 to vector<8x8xf32>
    %10 = vector.broadcast %cst_8 : f32 to vector<8x8xf32>
    %11 = arith.select %8, %9, %10 : vector<8x8xi1>, vector<8x8xf32>
    %12 = vector.broadcast %5 : vector<1x8xf32> to vector<8x8xf32>
    %13 = arith.addf %11, %12 : vector<8x8xf32>
    %c0_9 = arith.constant 0 : index
    %c0_10 = arith.constant 0 : index
    %14 = vector.load %arg12[%c0_9, %c0_10] : memref<32x64xbf16, #tpu.memory_space<vmem>>, vector<32x64xbf16>
    %15 = arith.truncf %3 : vector<16x32xf32> to vector<16x32xbf16>
    %cst_11 = arith.constant dense<0.000000e+00> : vector<16x64xf32>
    %16 = tpu.matmul %15, %14, %cst_11 {dimension_numbers = #tpu.dot_dimension_numbers<[1], [0], [0], [1], [0, 0, 1, 1], [], []>} : vector<16x32xbf16>, vector<32x64xbf16>, vector<16x64xf32> -> vector<16x64xf32>
    %c0_12 = arith.constant 0 : index
    %c0_13 = arith.constant 0 : index
    %17 = vector.load %arg13[%c0_12, %c0_13] : memref<1x64xf32, #tpu.memory_space<vmem>>, vector<1x64xf32>
    %18 = vector.broadcast %17 : vector<1x64xf32> to vector<16x64xf32>
    %19 = arith.addf %16, %18 : vector<16x64xf32>
    %c0_14 = arith.constant 0 : index
    %c0_15 = arith.constant 0 : index
    %20 = vector.load %arg4[%c0_14, %c0_15] : memref<32x96xbf16, #tpu.memory_space<vmem>>, vector<32x96xbf16>
    %21 = arith.truncf %1 : vector<8x32xf32> to vector<8x32xbf16>
    %cst_16 = arith.constant dense<0.000000e+00> : vector<8x96xf32>
    %22 = tpu.matmul %21, %20, %cst_16 {dimension_numbers = #tpu.dot_dimension_numbers<[1], [0], [0], [1], [0, 0, 1, 1], [], []>} : vector<8x32xbf16>, vector<32x96xbf16>, vector<8x96xf32> -> vector<8x96xf32>
    %c0_17 = arith.constant 0 : index
    %c0_18 = arith.constant 0 : index
    %23 = vector.load %arg5[%c0_17, %c0_18] : memref<1x96xf32, #tpu.memory_space<vmem>>, vector<1x96xf32>
    %24 = vector.broadcast %23 : vector<1x96xf32> to vector<8x96xf32>
    %25 = arith.addf %22, %24 : vector<8x96xf32>
    %26 = vector.extract_strided_slice %25 {offsets = [0, 0], sizes = [8, 8], strides = [1, 1]} : vector<8x96xf32> to vector<8x8xf32>
    %27 = vector.extract_strided_slice %25 {offsets = [0, 32], sizes = [8, 8], strides = [1, 1]} : vector<8x96xf32> to vector<8x8xf32>
    %28 = vector.extract_strided_slice %25 {offsets = [0, 64], sizes = [8, 8], strides = [1, 1]} : vector<8x96xf32> to vector<8x8xf32>
    %29 = arith.truncf %26 : vector<8x8xf32> to vector<8x8xbf16>
    %30 = arith.truncf %27 : vector<8x8xf32> to vector<8x8xbf16>
    %cst_19 = arith.constant dense<0.000000e+00> : vector<8x8xf32>
    %31 = tpu.matmul %29, %30, %cst_19 {dimension_numbers = #tpu.dot_dimension_numbers<[1], [1], [0], [0], [0, 0, 1, 0], [], []>} : vector<8x8xbf16>, vector<8x8xbf16>, vector<8x8xf32> -> vector<8x8xf32>
    %cst_20 = arith.constant 0.353553385 : f32
    %32 = vector.broadcast %cst_20 : f32 to vector<8x8xf32>
    %33 = arith.mulf %31, %32 : vector<8x8xf32>
    %34 = arith.addf %33, %13 : vector<8x8xf32>
    %cst_21 = arith.constant dense<0xFF800000> : vector<8xf32>
    %35 = vector.multi_reduction <maximumf>, %34, %cst_21 [1] : vector<8x8xf32> to vector<8xf32>
    %36 = vector.shape_cast %35 : vector<8xf32> to vector<8x1xf32>
    %37 = vector.broadcast %36 : vector<8x1xf32> to vector<8x8xf32>
    %38 = arith.subf %34, %37 : vector<8x8xf32>
    %39 = math.exp %38 : vector<8x8xf32>
    %cst_22 = arith.constant dense<0.000000e+00> : vector<8xf32>
    %40 = vector.multi_reduction <add>, %39, %cst_22 [1] : vector<8x8xf32> to vector<8xf32>
    %41 = vector.shape_cast %40 : vector<8xf32> to vector<8x1xf32>
    %42 = tpu.reciprocal %41 {approx = true} : vector<8x1xf32> -> vector<8x1xf32>
    %43 = vector.broadcast %42 : vector<8x1xf32> to vector<8x8xf32>
    %44 = arith.mulf %39, %43 : vector<8x8xf32>
    %45 = arith.truncf %44 : vector<8x8xf32> to vector<8x8xbf16>
    %46 = arith.truncf %28 : vector<8x8xf32> to vector<8x8xbf16>
    %cst_23 = arith.constant dense<0.000000e+00> : vector<8x8xf32>
    %47 = tpu.matmul %45, %46, %cst_23 {dimension_numbers = #tpu.dot_dimension_numbers<[1], [0], [0], [1], [0, 0, 1, 1], [], []>} : vector<8x8xbf16>, vector<8x8xbf16>, vector<8x8xf32> -> vector<8x8xf32>
    %48 = vector.extract_strided_slice %25 {offsets = [0, 8], sizes = [8, 8], strides = [1, 1]} : vector<8x96xf32> to vector<8x8xf32>
    %49 = vector.extract_strided_slice %25 {offsets = [0, 40], sizes = [8, 8], strides = [1, 1]} : vector<8x96xf32> to vector<8x8xf32>
    %50 = vector.extract_strided_slice %25 {offsets = [0, 72], sizes = [8, 8], strides = [1, 1]} : vector<8x96xf32> to vector<8x8xf32>
    %51 = arith.truncf %48 : vector<8x8xf32> to vector<8x8xbf16>
    %52 = arith.truncf %49 : vector<8x8xf32> to vector<8x8xbf16>
    %cst_24 = arith.constant dense<0.000000e+00> : vector<8x8xf32>
    %53 = tpu.matmul %51, %52, %cst_24 {dimension_numbers = #tpu.dot_dimension_numbers<[1], [1], [0], [0], [0, 0, 1, 0], [], []>} : vector<8x8xbf16>, vector<8x8xbf16>, vector<8x8xf32> -> vector<8x8xf32>
    %cst_25 = arith.constant 0.353553385 : f32
    %54 = vector.broadcast %cst_25 : f32 to vector<8x8xf32>
    %55 = arith.mulf %53, %54 : vector<8x8xf32>
    %56 = arith.addf %55, %13 : vector<8x8xf32>
    %cst_26 = arith.constant dense<0xFF800000> : vector<8xf32>
    %57 = vector.multi_reduction <maximumf>, %56, %cst_26 [1] : vector<8x8xf32> to vector<8xf32>
    %58 = vector.shape_cast %57 : vector<8xf32> to vector<8x1xf32>
    %59 = vector.broadcast %58 : vector<8x1xf32> to vector<8x8xf32>
    %60 = arith.subf %56, %59 : vector<8x8xf32>
    %61 = math.exp %60 : vector<8x8xf32>
    %cst_27 = arith.constant dense<0.000000e+00> : vector<8xf32>
    %62 = vector.multi_reduction <add>, %61, %cst_27 [1] : vector<8x8xf32> to vector<8xf32>
    %63 = vector.shape_cast %62 : vector<8xf32> to vector<8x1xf32>
    %64 = tpu.reciprocal %63 {approx = true} : vector<8x1xf32> -> vector<8x1xf32>
    %65 = vector.broadcast %64 : vector<8x1xf32> to vector<8x8xf32>
    %66 = arith.mulf %61, %65 : vector<8x8xf32>
    %67 = arith.truncf %66 : vector<8x8xf32> to vector<8x8xbf16>
    %68 = arith.truncf %50 : vector<8x8xf32> to vector<8x8xbf16>
    %cst_28 = arith.constant dense<0.000000e+00> : vector<8x8xf32>
    %69 = tpu.matmul %67, %68, %cst_28 {dimension_numbers = #tpu.dot_dimension_numbers<[1], [0], [0], [1], [0, 0, 1, 1], [], []>} : vector<8x8xbf16>, vector<8x8xbf16>, vector<8x8xf32> -> vector<8x8xf32>
    %70 = vector.extract_strided_slice %25 {offsets = [0, 16], sizes = [8, 8], strides = [1, 1]} : vector<8x96xf32> to vector<8x8xf32>
    %71 = vector.extract_strided_slice %25 {offsets = [0, 48], sizes = [8, 8], strides = [1, 1]} : vector<8x96xf32> to vector<8x8xf32>
    %72 = vector.extract_strided_slice %25 {offsets = [0, 80], sizes = [8, 8], strides = [1, 1]} : vector<8x96xf32> to vector<8x8xf32>
    %73 = arith.truncf %70 : vector<8x8xf32> to vector<8x8xbf16>
    %74 = arith.truncf %71 : vector<8x8xf32> to vector<8x8xbf16>
    %cst_29 = arith.constant dense<0.000000e+00> : vector<8x8xf32>
    %75 = tpu.matmul %73, %74, %cst_29 {dimension_numbers = #tpu.dot_dimension_numbers<[1], [1], [0], [0], [0, 0, 1, 0], [], []>} : vector<8x8xbf16>, vector<8x8xbf16>, vector<8x8xf32> -> vector<8x8xf32>
    %cst_30 = arith.constant 0.353553385 : f32
    %76 = vector.broadcast %cst_30 : f32 to vector<8x8xf32>
    %77 = arith.mulf %75, %76 : vector<8x8xf32>
    %78 = arith.addf %77, %13 : vector<8x8xf32>
    %cst_31 = arith.constant dense<0xFF800000> : vector<8xf32>
    %79 = vector.multi_reduction <maximumf>, %78, %cst_31 [1] : vector<8x8xf32> to vector<8xf32>
    %80 = vector.shape_cast %79 : vector<8xf32> to vector<8x1xf32>
    %81 = vector.broadcast %80 : vector<8x1xf32> to vector<8x8xf32>
    %82 = arith.subf %78, %81 : vector<8x8xf32>
    %83 = math.exp %82 : vector<8x8xf32>
    %cst_32 = arith.constant dense<0.000000e+00> : vector<8xf32>
    %84 = vector.multi_reduction <add>, %83, %cst_32 [1] : vector<8x8xf32> to vector<8xf32>
    %85 = vector.shape_cast %84 : vector<8xf32> to vector<8x1xf32>
    %86 = tpu.reciprocal %85 {approx = true} : vector<8x1xf32> -> vector<8x1xf32>
    %87 = vector.broadcast %86 : vector<8x1xf32> to vector<8x8xf32>
    %88 = arith.mulf %83, %87 : vector<8x8xf32>
    %89 = arith.truncf %88 : vector<8x8xf32> to vector<8x8xbf16>
    %90 = arith.truncf %72 : vector<8x8xf32> to vector<8x8xbf16>
    %cst_33 = arith.constant dense<0.000000e+00> : vector<8x8xf32>
    %91 = tpu.matmul %89, %90, %cst_33 {dimension_numbers = #tpu.dot_dimension_numbers<[1], [0], [0], [1], [0, 0, 1, 1], [], []>} : vector<8x8xbf16>, vector<8x8xbf16>, vector<8x8xf32> -> vector<8x8xf32>
    %92 = vector.extract_strided_slice %25 {offsets = [0, 24], sizes = [8, 8], strides = [1, 1]} : vector<8x96xf32> to vector<8x8xf32>
    %93 = vector.extract_strided_slice %25 {offsets = [0, 56], sizes = [8, 8], strides = [1, 1]} : vector<8x96xf32> to vector<8x8xf32>
    %94 = vector.extract_strided_slice %25 {offsets = [0, 88], sizes = [8, 8], strides = [1, 1]} : vector<8x96xf32> to vector<8x8xf32>
    %95 = arith.truncf %92 : vector<8x8xf32> to vector<8x8xbf16>
    %96 = arith.truncf %93 : vector<8x8xf32> to vector<8x8xbf16>
    %cst_34 = arith.constant dense<0.000000e+00> : vector<8x8xf32>
    %97 = tpu.matmul %95, %96, %cst_34 {dimension_numbers = #tpu.dot_dimension_numbers<[1], [1], [0], [0], [0, 0, 1, 0], [], []>} : vector<8x8xbf16>, vector<8x8xbf16>, vector<8x8xf32> -> vector<8x8xf32>
    %cst_35 = arith.constant 0.353553385 : f32
    %98 = vector.broadcast %cst_35 : f32 to vector<8x8xf32>
    %99 = arith.mulf %97, %98 : vector<8x8xf32>
    %100 = arith.addf %99, %13 : vector<8x8xf32>
    %cst_36 = arith.constant dense<0xFF800000> : vector<8xf32>
    %101 = vector.multi_reduction <maximumf>, %100, %cst_36 [1] : vector<8x8xf32> to vector<8xf32>
    %102 = vector.shape_cast %101 : vector<8xf32> to vector<8x1xf32>
    %103 = vector.broadcast %102 : vector<8x1xf32> to vector<8x8xf32>
    %104 = arith.subf %100, %103 : vector<8x8xf32>
    %105 = math.exp %104 : vector<8x8xf32>
    %cst_37 = arith.constant dense<0.000000e+00> : vector<8xf32>
    %106 = vector.multi_reduction <add>, %105, %cst_37 [1] : vector<8x8xf32> to vector<8xf32>
    %107 = vector.shape_cast %106 : vector<8xf32> to vector<8x1xf32>
    %108 = tpu.reciprocal %107 {approx = true} : vector<8x1xf32> -> vector<8x1xf32>
    %109 = vector.broadcast %108 : vector<8x1xf32> to vector<8x8xf32>
    %110 = arith.mulf %105, %109 : vector<8x8xf32>
    %111 = arith.truncf %110 : vector<8x8xf32> to vector<8x8xbf16>
    %112 = arith.truncf %94 : vector<8x8xf32> to vector<8x8xbf16>
    %cst_38 = arith.constant dense<0.000000e+00> : vector<8x8xf32>
    %113 = tpu.matmul %111, %112, %cst_38 {dimension_numbers = #tpu.dot_dimension_numbers<[1], [0], [0], [1], [0, 0, 1, 1], [], []>} : vector<8x8xbf16>, vector<8x8xbf16>, vector<8x8xf32> -> vector<8x8xf32>
    %114 = tpu.concatenate %47, %69, %91, %113 in 1 : vector<8x8xf32>, vector<8x8xf32>, vector<8x8xf32>, vector<8x8xf32> -> vector<8x32xf32>
    %c0_39 = arith.constant 0 : index
    %c0_40 = arith.constant 0 : index
    %115 = vector.load %arg6[%c0_39, %c0_40] : memref<32x32xbf16, #tpu.memory_space<vmem>>, vector<32x32xbf16>
    %116 = arith.truncf %114 : vector<8x32xf32> to vector<8x32xbf16>
    %cst_41 = arith.constant dense<0.000000e+00> : vector<8x32xf32>
    %117 = tpu.matmul %116, %115, %cst_41 {dimension_numbers = #tpu.dot_dimension_numbers<[1], [0], [0], [1], [0, 0, 1, 1], [], []>} : vector<8x32xbf16>, vector<32x32xbf16>, vector<8x32xf32> -> vector<8x32xf32>
    %c0_42 = arith.constant 0 : index
    %c0_43 = arith.constant 0 : index
    %118 = vector.load %arg7[%c0_42, %c0_43] : memref<1x32xf32, #tpu.memory_space<vmem>>, vector<1x32xf32>
    %119 = vector.broadcast %118 : vector<1x32xf32> to vector<8x32xf32>
    %120 = arith.addf %117, %119 : vector<8x32xf32>
    %121 = arith.addf %120, %1 : vector<8x32xf32>
    %c0_44 = arith.constant 0 : index
    %c0_45 = arith.constant 0 : index
    %122 = vector.load %arg8[%c0_44, %c0_45] : memref<1x32xf32, #tpu.memory_space<vmem>>, vector<1x32xf32>
    %c0_46 = arith.constant 0 : index
    %c0_47 = arith.constant 0 : index
    %123 = vector.load %arg9[%c0_46, %c0_47] : memref<1x32xf32, #tpu.memory_space<vmem>>, vector<1x32xf32>
    %cst_48 = arith.constant dense<0.000000e+00> : vector<8xf32>
    %124 = vector.multi_reduction <add>, %121, %cst_48 [1] : vector<8x32xf32> to vector<8xf32>
    %125 = vector.shape_cast %124 : vector<8xf32> to vector<8x1xf32>
    %cst_49 = arith.constant 3.200000e+01 : f32
    %126 = vector.broadcast %cst_49 : f32 to vector<8x1xf32>
    %127 = arith.divf %125, %126 : vector<8x1xf32>
    %128 = vector.broadcast %127 : vector<8x1xf32> to vector<8x32xf32>
    %129 = arith.subf %121, %128 : vector<8x32xf32>
    %130 = arith.mulf %129, %129 : vector<8x32xf32>
    %cst_50 = arith.constant dense<0.000000e+00> : vector<8xf32>
    %131 = vector.multi_reduction <add>, %130, %cst_50 [1] : vector<8x32xf32> to vector<8xf32>
    %132 = vector.shape_cast %131 : vector<8xf32> to vector<8x1xf32>
    %cst_51 = arith.constant 3.200000e+01 : f32
    %133 = vector.broadcast %cst_51 : f32 to vector<8x1xf32>
    %134 = arith.divf %132, %133 : vector<8x1xf32>
    %135 = vector.broadcast %127 : vector<8x1xf32> to vector<8x32xf32>
    %136 = arith.subf %121, %135 : vector<8x32xf32>
    %cst_52 = arith.constant 9.99999974E-6 : f32
    %137 = vector.broadcast %cst_52 : f32 to vector<8x1xf32>
    %138 = arith.addf %134, %137 : vector<8x1xf32>
    %139 = math.rsqrt %138 : vector<8x1xf32>
    %140 = vector.broadcast %139 : vector<8x1xf32> to vector<8x32xf32>
    %141 = arith.mulf %136, %140 : vector<8x32xf32>
    %142 = vector.broadcast %122 : vector<1x32xf32> to vector<8x32xf32>
    %143 = arith.mulf %141, %142 : vector<8x32xf32>
    %144 = vector.broadcast %123 : vector<1x32xf32> to vector<8x32xf32>
    %145 = arith.addf %143, %144 : vector<8x32xf32>
    %c0_53 = arith.constant 0 : index
    %c0_54 = arith.constant 0 : index
    %146 = vector.load %arg10[%c0_53, %c0_54] : memref<32x32xbf16, #tpu.memory_space<vmem>>, vector<32x32xbf16>
    %147 = arith.truncf %145 : vector<8x32xf32> to vector<8x32xbf16>
    %cst_55 = arith.constant dense<0.000000e+00> : vector<8x32xf32>
    %148 = tpu.matmul %147, %146, %cst_55 {dimension_numbers = #tpu.dot_dimension_numbers<[1], [0], [0], [1], [0, 0, 1, 1], [], []>} : vector<8x32xbf16>, vector<32x32xbf16>, vector<8x32xf32> -> vector<8x32xf32>
    %c0_56 = arith.constant 0 : index
    %c0_57 = arith.constant 0 : index
    %149 = vector.load %arg11[%c0_56, %c0_57] : memref<1x32xf32, #tpu.memory_space<vmem>>, vector<1x32xf32>
    %150 = vector.broadcast %149 : vector<1x32xf32> to vector<8x32xf32>
    %151 = arith.addf %148, %150 : vector<8x32xf32>
    %152 = vector.extract_strided_slice %151 {offsets = [0, 0], sizes = [8, 8], strides = [1, 1]} : vector<8x32xf32> to vector<8x8xf32>
    %153 = vector.extract_strided_slice %19 {offsets = [0, 0], sizes = [16, 8], strides = [1, 1]} : vector<16x64xf32> to vector<16x8xf32>
    %154 = vector.extract_strided_slice %19 {offsets = [0, 32], sizes = [16, 8], strides = [1, 1]} : vector<16x64xf32> to vector<16x8xf32>
    %155 = arith.truncf %152 : vector<8x8xf32> to vector<8x8xbf16>
    %156 = arith.truncf %153 : vector<16x8xf32> to vector<16x8xbf16>
    %cst_58 = arith.constant dense<0.000000e+00> : vector<8x16xf32>
    %157 = tpu.matmul %155, %156, %cst_58 {dimension_numbers = #tpu.dot_dimension_numbers<[1], [1], [0], [0], [0, 0, 1, 0], [], []>} : vector<8x8xbf16>, vector<16x8xbf16>, vector<8x16xf32> -> vector<8x16xf32>
    %cst_59 = arith.constant 0.353553385 : f32
    %158 = vector.broadcast %cst_59 : f32 to vector<8x16xf32>
    %159 = arith.mulf %157, %158 : vector<8x16xf32>
    %cst_60 = arith.constant dense<0xFF800000> : vector<8xf32>
    %160 = vector.multi_reduction <maximumf>, %159, %cst_60 [1] : vector<8x16xf32> to vector<8xf32>
    %161 = vector.shape_cast %160 : vector<8xf32> to vector<8x1xf32>
    %162 = vector.broadcast %161 : vector<8x1xf32> to vector<8x16xf32>
    %163 = arith.subf %159, %162 : vector<8x16xf32>
    %164 = math.exp %163 : vector<8x16xf32>
    %cst_61 = arith.constant dense<0.000000e+00> : vector<8xf32>
    %165 = vector.multi_reduction <add>, %164, %cst_61 [1] : vector<8x16xf32> to vector<8xf32>
    %166 = vector.shape_cast %165 : vector<8xf32> to vector<8x1xf32>
    %167 = vector.broadcast %166 : vector<8x1xf32> to vector<8x16xf32>
    %168 = arith.divf %164, %167 : vector<8x16xf32>
    %169 = arith.truncf %168 : vector<8x16xf32> to vector<8x16xbf16>
    %170 = arith.truncf %154 : vector<16x8xf32> to vector<16x8xbf16>
    %cst_62 = arith.constant dense<0.000000e+00> : vector<8x8xf32>
    %171 = tpu.matmul %169, %170, %cst_62 {dimension_numbers = #tpu.dot_dimension_numbers<[1], [0], [0], [1], [0, 0, 1, 1], [], []>} : vector<8x16xbf16>, vector<16x8xbf16>, vector<8x8xf32> -> vector<8x8xf32>
    %172 = vector.extract_strided_slice %151 {offsets = [0, 8], sizes = [8, 8], strides = [1, 1]} : vector<8x32xf32> to vector<8x8xf32>
    %173 = vector.extract_strided_slice %19 {offsets = [0, 8], sizes = [16, 8], strides = [1, 1]} : vector<16x64xf32> to vector<16x8xf32>
    %174 = vector.extract_strided_slice %19 {offsets = [0, 40], sizes = [16, 8], strides = [1, 1]} : vector<16x64xf32> to vector<16x8xf32>
    %175 = arith.truncf %172 : vector<8x8xf32> to vector<8x8xbf16>
    %176 = arith.truncf %173 : vector<16x8xf32> to vector<16x8xbf16>
    %cst_63 = arith.constant dense<0.000000e+00> : vector<8x16xf32>
    %177 = tpu.matmul %175, %176, %cst_63 {dimension_numbers = #tpu.dot_dimension_numbers<[1], [1], [0], [0], [0, 0, 1, 0], [], []>} : vector<8x8xbf16>, vector<16x8xbf16>, vector<8x16xf32> -> vector<8x16xf32>
    %cst_64 = arith.constant 0.353553385 : f32
    %178 = vector.broadcast %cst_64 : f32 to vector<8x16xf32>
    %179 = arith.mulf %177, %178 : vector<8x16xf32>
    %cst_65 = arith.constant dense<0xFF800000> : vector<8xf32>
    %180 = vector.multi_reduction <maximumf>, %179, %cst_65 [1] : vector<8x16xf32> to vector<8xf32>
    %181 = vector.shape_cast %180 : vector<8xf32> to vector<8x1xf32>
    %182 = vector.broadcast %181 : vector<8x1xf32> to vector<8x16xf32>
    %183 = arith.subf %179, %182 : vector<8x16xf32>
    %184 = math.exp %183 : vector<8x16xf32>
    %cst_66 = arith.constant dense<0.000000e+00> : vector<8xf32>
    %185 = vector.multi_reduction <add>, %184, %cst_66 [1] : vector<8x16xf32> to vector<8xf32>
    %186 = vector.shape_cast %185 : vector<8xf32> to vector<8x1xf32>
    %187 = vector.broadcast %186 : vector<8x1xf32> to vector<8x16xf32>
    %188 = arith.divf %184, %187 : vector<8x16xf32>
    %189 = arith.truncf %188 : vector<8x16xf32> to vector<8x16xbf16>
    %190 = arith.truncf %174 : vector<16x8xf32> to vector<16x8xbf16>
    %cst_67 = arith.constant dense<0.000000e+00> : vector<8x8xf32>
    %191 = tpu.matmul %189, %190, %cst_67 {dimension_numbers = #tpu.dot_dimension_numbers<[1], [0], [0], [1], [0, 0, 1, 1], [], []>} : vector<8x16xbf16>, vector<16x8xbf16>, vector<8x8xf32> -> vector<8x8xf32>
    %192 = vector.extract_strided_slice %151 {offsets = [0, 16], sizes = [8, 8], strides = [1, 1]} : vector<8x32xf32> to vector<8x8xf32>
    %193 = vector.extract_strided_slice %19 {offsets = [0, 16], sizes = [16, 8], strides = [1, 1]} : vector<16x64xf32> to vector<16x8xf32>
    %194 = vector.extract_strided_slice %19 {offsets = [0, 48], sizes = [16, 8], strides = [1, 1]} : vector<16x64xf32> to vector<16x8xf32>
    %195 = arith.truncf %192 : vector<8x8xf32> to vector<8x8xbf16>
    %196 = arith.truncf %193 : vector<16x8xf32> to vector<16x8xbf16>
    %cst_68 = arith.constant dense<0.000000e+00> : vector<8x16xf32>
    %197 = tpu.matmul %195, %196, %cst_68 {dimension_numbers = #tpu.dot_dimension_numbers<[1], [1], [0], [0], [0, 0, 1, 0], [], []>} : vector<8x8xbf16>, vector<16x8xbf16>, vector<8x16xf32> -> vector<8x16xf32>
    %cst_69 = arith.constant 0.353553385 : f32
    %198 = vector.broadcast %cst_69 : f32 to vector<8x16xf32>
    %199 = arith.mulf %197, %198 : vector<8x16xf32>
    %cst_70 = arith.constant dense<0xFF800000> : vector<8xf32>
    %200 = vector.multi_reduction <maximumf>, %199, %cst_70 [1] : vector<8x16xf32> to vector<8xf32>
    %201 = vector.shape_cast %200 : vector<8xf32> to vector<8x1xf32>
    %202 = vector.broadcast %201 : vector<8x1xf32> to vector<8x16xf32>
    %203 = arith.subf %199, %202 : vector<8x16xf32>
    %204 = math.exp %203 : vector<8x16xf32>
    %cst_71 = arith.constant dense<0.000000e+00> : vector<8xf32>
    %205 = vector.multi_reduction <add>, %204, %cst_71 [1] : vector<8x16xf32> to vector<8xf32>
    %206 = vector.shape_cast %205 : vector<8xf32> to vector<8x1xf32>
    %207 = vector.broadcast %206 : vector<8x1xf32> to vector<8x16xf32>
    %208 = arith.divf %204, %207 : vector<8x16xf32>
    %209 = arith.truncf %208 : vector<8x16xf32> to vector<8x16xbf16>
    %210 = arith.truncf %194 : vector<16x8xf32> to vector<16x8xbf16>
    %cst_72 = arith.constant dense<0.000000e+00> : vector<8x8xf32>
    %211 = tpu.matmul %209, %210, %cst_72 {dimension_numbers = #tpu.dot_dimension_numbers<[1], [0], [0], [1], [0, 0, 1, 1], [], []>} : vector<8x16xbf16>, vector<16x8xbf16>, vector<8x8xf32> -> vector<8x8xf32>
    %212 = vector.extract_strided_slice %151 {offsets = [0, 24], sizes = [8, 8], strides = [1, 1]} : vector<8x32xf32> to vector<8x8xf32>
    %213 = vector.extract_strided_slice %19 {offsets = [0, 24], sizes = [16, 8], strides = [1, 1]} : vector<16x64xf32> to vector<16x8xf32>
    %214 = vector.extract_strided_slice %19 {offsets = [0, 56], sizes = [16, 8], strides = [1, 1]} : vector<16x64xf32> to vector<16x8xf32>
    %215 = arith.truncf %212 : vector<8x8xf32> to vector<8x8xbf16>
    %216 = arith.truncf %213 : vector<16x8xf32> to vector<16x8xbf16>
    %cst_73 = arith.constant dense<0.000000e+00> : vector<8x16xf32>
    %217 = tpu.matmul %215, %216, %cst_73 {dimension_numbers = #tpu.dot_dimension_numbers<[1], [1], [0], [0], [0, 0, 1, 0], [], []>} : vector<8x8xbf16>, vector<16x8xbf16>, vector<8x16xf32> -> vector<8x16xf32>
    %cst_74 = arith.constant 0.353553385 : f32
    %218 = vector.broadcast %cst_74 : f32 to vector<8x16xf32>
    %219 = arith.mulf %217, %218 : vector<8x16xf32>
    %cst_75 = arith.constant dense<0xFF800000> : vector<8xf32>
    %220 = vector.multi_reduction <maximumf>, %219, %cst_75 [1] : vector<8x16xf32> to vector<8xf32>
    %221 = vector.shape_cast %220 : vector<8xf32> to vector<8x1xf32>
    %222 = vector.broadcast %221 : vector<8x1xf32> to vector<8x16xf32>
    %223 = arith.subf %219, %222 : vector<8x16xf32>
    %224 = math.exp %223 : vector<8x16xf32>
    %cst_76 = arith.constant dense<0.000000e+00> : vector<8xf32>
    %225 = vector.multi_reduction <add>, %224, %cst_76 [1] : vector<8x16xf32> to vector<8xf32>
    %226 = vector.shape_cast %225 : vector<8xf32> to vector<8x1xf32>
    %227 = vector.broadcast %226 : vector<8x1xf32> to vector<8x16xf32>
    %228 = arith.divf %224, %227 : vector<8x16xf32>
    %229 = arith.truncf %228 : vector<8x16xf32> to vector<8x16xbf16>
    %230 = arith.truncf %214 : vector<16x8xf32> to vector<16x8xbf16>
    %cst_77 = arith.constant dense<0.000000e+00> : vector<8x8xf32>
    %231 = tpu.matmul %229, %230, %cst_77 {dimension_numbers = #tpu.dot_dimension_numbers<[1], [0], [0], [1], [0, 0, 1, 1], [], []>} : vector<8x16xbf16>, vector<16x8xbf16>, vector<8x8xf32> -> vector<8x8xf32>
    %232 = tpu.concatenate %168, %188, %208, %228 in 1 : vector<8x16xf32>, vector<8x16xf32>, vector<8x16xf32>, vector<8x16xf32> -> vector<8x64xf32>
    %c0_78 = arith.constant 0 : index
    %c0_79 = arith.constant 0 : index
    %c0_80 = arith.constant 0 : index
    %c0_81 = arith.constant 0 : index
    %233 = vector.load %arg26[%c0_78, %c0_79, %c0_80, %c0_81] : memref<2x1x8x64xf32, #tpu.memory_space<vmem>>, vector<1x1x8x64xf32>
    %234 = vector.shape_cast %233 : vector<1x1x8x64xf32> to vector<8x64xf32>
    %235 = vector.shape_cast %232 : vector<8x64xf32> to vector<1x1x8x64xf32>
    tpu.vector_store %arg26[%c0_78, %c0_79, %c0_80, %c0_81], %235 {strides = array<i32>} : memref<2x1x8x64xf32, #tpu.memory_space<vmem>>, vector<1x1x8x64xf32>,
    %236 = tpu.concatenate %171, %191, %211, %231 in 1 : vector<8x8xf32>, vector<8x8xf32>, vector<8x8xf32>, vector<8x8xf32> -> vector<8x32xf32>
    %c0_82 = arith.constant 0 : index
    %c0_83 = arith.constant 0 : index
    %237 = vector.load %arg14[%c0_82, %c0_83] : memref<32x32xbf16, #tpu.memory_space<vmem>>, vector<32x32xbf16>
    %238 = arith.truncf %236 : vector<8x32xf32> to vector<8x32xbf16>
    %cst_84 = arith.constant dense<0.000000e+00> : vector<8x32xf32>
    %239 = tpu.matmul %238, %237, %cst_84 {dimension_numbers = #tpu.dot_dimension_numbers<[1], [0], [0], [1], [0, 0, 1, 1], [], []>} : vector<8x32xbf16>, vector<32x32xbf16>, vector<8x32xf32> -> vector<8x32xf32>
    %c0_85 = arith.constant 0 : index
    %c0_86 = arith.constant 0 : index
    %240 = vector.load %arg15[%c0_85, %c0_86] : memref<1x32xf32, #tpu.memory_space<vmem>>, vector<1x32xf32>
    %241 = vector.broadcast %240 : vector<1x32xf32> to vector<8x32xf32>
    %242 = arith.addf %239, %241 : vector<8x32xf32>
    %243 = arith.addf %242, %145 : vector<8x32xf32>
    %c0_87 = arith.constant 0 : index
    %c0_88 = arith.constant 0 : index
    %244 = vector.load %arg16[%c0_87, %c0_88] : memref<1x32xf32, #tpu.memory_space<vmem>>, vector<1x32xf32>
    %c0_89 = arith.constant 0 : index
    %c0_90 = arith.constant 0 : index
    %245 = vector.load %arg17[%c0_89, %c0_90] : memref<1x32xf32, #tpu.memory_space<vmem>>, vector<1x32xf32>
    %cst_91 = arith.constant dense<0.000000e+00> : vector<8xf32>
    %246 = vector.multi_reduction <add>, %243, %cst_91 [1] : vector<8x32xf32> to vector<8xf32>
    %247 = vector.shape_cast %246 : vector<8xf32> to vector<8x1xf32>
    %cst_92 = arith.constant 3.200000e+01 : f32
    %248 = vector.broadcast %cst_92 : f32 to vector<8x1xf32>
    %249 = arith.divf %247, %248 : vector<8x1xf32>
    %250 = vector.broadcast %249 : vector<8x1xf32> to vector<8x32xf32>
    %251 = arith.subf %243, %250 : vector<8x32xf32>
    %252 = arith.mulf %251, %251 : vector<8x32xf32>
    %cst_93 = arith.constant dense<0.000000e+00> : vector<8xf32>
    %253 = vector.multi_reduction <add>, %252, %cst_93 [1] : vector<8x32xf32> to vector<8xf32>
    %254 = vector.shape_cast %253 : vector<8xf32> to vector<8x1xf32>
    %cst_94 = arith.constant 3.200000e+01 : f32
    %255 = vector.broadcast %cst_94 : f32 to vector<8x1xf32>
    %256 = arith.divf %254, %255 : vector<8x1xf32>
    %257 = vector.broadcast %249 : vector<8x1xf32> to vector<8x32xf32>
    %258 = arith.subf %243, %257 : vector<8x32xf32>
    %cst_95 = arith.constant 9.99999974E-6 : f32
    %259 = vector.broadcast %cst_95 : f32 to vector<8x1xf32>
    %260 = arith.addf %256, %259 : vector<8x1xf32>
    %261 = math.rsqrt %260 : vector<8x1xf32>
    %262 = vector.broadcast %261 : vector<8x1xf32> to vector<8x32xf32>
    %263 = arith.mulf %258, %262 : vector<8x32xf32>
    %264 = vector.broadcast %244 : vector<1x32xf32> to vector<8x32xf32>
    %265 = arith.mulf %263, %264 : vector<8x32xf32>
    %266 = vector.broadcast %245 : vector<1x32xf32> to vector<8x32xf32>
    %267 = arith.addf %265, %266 : vector<8x32xf32>
    %c0_96 = arith.constant 0 : index
    %c0_97 = arith.constant 0 : index
    %268 = vector.load %arg18[%c0_96, %c0_97] : memref<32x64xbf16, #tpu.memory_space<vmem>>, vector<32x64xbf16>
    %269 = arith.truncf %267 : vector<8x32xf32> to vector<8x32xbf16>
    %cst_98 = arith.constant dense<0.000000e+00> : vector<8x64xf32>
    %270 = tpu.matmul %269, %268, %cst_98 {dimension_numbers = #tpu.dot_dimension_numbers<[1], [0], [0], [1], [0, 0, 1, 1], [], []>} : vector<8x32xbf16>, vector<32x64xbf16>, vector<8x64xf32> -> vector<8x64xf32>
    %c0_99 = arith.constant 0 : index
    %c0_100 = arith.constant 0 : index
    %271 = vector.load %arg19[%c0_99, %c0_100] : memref<1x64xf32, #tpu.memory_space<vmem>>, vector<1x64xf32>
    %272 = vector.broadcast %271 : vector<1x64xf32> to vector<8x64xf32>
    %273 = arith.addf %270, %272 : vector<8x64xf32>
    %cst_101 = arith.constant 0.000000e+00 : f32
    %274 = vector.broadcast %cst_101 : f32 to vector<8x64xf32>
    %275 = arith.maximumf %273, %274 : vector<8x64xf32>
    %c0_102 = arith.constant 0 : index
    %c0_103 = arith.constant 0 : index
    %276 = vector.load %arg20[%c0_102, %c0_103] : memref<64x32xbf16, #tpu.memory_space<vmem>>, vector<64x32xbf16>
    %277 = arith.truncf %275 : vector<8x64xf32> to vector<8x64xbf16>
    %cst_104 = arith.constant dense<0.000000e+00> : vector<8x32xf32>
    %278 = tpu.matmul %277, %276, %cst_104 {dimension_numbers = #tpu.dot_dimension_numbers<[1], [0], [0], [1], [0, 0, 1, 1], [], []>} : vector<8x64xbf16>, vector<64x32xbf16>, vector<8x32xf32> -> vector<8x32xf32>
    %c0_105 = arith.constant 0 : index
    %c0_106 = arith.constant 0 : index
    %279 = vector.load %arg21[%c0_105, %c0_106] : memref<1x32xf32, #tpu.memory_space<vmem>>, vector<1x32xf32>
    %280 = vector.broadcast %279 : vector<1x32xf32> to vector<8x32xf32>
    %281 = arith.addf %278, %280 : vector<8x32xf32>
    %282 = arith.addf %281, %267 : vector<8x32xf32>
    %c0_107 = arith.constant 0 : index
    %c0_108 = arith.constant 0 : index
    %283 = vector.load %arg22[%c0_107, %c0_108] : memref<1x32xf32, #tpu.memory_space<vmem>>, vector<1x32xf32>
    %c0_109 = arith.constant 0 : index
    %c0_110 = arith.constant 0 : index
    %284 = vector.load %arg23[%c0_109, %c0_110] : memref<1x32xf32, #tpu.memory_space<vmem>>, vector<1x32xf32>
    %cst_111 = arith.constant dense<0.000000e+00> : vector<8xf32>
    %285 = vector.multi_reduction <add>, %282, %cst_111 [1] : vector<8x32xf32> to vector<8xf32>
    %286 = vector.shape_cast %285 : vector<8xf32> to vector<8x1xf32>
    %cst_112 = arith.constant 3.200000e+01 : f32
    %287 = vector.broadcast %cst_112 : f32 to vector<8x1xf32>
    %288 = arith.divf %286, %287 : vector<8x1xf32>
    %289 = vector.broadcast %288 : vector<8x1xf32> to vector<8x32xf32>
    %290 = arith.subf %282, %289 : vector<8x32xf32>
    %291 = arith.mulf %290, %290 : vector<8x32xf32>
    %cst_113 = arith.constant dense<0.000000e+00> : vector<8xf32>
    %292 = vector.multi_reduction <add>, %291, %cst_113 [1] : vector<8x32xf32> to vector<8xf32>
    %293 = vector.shape_cast %292 : vector<8xf32> to vector<8x1xf32>
    %cst_114 = arith.constant 3.200000e+01 : f32
    %294 = vector.broadcast %cst_114 : f32 to vector<8x1xf32>
    %295 = arith.divf %293, %294 : vector<8x1xf32>
    %296 = vector.broadcast %288 : vector<8x1xf32> to vector<8x32xf32>
    %297 = arith.subf %282, %296 : vector<8x32xf32>
    %cst_115 = arith.constant 9.99999974E-6 : f32
    %298 = vector.broadcast %cst_115 : f32 to vector<8x1xf32>
    %299 = arith.addf %295, %298 : vector<8x1xf32>
    %300 = math.rsqrt %299 : vector<8x1xf32>
    %301 = vector.broadcast %300 : vector<8x1xf32> to vector<8x32xf32>
    %302 = arith.mulf %297, %301 : vector<8x32xf32>
    %303 = vector.broadcast %283 : vector<1x32xf32> to vector<8x32xf32>
    %304 = arith.mulf %302, %303 : vector<8x32xf32>
    %305 = vector.broadcast %284 : vector<1x32xf32> to vector<8x32xf32>
    %306 = arith.addf %304, %305 : vector<8x32xf32>
    %c0_116 = arith.constant 0 : index
    %c0_117 = arith.constant 0 : index
    %307 = vector.load %arg4[%c0_116, %c0_117] : memref<32x96xbf16, #tpu.memory_space<vmem>>, vector<32x96xbf16>
    %308 = arith.truncf %306 : vector<8x32xf32> to vector<8x32xbf16>
    %cst_118 = arith.constant dense<0.000000e+00> : vector<8x96xf32>
    %309 = tpu.matmul %308, %307, %cst_118 {dimension_numbers = #tpu.dot_dimension_numbers<[1], [0], [0], [1], [0, 0, 1, 1], [], []>} : vector<8x32xbf16>, vector<32x96xbf16>, vector<8x96xf32> -> vector<8x96xf32>
    %c0_119 = arith.constant 0 : index
    %c0_120 = arith.constant 0 : index
    %310 = vector.load %arg5[%c0_119, %c0_120] : memref<1x96xf32, #tpu.memory_space<vmem>>, vector<1x96xf32>
    %311 = vector.broadcast %310 : vector<1x96xf32> to vector<8x96xf32>
    %312 = arith.addf %309, %311 : vector<8x96xf32>
    %313 = vector.extract_strided_slice %312 {offsets = [0, 0], sizes = [8, 8], strides = [1, 1]} : vector<8x96xf32> to vector<8x8xf32>
    %314 = vector.extract_strided_slice %312 {offsets = [0, 32], sizes = [8, 8], strides = [1, 1]} : vector<8x96xf32> to vector<8x8xf32>
    %315 = vector.extract_strided_slice %312 {offsets = [0, 64], sizes = [8, 8], strides = [1, 1]} : vector<8x96xf32> to vector<8x8xf32>
    %316 = arith.truncf %313 : vector<8x8xf32> to vector<8x8xbf16>
    %317 = arith.truncf %314 : vector<8x8xf32> to vector<8x8xbf16>
    %cst_121 = arith.constant dense<0.000000e+00> : vector<8x8xf32>
    %318 = tpu.matmul %316, %317, %cst_121 {dimension_numbers = #tpu.dot_dimension_numbers<[1], [1], [0], [0], [0, 0, 1, 0], [], []>} : vector<8x8xbf16>, vector<8x8xbf16>, vector<8x8xf32> -> vector<8x8xf32>
    %cst_122 = arith.constant 0.353553385 : f32
    %319 = vector.broadcast %cst_122 : f32 to vector<8x8xf32>
    %320 = arith.mulf %318, %319 : vector<8x8xf32>
    %321 = arith.addf %320, %13 : vector<8x8xf32>
    %cst_123 = arith.constant dense<0xFF800000> : vector<8xf32>
    %322 = vector.multi_reduction <maximumf>, %321, %cst_123 [1] : vector<8x8xf32> to vector<8xf32>
    %323 = vector.shape_cast %322 : vector<8xf32> to vector<8x1xf32>
    %324 = vector.broadcast %323 : vector<8x1xf32> to vector<8x8xf32>
    %325 = arith.subf %321, %324 : vector<8x8xf32>
    %326 = math.exp %325 : vector<8x8xf32>
    %cst_124 = arith.constant dense<0.000000e+00> : vector<8xf32>
    %327 = vector.multi_reduction <add>, %326, %cst_124 [1] : vector<8x8xf32> to vector<8xf32>
    %328 = vector.shape_cast %327 : vector<8xf32> to vector<8x1xf32>
    %329 = tpu.reciprocal %328 {approx = true} : vector<8x1xf32> -> vector<8x1xf32>
    %330 = vector.broadcast %329 : vector<8x1xf32> to vector<8x8xf32>
    %331 = arith.mulf %326, %330 : vector<8x8xf32>
    %332 = arith.truncf %331 : vector<8x8xf32> to vector<8x8xbf16>
    %333 = arith.truncf %315 : vector<8x8xf32> to vector<8x8xbf16>
    %cst_125 = arith.constant dense<0.000000e+00> : vector<8x8xf32>
    %334 = tpu.matmul %332, %333, %cst_125 {dimension_numbers = #tpu.dot_dimension_numbers<[1], [0], [0], [1], [0, 0, 1, 1], [], []>} : vector<8x8xbf16>, vector<8x8xbf16>, vector<8x8xf32> -> vector<8x8xf32>
    %335 = vector.extract_strided_slice %312 {offsets = [0, 8], sizes = [8, 8], strides = [1, 1]} : vector<8x96xf32> to vector<8x8xf32>
    %336 = vector.extract_strided_slice %312 {offsets = [0, 40], sizes = [8, 8], strides = [1, 1]} : vector<8x96xf32> to vector<8x8xf32>
    %337 = vector.extract_strided_slice %312 {offsets = [0, 72], sizes = [8, 8], strides = [1, 1]} : vector<8x96xf32> to vector<8x8xf32>
    %338 = arith.truncf %335 : vector<8x8xf32> to vector<8x8xbf16>
    %339 = arith.truncf %336 : vector<8x8xf32> to vector<8x8xbf16>
    %cst_126 = arith.constant dense<0.000000e+00> : vector<8x8xf32>
    %340 = tpu.matmul %338, %339, %cst_126 {dimension_numbers = #tpu.dot_dimension_numbers<[1], [1], [0], [0], [0, 0, 1, 0], [], []>} : vector<8x8xbf16>, vector<8x8xbf16>, vector<8x8xf32> -> vector<8x8xf32>
    %cst_127 = arith.constant 0.353553385 : f32
    %341 = vector.broadcast %cst_127 : f32 to vector<8x8xf32>
    %342 = arith.mulf %340, %341 : vector<8x8xf32>
    %343 = arith.addf %342, %13 : vector<8x8xf32>
    %cst_128 = arith.constant dense<0xFF800000> : vector<8xf32>
    %344 = vector.multi_reduction <maximumf>, %343, %cst_128 [1] : vector<8x8xf32> to vector<8xf32>
    %345 = vector.shape_cast %344 : vector<8xf32> to vector<8x1xf32>
    %346 = vector.broadcast %345 : vector<8x1xf32> to vector<8x8xf32>
    %347 = arith.subf %343, %346 : vector<8x8xf32>
    %348 = math.exp %347 : vector<8x8xf32>
    %cst_129 = arith.constant dense<0.000000e+00> : vector<8xf32>
    %349 = vector.multi_reduction <add>, %348, %cst_129 [1] : vector<8x8xf32> to vector<8xf32>
    %350 = vector.shape_cast %349 : vector<8xf32> to vector<8x1xf32>
    %351 = tpu.reciprocal %350 {approx = true} : vector<8x1xf32> -> vector<8x1xf32>
    %352 = vector.broadcast %351 : vector<8x1xf32> to vector<8x8xf32>
    %353 = arith.mulf %348, %352 : vector<8x8xf32>
    %354 = arith.truncf %353 : vector<8x8xf32> to vector<8x8xbf16>
    %355 = arith.truncf %337 : vector<8x8xf32> to vector<8x8xbf16>
    %cst_130 = arith.constant dense<0.000000e+00> : vector<8x8xf32>
    %356 = tpu.matmul %354, %355, %cst_130 {dimension_numbers = #tpu.dot_dimension_numbers<[1], [0], [0], [1], [0, 0, 1, 1], [], []>} : vector<8x8xbf16>, vector<8x8xbf16>, vector<8x8xf32> -> vector<8x8xf32>
    %357 = vector.extract_strided_slice %312 {offsets = [0, 16], sizes = [8, 8], strides = [1, 1]} : vector<8x96xf32> to vector<8x8xf32>
    %358 = vector.extract_strided_slice %312 {offsets = [0, 48], sizes = [8, 8], strides = [1, 1]} : vector<8x96xf32> to vector<8x8xf32>
    %359 = vector.extract_strided_slice %312 {offsets = [0, 80], sizes = [8, 8], strides = [1, 1]} : vector<8x96xf32> to vector<8x8xf32>
    %360 = arith.truncf %357 : vector<8x8xf32> to vector<8x8xbf16>
    %361 = arith.truncf %358 : vector<8x8xf32> to vector<8x8xbf16>
    %cst_131 = arith.constant dense<0.000000e+00> : vector<8x8xf32>
    %362 = tpu.matmul %360, %361, %cst_131 {dimension_numbers = #tpu.dot_dimension_numbers<[1], [1], [0], [0], [0, 0, 1, 0], [], []>} : vector<8x8xbf16>, vector<8x8xbf16>, vector<8x8xf32> -> vector<8x8xf32>
    %cst_132 = arith.constant 0.353553385 : f32
    %363 = vector.broadcast %cst_132 : f32 to vector<8x8xf32>
    %364 = arith.mulf %362, %363 : vector<8x8xf32>
    %365 = arith.addf %364, %13 : vector<8x8xf32>
    %cst_133 = arith.constant dense<0xFF800000> : vector<8xf32>
    %366 = vector.multi_reduction <maximumf>, %365, %cst_133 [1] : vector<8x8xf32> to vector<8xf32>
    %367 = vector.shape_cast %366 : vector<8xf32> to vector<8x1xf32>
    %368 = vector.broadcast %367 : vector<8x1xf32> to vector<8x8xf32>
    %369 = arith.subf %365, %368 : vector<8x8xf32>
    %370 = math.exp %369 : vector<8x8xf32>
    %cst_134 = arith.constant dense<0.000000e+00> : vector<8xf32>
    %371 = vector.multi_reduction <add>, %370, %cst_134 [1] : vector<8x8xf32> to vector<8xf32>
    %372 = vector.shape_cast %371 : vector<8xf32> to vector<8x1xf32>
    %373 = tpu.reciprocal %372 {approx = true} : vector<8x1xf32> -> vector<8x1xf32>
    %374 = vector.broadcast %373 : vector<8x1xf32> to vector<8x8xf32>
    %375 = arith.mulf %370, %374 : vector<8x8xf32>
    %376 = arith.truncf %375 : vector<8x8xf32> to vector<8x8xbf16>
    %377 = arith.truncf %359 : vector<8x8xf32> to vector<8x8xbf16>
    %cst_135 = arith.constant dense<0.000000e+00> : vector<8x8xf32>
    %378 = tpu.matmul %376, %377, %cst_135 {dimension_numbers = #tpu.dot_dimension_numbers<[1], [0], [0], [1], [0, 0, 1, 1], [], []>} : vector<8x8xbf16>, vector<8x8xbf16>, vector<8x8xf32> -> vector<8x8xf32>
    %379 = vector.extract_strided_slice %312 {offsets = [0, 24], sizes = [8, 8], strides = [1, 1]} : vector<8x96xf32> to vector<8x8xf32>
    %380 = vector.extract_strided_slice %312 {offsets = [0, 56], sizes = [8, 8], strides = [1, 1]} : vector<8x96xf32> to vector<8x8xf32>
    %381 = vector.extract_strided_slice %312 {offsets = [0, 88], sizes = [8, 8], strides = [1, 1]} : vector<8x96xf32> to vector<8x8xf32>
    %382 = arith.truncf %379 : vector<8x8xf32> to vector<8x8xbf16>
    %383 = arith.truncf %380 : vector<8x8xf32> to vector<8x8xbf16>
    %cst_136 = arith.constant dense<0.000000e+00> : vector<8x8xf32>
    %384 = tpu.matmul %382, %383, %cst_136 {dimension_numbers = #tpu.dot_dimension_numbers<[1], [1], [0], [0], [0, 0, 1, 0], [], []>} : vector<8x8xbf16>, vector<8x8xbf16>, vector<8x8xf32> -> vector<8x8xf32>
    %cst_137 = arith.constant 0.353553385 : f32
    %385 = vector.broadcast %cst_137 : f32 to vector<8x8xf32>
    %386 = arith.mulf %384, %385 : vector<8x8xf32>
    %387 = arith.addf %386, %13 : vector<8x8xf32>
    %cst_138 = arith.constant dense<0xFF800000> : vector<8xf32>
    %388 = vector.multi_reduction <maximumf>, %387, %cst_138 [1] : vector<8x8xf32> to vector<8xf32>
    %389 = vector.shape_cast %388 : vector<8xf32> to vector<8x1xf32>
    %390 = vector.broadcast %389 : vector<8x1xf32> to vector<8x8xf32>
    %391 = arith.subf %387, %390 : vector<8x8xf32>
    %392 = math.exp %391 : vector<8x8xf32>
    %cst_139 = arith.constant dense<0.000000e+00> : vector<8xf32>
    %393 = vector.multi_reduction <add>, %392, %cst_139 [1] : vector<8x8xf32> to vector<8xf32>
    %394 = vector.shape_cast %393 : vector<8xf32> to vector<8x1xf32>
    %395 = tpu.reciprocal %394 {approx = true} : vector<8x1xf32> -> vector<8x1xf32>
    %396 = vector.broadcast %395 : vector<8x1xf32> to vector<8x8xf32>
    %397 = arith.mulf %392, %396 : vector<8x8xf32>
    %398 = arith.truncf %397 : vector<8x8xf32> to vector<8x8xbf16>
    %399 = arith.truncf %381 : vector<8x8xf32> to vector<8x8xbf16>
    %cst_140 = arith.constant dense<0.000000e+00> : vector<8x8xf32>
    %400 = tpu.matmul %398, %399, %cst_140 {dimension_numbers = #tpu.dot_dimension_numbers<[1], [0], [0], [1], [0, 0, 1, 1], [], []>} : vector<8x8xbf16>, vector<8x8xbf16>, vector<8x8xf32> -> vector<8x8xf32>
    %401 = tpu.concatenate %334, %356, %378, %400 in 1 : vector<8x8xf32>, vector<8x8xf32>, vector<8x8xf32>, vector<8x8xf32> -> vector<8x32xf32>
    %c0_141 = arith.constant 0 : index
    %c0_142 = arith.constant 0 : index
    %402 = vector.load %arg6[%c0_141, %c0_142] : memref<32x32xbf16, #tpu.memory_space<vmem>>, vector<32x32xbf16>
    %403 = arith.truncf %401 : vector<8x32xf32> to vector<8x32xbf16>
    %cst_143 = arith.constant dense<0.000000e+00> : vector<8x32xf32>
    %404 = tpu.matmul %403, %402, %cst_143 {dimension_numbers = #tpu.dot_dimension_numbers<[1], [0], [0], [1], [0, 0, 1, 1], [], []>} : vector<8x32xbf16>, vector<32x32xbf16>, vector<8x32xf32> -> vector<8x32xf32>
    %c0_144 = arith.constant 0 : index
    %c0_145 = arith.constant 0 : index
    %405 = vector.load %arg7[%c0_144, %c0_145] : memref<1x32xf32, #tpu.memory_space<vmem>>, vector<1x32xf32>
    %406 = vector.broadcast %405 : vector<1x32xf32> to vector<8x32xf32>
    %407 = arith.addf %404, %406 : vector<8x32xf32>
    %408 = arith.addf %407, %306 : vector<8x32xf32>
    %c0_146 = arith.constant 0 : index
    %c0_147 = arith.constant 0 : index
    %409 = vector.load %arg8[%c0_146, %c0_147] : memref<1x32xf32, #tpu.memory_space<vmem>>, vector<1x32xf32>
    %c0_148 = arith.constant 0 : index
    %c0_149 = arith.constant 0 : index
    %410 = vector.load %arg9[%c0_148, %c0_149] : memref<1x32xf32, #tpu.memory_space<vmem>>, vector<1x32xf32>
    %cst_150 = arith.constant dense<0.000000e+00> : vector<8xf32>
    %411 = vector.multi_reduction <add>, %408, %cst_150 [1] : vector<8x32xf32> to vector<8xf32>
    %412 = vector.shape_cast %411 : vector<8xf32> to vector<8x1xf32>
    %cst_151 = arith.constant 3.200000e+01 : f32
    %413 = vector.broadcast %cst_151 : f32 to vector<8x1xf32>
    %414 = arith.divf %412, %413 : vector<8x1xf32>
    %415 = vector.broadcast %414 : vector<8x1xf32> to vector<8x32xf32>
    %416 = arith.subf %408, %415 : vector<8x32xf32>
    %417 = arith.mulf %416, %416 : vector<8x32xf32>
    %cst_152 = arith.constant dense<0.000000e+00> : vector<8xf32>
    %418 = vector.multi_reduction <add>, %417, %cst_152 [1] : vector<8x32xf32> to vector<8xf32>
    %419 = vector.shape_cast %418 : vector<8xf32> to vector<8x1xf32>
    %cst_153 = arith.constant 3.200000e+01 : f32
    %420 = vector.broadcast %cst_153 : f32 to vector<8x1xf32>
    %421 = arith.divf %419, %420 : vector<8x1xf32>
    %422 = vector.broadcast %414 : vector<8x1xf32> to vector<8x32xf32>
    %423 = arith.subf %408, %422 : vector<8x32xf32>
    %cst_154 = arith.constant 9.99999974E-6 : f32
    %424 = vector.broadcast %cst_154 : f32 to vector<8x1xf32>
    %425 = arith.addf %421, %424 : vector<8x1xf32>
    %426 = math.rsqrt %425 : vector<8x1xf32>
    %427 = vector.broadcast %426 : vector<8x1xf32> to vector<8x32xf32>
    %428 = arith.mulf %423, %427 : vector<8x32xf32>
    %429 = vector.broadcast %409 : vector<1x32xf32> to vector<8x32xf32>
    %430 = arith.mulf %428, %429 : vector<8x32xf32>
    %431 = vector.broadcast %410 : vector<1x32xf32> to vector<8x32xf32>
    %432 = arith.addf %430, %431 : vector<8x32xf32>
    %c0_155 = arith.constant 0 : index
    %c0_156 = arith.constant 0 : index
    %433 = vector.load %arg10[%c0_155, %c0_156] : memref<32x32xbf16, #tpu.memory_space<vmem>>, vector<32x32xbf16>
    %434 = arith.truncf %432 : vector<8x32xf32> to vector<8x32xbf16>
    %cst_157 = arith.constant dense<0.000000e+00> : vector<8x32xf32>
    %435 = tpu.matmul %434, %433, %cst_157 {dimension_numbers = #tpu.dot_dimension_numbers<[1], [0], [0], [1], [0, 0, 1, 1], [], []>} : vector<8x32xbf16>, vector<32x32xbf16>, vector<8x32xf32> -> vector<8x32xf32>
    %c0_158 = arith.constant 0 : index
    %c0_159 = arith.constant 0 : index
    %436 = vector.load %arg11[%c0_158, %c0_159] : memref<1x32xf32, #tpu.memory_space<vmem>>, vector<1x32xf32>
    %437 = vector.broadcast %436 : vector<1x32xf32> to vector<8x32xf32>
    %438 = arith.addf %435, %437 : vector<8x32xf32>
    %439 = vector.extract_strided_slice %438 {offsets = [0, 0], sizes = [8, 8], strides = [1, 1]} : vector<8x32xf32> to vector<8x8xf32>
    %440 = vector.extract_strided_slice %19 {offsets = [0, 0], sizes = [16, 8], strides = [1, 1]} : vector<16x64xf32> to vector<16x8xf32>
    %441 = vector.extract_strided_slice %19 {offsets = [0, 32], sizes = [16, 8], strides = [1, 1]} : vector<16x64xf32> to vector<16x8xf32>
    %442 = arith.truncf %439 : vector<8x8xf32> to vector<8x8xbf16>
    %443 = arith.truncf %440 : vector<16x8xf32> to vector<16x8xbf16>
    %cst_160 = arith.constant dense<0.000000e+00> : vector<8x16xf32>
    %444 = tpu.matmul %442, %443, %cst_160 {dimension_numbers = #tpu.dot_dimension_numbers<[1], [1], [0], [0], [0, 0, 1, 0], [], []>} : vector<8x8xbf16>, vector<16x8xbf16>, vector<8x16xf32> -> vector<8x16xf32>
    %cst_161 = arith.constant 0.353553385 : f32
    %445 = vector.broadcast %cst_161 : f32 to vector<8x16xf32>
    %446 = arith.mulf %444, %445 : vector<8x16xf32>
    %cst_162 = arith.constant dense<0xFF800000> : vector<8xf32>
    %447 = vector.multi_reduction <maximumf>, %446, %cst_162 [1] : vector<8x16xf32> to vector<8xf32>
    %448 = vector.shape_cast %447 : vector<8xf32> to vector<8x1xf32>
    %449 = vector.broadcast %448 : vector<8x1xf32> to vector<8x16xf32>
    %450 = arith.subf %446, %449 : vector<8x16xf32>
    %451 = math.exp %450 : vector<8x16xf32>
    %cst_163 = arith.constant dense<0.000000e+00> : vector<8xf32>
    %452 = vector.multi_reduction <add>, %451, %cst_163 [1] : vector<8x16xf32> to vector<8xf32>
    %453 = vector.shape_cast %452 : vector<8xf32> to vector<8x1xf32>
    %454 = vector.broadcast %453 : vector<8x1xf32> to vector<8x16xf32>
    %455 = arith.divf %451, %454 : vector<8x16xf32>
    %456 = arith.truncf %455 : vector<8x16xf32> to vector<8x16xbf16>
    %457 = arith.truncf %441 : vector<16x8xf32> to vector<16x8xbf16>
    %cst_164 = arith.constant dense<0.000000e+00> : vector<8x8xf32>
    %458 = tpu.matmul %456, %457, %cst_164 {dimension_numbers = #tpu.dot_dimension_numbers<[1], [0], [0], [1], [0, 0, 1, 1], [], []>} : vector<8x16xbf16>, vector<16x8xbf16>, vector<8x8xf32> -> vector<8x8xf32>
    %459 = vector.extract_strided_slice %438 {offsets = [0, 8], sizes = [8, 8], strides = [1, 1]} : vector<8x32xf32> to vector<8x8xf32>
    %460 = vector.extract_strided_slice %19 {offsets = [0, 8], sizes = [16, 8], strides = [1, 1]} : vector<16x64xf32> to vector<16x8xf32>
    %461 = vector.extract_strided_slice %19 {offsets = [0, 40], sizes = [16, 8], strides = [1, 1]} : vector<16x64xf32> to vector<16x8xf32>
    %462 = arith.truncf %459 : vector<8x8xf32> to vector<8x8xbf16>
    %463 = arith.truncf %460 : vector<16x8xf32> to vector<16x8xbf16>
    %cst_165 = arith.constant dense<0.000000e+00> : vector<8x16xf32>
    %464 = tpu.matmul %462, %463, %cst_165 {dimension_numbers = #tpu.dot_dimension_numbers<[1], [1], [0], [0], [0, 0, 1, 0], [], []>} : vector<8x8xbf16>, vector<16x8xbf16>, vector<8x16xf32> -> vector<8x16xf32>
    %cst_166 = arith.constant 0.353553385 : f32
    %465 = vector.broadcast %cst_166 : f32 to vector<8x16xf32>
    %466 = arith.mulf %464, %465 : vector<8x16xf32>
    %cst_167 = arith.constant dense<0xFF800000> : vector<8xf32>
    %467 = vector.multi_reduction <maximumf>, %466, %cst_167 [1] : vector<8x16xf32> to vector<8xf32>
    %468 = vector.shape_cast %467 : vector<8xf32> to vector<8x1xf32>
    %469 = vector.broadcast %468 : vector<8x1xf32> to vector<8x16xf32>
    %470 = arith.subf %466, %469 : vector<8x16xf32>
    %471 = math.exp %470 : vector<8x16xf32>
    %cst_168 = arith.constant dense<0.000000e+00> : vector<8xf32>
    %472 = vector.multi_reduction <add>, %471, %cst_168 [1] : vector<8x16xf32> to vector<8xf32>
    %473 = vector.shape_cast %472 : vector<8xf32> to vector<8x1xf32>
    %474 = vector.broadcast %473 : vector<8x1xf32> to vector<8x16xf32>
    %475 = arith.divf %471, %474 : vector<8x16xf32>
    %476 = arith.truncf %475 : vector<8x16xf32> to vector<8x16xbf16>
    %477 = arith.truncf %461 : vector<16x8xf32> to vector<16x8xbf16>
    %cst_169 = arith.constant dense<0.000000e+00> : vector<8x8xf32>
    %478 = tpu.matmul %476, %477, %cst_169 {dimension_numbers = #tpu.dot_dimension_numbers<[1], [0], [0], [1], [0, 0, 1, 1], [], []>} : vector<8x16xbf16>, vector<16x8xbf16>, vector<8x8xf32> -> vector<8x8xf32>
    %479 = vector.extract_strided_slice %438 {offsets = [0, 16], sizes = [8, 8], strides = [1, 1]} : vector<8x32xf32> to vector<8x8xf32>
    %480 = vector.extract_strided_slice %19 {offsets = [0, 16], sizes = [16, 8], strides = [1, 1]} : vector<16x64xf32> to vector<16x8xf32>
    %481 = vector.extract_strided_slice %19 {offsets = [0, 48], sizes = [16, 8], strides = [1, 1]} : vector<16x64xf32> to vector<16x8xf32>
    %482 = arith.truncf %479 : vector<8x8xf32> to vector<8x8xbf16>
    %483 = arith.truncf %480 : vector<16x8xf32> to vector<16x8xbf16>
    %cst_170 = arith.constant dense<0.000000e+00> : vector<8x16xf32>
    %484 = tpu.matmul %482, %483, %cst_170 {dimension_numbers = #tpu.dot_dimension_numbers<[1], [1], [0], [0], [0, 0, 1, 0], [], []>} : vector<8x8xbf16>, vector<16x8xbf16>, vector<8x16xf32> -> vector<8x16xf32>
    %cst_171 = arith.constant 0.353553385 : f32
    %485 = vector.broadcast %cst_171 : f32 to vector<8x16xf32>
    %486 = arith.mulf %484, %485 : vector<8x16xf32>
    %cst_172 = arith.constant dense<0xFF800000> : vector<8xf32>
    %487 = vector.multi_reduction <maximumf>, %486, %cst_172 [1] : vector<8x16xf32> to vector<8xf32>
    %488 = vector.shape_cast %487 : vector<8xf32> to vector<8x1xf32>
    %489 = vector.broadcast %488 : vector<8x1xf32> to vector<8x16xf32>
    %490 = arith.subf %486, %489 : vector<8x16xf32>
    %491 = math.exp %490 : vector<8x16xf32>
    %cst_173 = arith.constant dense<0.000000e+00> : vector<8xf32>
    %492 = vector.multi_reduction <add>, %491, %cst_173 [1] : vector<8x16xf32> to vector<8xf32>
    %493 = vector.shape_cast %492 : vector<8xf32> to vector<8x1xf32>
    %494 = vector.broadcast %493 : vector<8x1xf32> to vector<8x16xf32>
    %495 = arith.divf %491, %494 : vector<8x16xf32>
    %496 = arith.truncf %495 : vector<8x16xf32> to vector<8x16xbf16>
    %497 = arith.truncf %481 : vector<16x8xf32> to vector<16x8xbf16>
    %cst_174 = arith.constant dense<0.000000e+00> : vector<8x8xf32>
    %498 = tpu.matmul %496, %497, %cst_174 {dimension_numbers = #tpu.dot_dimension_numbers<[1], [0], [0], [1], [0, 0, 1, 1], [], []>} : vector<8x16xbf16>, vector<16x8xbf16>, vector<8x8xf32> -> vector<8x8xf32>
    %499 = vector.extract_strided_slice %438 {offsets = [0, 24], sizes = [8, 8], strides = [1, 1]} : vector<8x32xf32> to vector<8x8xf32>
    %500 = vector.extract_strided_slice %19 {offsets = [0, 24], sizes = [16, 8], strides = [1, 1]} : vector<16x64xf32> to vector<16x8xf32>
    %501 = vector.extract_strided_slice %19 {offsets = [0, 56], sizes = [16, 8], strides = [1, 1]} : vector<16x64xf32> to vector<16x8xf32>
    %502 = arith.truncf %499 : vector<8x8xf32> to vector<8x8xbf16>
    %503 = arith.truncf %500 : vector<16x8xf32> to vector<16x8xbf16>
    %cst_175 = arith.constant dense<0.000000e+00> : vector<8x16xf32>
    %504 = tpu.matmul %502, %503, %cst_175 {dimension_numbers = #tpu.dot_dimension_numbers<[1], [1], [0], [0], [0, 0, 1, 0], [], []>} : vector<8x8xbf16>, vector<16x8xbf16>, vector<8x16xf32> -> vector<8x16xf32>
    %cst_176 = arith.constant 0.353553385 : f32
    %505 = vector.broadcast %cst_176 : f32 to vector<8x16xf32>
    %506 = arith.mulf %504, %505 : vector<8x16xf32>
    %cst_177 = arith.constant dense<0xFF800000> : vector<8xf32>
    %507 = vector.multi_reduction <maximumf>, %506, %cst_177 [1] : vector<8x16xf32> to vector<8xf32>
    %508 = vector.shape_cast %507 : vector<8xf32> to vector<8x1xf32>
    %509 = vector.broadcast %508 : vector<8x1xf32> to vector<8x16xf32>
    %510 = arith.subf %506, %509 : vector<8x16xf32>
    %511 = math.exp %510 : vector<8x16xf32>
    %cst_178 = arith.constant dense<0.000000e+00> : vector<8xf32>
    %512 = vector.multi_reduction <add>, %511, %cst_178 [1] : vector<8x16xf32> to vector<8xf32>
    %513 = vector.shape_cast %512 : vector<8xf32> to vector<8x1xf32>
    %514 = vector.broadcast %513 : vector<8x1xf32> to vector<8x16xf32>
    %515 = arith.divf %511, %514 : vector<8x16xf32>
    %516 = arith.truncf %515 : vector<8x16xf32> to vector<8x16xbf16>
    %517 = arith.truncf %501 : vector<16x8xf32> to vector<16x8xbf16>
    %cst_179 = arith.constant dense<0.000000e+00> : vector<8x8xf32>
    %518 = tpu.matmul %516, %517, %cst_179 {dimension_numbers = #tpu.dot_dimension_numbers<[1], [0], [0], [1], [0, 0, 1, 1], [], []>} : vector<8x16xbf16>, vector<16x8xbf16>, vector<8x8xf32> -> vector<8x8xf32>
    %519 = tpu.concatenate %455, %475, %495, %515 in 1 : vector<8x16xf32>, vector<8x16xf32>, vector<8x16xf32>, vector<8x16xf32> -> vector<8x64xf32>
    %c1 = arith.constant 1 : index
    %c0_180 = arith.constant 0 : index
    %c0_181 = arith.constant 0 : index
    %c0_182 = arith.constant 0 : index
    %520 = vector.load %arg26[%c1, %c0_180, %c0_181, %c0_182] : memref<2x1x8x64xf32, #tpu.memory_space<vmem>>, vector<1x1x8x64xf32>
    %521 = vector.shape_cast %520 : vector<1x1x8x64xf32> to vector<8x64xf32>
    %522 = vector.shape_cast %519 : vector<8x64xf32> to vector<1x1x8x64xf32>
    tpu.vector_store %arg26[%c1, %c0_180, %c0_181, %c0_182], %522 {strides = array<i32>} : memref<2x1x8x64xf32, #tpu.memory_space<vmem>>, vector<1x1x8x64xf32>,
    %523 = tpu.concatenate %458, %478, %498, %518 in 1 : vector<8x8xf32>, vector<8x8xf32>, vector<8x8xf32>, vector<8x8xf32> -> vector<8x32xf32>
    %c0_183 = arith.constant 0 : index
    %c0_184 = arith.constant 0 : index
    %524 = vector.load %arg14[%c0_183, %c0_184] : memref<32x32xbf16, #tpu.memory_space<vmem>>, vector<32x32xbf16>
    %525 = arith.truncf %523 : vector<8x32xf32> to vector<8x32xbf16>
    %cst_185 = arith.constant dense<0.000000e+00> : vector<8x32xf32>
    %526 = tpu.matmul %525, %524, %cst_185 {dimension_numbers = #tpu.dot_dimension_numbers<[1], [0], [0], [1], [0, 0, 1, 1], [], []>} : vector<8x32xbf16>, vector<32x32xbf16>, vector<8x32xf32> -> vector<8x32xf32>
    %c0_186 = arith.constant 0 : index
    %c0_187 = arith.constant 0 : index
    %527 = vector.load %arg15[%c0_186, %c0_187] : memref<1x32xf32, #tpu.memory_space<vmem>>, vector<1x32xf32>
    %528 = vector.broadcast %527 : vector<1x32xf32> to vector<8x32xf32>
    %529 = arith.addf %526, %528 : vector<8x32xf32>
    %530 = arith.addf %529, %432 : vector<8x32xf32>
    %c0_188 = arith.constant 0 : index
    %c0_189 = arith.constant 0 : index
    %531 = vector.load %arg16[%c0_188, %c0_189] : memref<1x32xf32, #tpu.memory_space<vmem>>, vector<1x32xf32>
    %c0_190 = arith.constant 0 : index
    %c0_191 = arith.constant 0 : index
    %532 = vector.load %arg17[%c0_190, %c0_191] : memref<1x32xf32, #tpu.memory_space<vmem>>, vector<1x32xf32>
    %cst_192 = arith.constant dense<0.000000e+00> : vector<8xf32>
    %533 = vector.multi_reduction <add>, %530, %cst_192 [1] : vector<8x32xf32> to vector<8xf32>
    %534 = vector.shape_cast %533 : vector<8xf32> to vector<8x1xf32>
    %cst_193 = arith.constant 3.200000e+01 : f32
    %535 = vector.broadcast %cst_193 : f32 to vector<8x1xf32>
    %536 = arith.divf %534, %535 : vector<8x1xf32>
    %537 = vector.broadcast %536 : vector<8x1xf32> to vector<8x32xf32>
    %538 = arith.subf %530, %537 : vector<8x32xf32>
    %539 = arith.mulf %538, %538 : vector<8x32xf32>
    %cst_194 = arith.constant dense<0.000000e+00> : vector<8xf32>
    %540 = vector.multi_reduction <add>, %539, %cst_194 [1] : vector<8x32xf32> to vector<8xf32>
    %541 = vector.shape_cast %540 : vector<8xf32> to vector<8x1xf32>
    %cst_195 = arith.constant 3.200000e+01 : f32
    %542 = vector.broadcast %cst_195 : f32 to vector<8x1xf32>
    %543 = arith.divf %541, %542 : vector<8x1xf32>
    %544 = vector.broadcast %536 : vector<8x1xf32> to vector<8x32xf32>
    %545 = arith.subf %530, %544 : vector<8x32xf32>
    %cst_196 = arith.constant 9.99999974E-6 : f32
    %546 = vector.broadcast %cst_196 : f32 to vector<8x1xf32>
    %547 = arith.addf %543, %546 : vector<8x1xf32>
    %548 = math.rsqrt %547 : vector<8x1xf32>
    %549 = vector.broadcast %548 : vector<8x1xf32> to vector<8x32xf32>
    %550 = arith.mulf %545, %549 : vector<8x32xf32>
    %551 = vector.broadcast %531 : vector<1x32xf32> to vector<8x32xf32>
    %552 = arith.mulf %550, %551 : vector<8x32xf32>
    %553 = vector.broadcast %532 : vector<1x32xf32> to vector<8x32xf32>
    %554 = arith.addf %552, %553 : vector<8x32xf32>
    %c0_197 = arith.constant 0 : index
    %c0_198 = arith.constant 0 : index
    %555 = vector.load %arg18[%c0_197, %c0_198] : memref<32x64xbf16, #tpu.memory_space<vmem>>, vector<32x64xbf16>
    %556 = arith.truncf %554 : vector<8x32xf32> to vector<8x32xbf16>
    %cst_199 = arith.constant dense<0.000000e+00> : vector<8x64xf32>
    %557 = tpu.matmul %556, %555, %cst_199 {dimension_numbers = #tpu.dot_dimension_numbers<[1], [0], [0], [1], [0, 0, 1, 1], [], []>} : vector<8x32xbf16>, vector<32x64xbf16>, vector<8x64xf32> -> vector<8x64xf32>
    %c0_200 = arith.constant 0 : index
    %c0_201 = arith.constant 0 : index
    %558 = vector.load %arg19[%c0_200, %c0_201] : memref<1x64xf32, #tpu.memory_space<vmem>>, vector<1x64xf32>
    %559 = vector.broadcast %558 : vector<1x64xf32> to vector<8x64xf32>
    %560 = arith.addf %557, %559 : vector<8x64xf32>
    %cst_202 = arith.constant 0.000000e+00 : f32
    %561 = vector.broadcast %cst_202 : f32 to vector<8x64xf32>
    %562 = arith.maximumf %560, %561 : vector<8x64xf32>
    %c0_203 = arith.constant 0 : index
    %c0_204 = arith.constant 0 : index
    %563 = vector.load %arg20[%c0_203, %c0_204] : memref<64x32xbf16, #tpu.memory_space<vmem>>, vector<64x32xbf16>
    %564 = arith.truncf %562 : vector<8x64xf32> to vector<8x64xbf16>
    %cst_205 = arith.constant dense<0.000000e+00> : vector<8x32xf32>
    %565 = tpu.matmul %564, %563, %cst_205 {dimension_numbers = #tpu.dot_dimension_numbers<[1], [0], [0], [1], [0, 0, 1, 1], [], []>} : vector<8x64xbf16>, vector<64x32xbf16>, vector<8x32xf32> -> vector<8x32xf32>
    %c0_206 = arith.constant 0 : index
    %c0_207 = arith.constant 0 : index
    %566 = vector.load %arg21[%c0_206, %c0_207] : memref<1x32xf32, #tpu.memory_space<vmem>>, vector<1x32xf32>
    %567 = vector.broadcast %566 : vector<1x32xf32> to vector<8x32xf32>
    %568 = arith.addf %565, %567 : vector<8x32xf32>
    %569 = arith.addf %568, %554 : vector<8x32xf32>
    %c0_208 = arith.constant 0 : index
    %c0_209 = arith.constant 0 : index
    %570 = vector.load %arg22[%c0_208, %c0_209] : memref<1x32xf32, #tpu.memory_space<vmem>>, vector<1x32xf32>
    %c0_210 = arith.constant 0 : index
    %c0_211 = arith.constant 0 : index
    %571 = vector.load %arg23[%c0_210, %c0_211] : memref<1x32xf32, #tpu.memory_space<vmem>>, vector<1x32xf32>
    %cst_212 = arith.constant dense<0.000000e+00> : vector<8xf32>
    %572 = vector.multi_reduction <add>, %569, %cst_212 [1] : vector<8x32xf32> to vector<8xf32>
    %573 = vector.shape_cast %572 : vector<8xf32> to vector<8x1xf32>
    %cst_213 = arith.constant 3.200000e+01 : f32
    %574 = vector.broadcast %cst_213 : f32 to vector<8x1xf32>
    %575 = arith.divf %573, %574 : vector<8x1xf32>
    %576 = vector.broadcast %575 : vector<8x1xf32> to vector<8x32xf32>
    %577 = arith.subf %569, %576 : vector<8x32xf32>
    %578 = arith.mulf %577, %577 : vector<8x32xf32>
    %cst_214 = arith.constant dense<0.000000e+00> : vector<8xf32>
    %579 = vector.multi_reduction <add>, %578, %cst_214 [1] : vector<8x32xf32> to vector<8xf32>
    %580 = vector.shape_cast %579 : vector<8xf32> to vector<8x1xf32>
    %cst_215 = arith.constant 3.200000e+01 : f32
    %581 = vector.broadcast %cst_215 : f32 to vector<8x1xf32>
    %582 = arith.divf %580, %581 : vector<8x1xf32>
    %583 = vector.broadcast %575 : vector<8x1xf32> to vector<8x32xf32>
    %584 = arith.subf %569, %583 : vector<8x32xf32>
    %cst_216 = arith.constant 9.99999974E-6 : f32
    %585 = vector.broadcast %cst_216 : f32 to vector<8x1xf32>
    %586 = arith.addf %582, %585 : vector<8x1xf32>
    %587 = math.rsqrt %586 : vector<8x1xf32>
    %588 = vector.broadcast %587 : vector<8x1xf32> to vector<8x32xf32>
    %589 = arith.mulf %584, %588 : vector<8x32xf32>
    %590 = vector.broadcast %570 : vector<1x32xf32> to vector<8x32xf32>
    %591 = arith.mulf %589, %590 : vector<8x32xf32>
    %592 = vector.broadcast %571 : vector<1x32xf32> to vector<8x32xf32>
    %593 = arith.addf %591, %592 : vector<8x32xf32>
    %c0_217 = arith.constant 0 : index
    %c0_218 = arith.constant 0 : index
    %594 = vector.load %arg24[%c0_217, %c0_218] : memref<32x128xbf16, #tpu.memory_space<vmem>>, vector<32x128xbf16>
    %595 = arith.truncf %593 : vector<8x32xf32> to vector<8x32xbf16>
    %cst_219 = arith.constant dense<0.000000e+00> : vector<8x128xf32>
    %596 = tpu.matmul %595, %594, %cst_219 {dimension_numbers = #tpu.dot_dimension_numbers<[1], [0], [0], [1], [0, 0, 1, 1], [], []>} : vector<8x32xbf16>, vector<32x128xbf16>, vector<8x128xf32> -> vector<8x128xf32>
    %c0_220 = arith.constant 0 : index
    %c0_221 = arith.constant 0 : index
    %c0_222 = arith.constant 0 : index
    %597 = vector.load %arg25[%c0_220, %c0_221, %c0_222] : memref<1x8x128xf32, #tpu.memory_space<vmem>>, vector<1x8x128xf32>
    %598 = vector.shape_cast %597 : vector<1x8x128xf32> to vector<8x128xf32>
    %599 = vector.shape_cast %596 : vector<8x128xf32> to vector<1x8x128xf32>
    tpu.vector_store %arg25[%c0_220, %c0_221, %c0_222], %599 {strides = array<i32>} : memref<1x8x128xf32, #tpu.memory_space<vmem>>, vector<1x8x128xf32>,
    return
  }
  func.func @transform_0(%arg0: i32) -> (i32, i32, i32) {
    %c0_i32 = arith.constant 0 : i32
    %c0_i32_0 = arith.constant 0 : i32
    %c0_i32_1 = arith.constant 0 : i32
    return %arg0, %c0_i32, %c0_i32_0 : i32, i32, i32
  }
  func.func @transform_1(%arg0: i32) -> (i32, i32, i32) {
    %c0_i32 = arith.constant 0 : i32
    %c0_i32_0 = arith.constant 0 : i32
    %c0_i32_1 = arith.constant 0 : i32
    return %arg0, %c0_i32, %c0_i32_0 : i32, i32, i32
  }
  func.func @transform_2(%arg0: i32) -> (i32, i32, i32) {
    %c0_i32 = arith.constant 0 : i32
    %c0_i32_0 = arith.constant 0 : i32
    %c0_i32_1 = arith.constant 0 : i32
    return %arg0, %c0_i32, %c0_i32_0 : i32, i32, i32
  }
  func.func @transform_3(%arg0: i32) -> (i32, i32) {
    %c0_i32 = arith.constant 0 : i32
    %c0_i32_0 = arith.constant 0 : i32
    %c0_i32_1 = arith.constant 0 : i32
    return %c0_i32, %c0_i32_0 : i32, i32
  }
  func.func @transform_4(%arg0: i32) -> (i32, i32) {
    %c0_i32 = arith.constant 0 : i32
    %c0_i32_0 = arith.constant 0 : i32
    %c0_i32_1 = arith.constant 0 : i32
    return %c0_i32, %c0_i32_0 : i32, i32
  }
  func.func @transform_5(%arg0: i32) -> (i32, i32) {
    %c0_i32 = arith.constant 0 : i32
    %c0_i32_0 = arith.constant 0 : i32
    %c0_i32_1 = arith.constant 0 : i32
    return %c0_i32, %c0_i32_0 : i32, i32
  }
  func.func @transform_6(%arg0: i32) -> (i32, i32) {
    %c0_i32 = arith.constant 0 : i32
    %c0_i32_0 = arith.constant 0 : i32
    %c0_i32_1 = arith.constant 0 : i32
    return %c0_i32, %c0_i32_0 : i32, i32
  }
  func.func @transform_7(%arg0: i32) -> (i32, i32) {
    %c0_i32 = arith.constant 0 : i32
    %c0_i32_0 = arith.constant 0 : i32
    %c0_i32_1 = arith.constant 0 : i32
    return %c0_i32, %c0_i32_0 : i32, i32
  }
  func.func @transform_8(%arg0: i32) -> (i32, i32) {
    %c0_i32 = arith.constant 0 : i32
    %c0_i32_0 = arith.constant 0 : i32
    %c0_i32_1 = arith.constant 0 : i32
    return %c0_i32, %c0_i32_0 : i32, i32
  }
  func.func @transform_9(%arg0: i32) -> (i32, i32) {
    %c0_i32 = arith.constant 0 : i32
    %c0_i32_0 = arith.constant 0 : i32
    %c0_i32_1 = arith.constant 0 : i32
    return %c0_i32, %c0_i32_0 : i32, i32
  }
  func.func @transform_10(%arg0: i32) -> (i32, i32) {
    %c0_i32 = arith.constant 0 : i32
    %c0_i32_0 = arith.constant 0 : i32
    %c0_i32_1 = arith.constant 0 : i32
    return %c0_i32, %c0_i32_0 : i32, i32
  }
  func.func @transform_11(%arg0: i32) -> (i32, i32) {
    %c0_i32 = arith.constant 0 : i32
    %c0_i32_0 = arith.constant 0 : i32
    %c0_i32_1 = arith.constant 0 : i32
    return %c0_i32, %c0_i32_0 : i32, i32
  }
  func.func @transform_12(%arg0: i32) -> (i32, i32) {
    %c0_i32 = arith.constant 0 : i32
    %c0_i32_0 = arith.constant 0 : i32
    %c0_i32_1 = arith.constant 0 : i32
    return %c0_i32, %c0_i32_0 : i32, i32
  }
  func.func @transform_13(%arg0: i32) -> (i32, i32) {
    %c0_i32 = arith.constant 0 : i32
    %c0_i32_0 = arith.constant 0 : i32
    %c0_i32_1 = arith.constant 0 : i32
    return %c0_i32, %c0_i32_0 : i32, i32
  }
  func.func @transform_14(%arg0: i32) -> (i32, i32) {
    %c0_i32 = arith.constant 0 : i32
    %c0_i32_0 = arith.constant 0 : i32
    %c0_i32_1 = arith.constant 0 : i32
    return %c0_i32, %c0_i32_0 : i32, i32
  }
  func.func @transform_15(%arg0: i32) -> (i32, i32) {
    %c0_i32 = arith.constant 0 : i32
    %c0_i32_0 = arith.constant 0 : i32
    %c0_i32_1 = arith.constant 0 : i32
    return %c0_i32, %c0_i32_0 : i32, i32
  }
  func.func @transform_16(%arg0: i32) -> (i32, i32) {
    %c0_i32 = arith.constant 0 : i32
    %c0_i32_0 = arith.constant 0 : i32
    %c0_i32_1 = arith.constant 0 : i32
    return %c0_i32, %c0_i32_0 : i32, i32
  }
  func.func @transform_17(%arg0: i32) -> (i32, i32) {
    %c0_i32 = arith.constant 0 : i32
    %c0_i32_0 = arith.constant 0 : i32
    %c0_i32_1 = arith.constant 0 : i32
    return %c0_i32, %c0_i32_0 : i32, i32
  }
  func.func @transform_18(%arg0: i32) -> (i32, i32) {
    %c0_i32 = arith.constant 0 : i32
    %c0_i32_0 = arith.constant 0 : i32
    %c0_i32_1 = arith.constant 0 : i32
    return %c0_i32, %c0_i32_0 : i32, i32
  }
  func.func @transform_19(%arg0: i32) -> (i32, i32) {
    %c0_i32 = arith.constant 0 : i32
    %c0_i32_0 = arith.constant 0 : i32
    %c0_i32_1 = arith.constant 0 : i32
    return %c0_i32, %c0_i32_0 : i32, i32
  }
  func.func @transform_20(%arg0: i32) -> (i32, i32) {
    %c0_i32 = arith.constant 0 : i32
    %c0_i32_0 = arith.constant 0 : i32
    %c0_i32_1 = arith.constant 0 : i32
    return %c0_i32, %c0_i32_0 : i32, i32
  }
  func.func @transform_21(%arg0: i32) -> (i32, i32) {
    %c0_i32 = arith.constant 0 : i32
    %c0_i32_0 = arith.constant 0 : i32
    %c0_i32_1 = arith.constant 0 : i32
    return %c0_i32, %c0_i32_0 : i32, i32
  }
  func.func @transform_22(%arg0: i32) -> (i32, i32) {
    %c0_i32 = arith.constant 0 : i32
    %c0_i32_0 = arith.constant 0 : i32
    %c0_i32_1 = arith.constant 0 : i32
    return %c0_i32, %c0_i32_0 : i32, i32
  }
  func.func @transform_23(%arg0: i32) -> (i32, i32) {
    %c0_i32 = arith.constant 0 : i32
    %c0_i32_0 = arith.constant 0 : i32
    %c0_i32_1 = arith.constant 0 : i32
    return %c0_i32, %c0_i32_0 : i32, i32
  }
  func.func @transform_24(%arg0: i32) -> (i32, i32, i32) {
    %c0_i32 = arith.constant 0 : i32
    %c0_i32_0 = arith.constant 0 : i32
    %c0_i32_1 = arith.constant 0 : i32
    return %arg0, %c0_i32, %c0_i32_0 : i32, i32, i32
  }
  func.func @transform_25(%arg0: i32) -> (i32, i32, i32, i32) {
    %c0_i32 = arith.constant 0 : i32
    %c0_i32_0 = arith.constant 0 : i32
    %c0_i32_1 = arith.constant 0 : i32
    %c0_i32_2 = arith.constant 0 : i32
    return %c0_i32, %arg0, %c0_i32_0, %c0_i32_1 : i32, i32, i32, i32
  }
}

</mosaic_0001>

<bundles_post_ra>
// kernel: _lambda_.2
= control target key start
LH: loop header
LB: loop body
LE: loop exit
PB: predicated region body
PF: predicated region fallthrough
CT: control target
= control target key end

     0   :  { %s2700_s25 = smov 0   ;;  %s3128_s0 = inlined_call_operand.vmem [shape: f32[2,16,32], index: 0, kind: input, shape index: {}]   ;;  %s3129_s1 = inlined_call_operand.vmem [shape: bf16[32,96], index: 1, kind: input, shape index: {}]   ;;  %s3130_s2 = inlined_call_operand.vmem [shape: f32[1,96], index: 2, kind: input, shape index: {}]   ;;  %s3131_s3 = inlined_call_operand.vmem [shape: bf16[32,32], index: 3, kind: input, shape index: {}]   ;;  %s3132_s4 = inlined_call_operand.vmem [shape: f32[1,32], index: 4, kind: input, shape index: {}]   ;;  %s3133_s5 = inlined_call_operand.vmem [shape: f32[1,32], index: 5, kind: input, shape index: {}]   ;;  %s3134_s6 = inlined_call_operand.vmem [shape: f32[1,32], index: 6, kind: input, shape index: {}]   ;;  %s3135_s7 = inlined_call_operand.vmem [shape: bf16[32,64], index: 7, kind: input, shape index: {}]   ;;  %s3136_s8 = inlined_call_operand.vmem [shape: f32[1,64], index: 8, kind: input, shape index: {}]   ;;  %s3137_s9 = inlined_call_operand.vmem [shape: bf16[64,32], index: 9, kind: input, shape index: {}]   ;;  %s3138_s10 = inlined_call_operand.vmem [shape: f32[1,32], index: 10, kind: input, shape index: {}]   ;;  %s3139_s11 = inlined_call_operand.vmem [shape: f32[1,32], index: 11, kind: input, shape index: {}]   ;;  %s3140_s12 = inlined_call_operand.vmem [shape: f32[1,32], index: 12, kind: input, shape index: {}]   ;;  %s3141_s13 = inlined_call_operand.vmem [shape: f32[2,16,32], index: 13, kind: output, shape index: {}]  }
   0x1 LB: > { %s2179_s26 = sadd.s32 4294967295, %s2612_s25   ;;  %p2183_p0 = scmp.ge.s32.totalorder %s2612_s25, 1  ;;  %s2612_s25 = sphi %s2700_s25, %s23_s25  }
   0x2   : > { %p387_p1 = scmp.lt.s32.totalorder %s2612_s25, 3 }
   0x4   : > { %p388_p2 = pnand %p2183_p0, %p387_p1 }
   0x5   : > { %p431_p3 = scmp.lt.s32.totalorder (!%p388_p2), %s2179_s26, 1  ;;  %s2616_s20 = smov (!%p388_p2), 120  }
   0x6   : > { %391 = sbr.rel (%p388_p2) target bundleno = 4919 (0x1337), region = 72  ;;  %s2617_s21 = smov (!%p388_p2), 96  }
   0x7   : > { %s2618_s22 = smov (!%p388_p2), 80   ;;  %s2619_s23 = smov (!%p388_p2), 88  }
   0x8   : > { %s2620_s24 = smov (!%p388_p2), 72   ;;  %s2621_s27 = smov (!%p388_p2), 112  }
   0x9   : > { %s2622_s28 = smov (!%p388_p2), 104   ;;  %s2623_s29 = smov (!%p388_p2), 56  }
   0xa   : > { %s2624_s30 = smov (!%p388_p2), 64   ;;  %s3147_s15 = smov (!%p388_p2), 48  }
   0xb   : > { %v2711_v0 = vld [vmem:[%s3129_s1 + $0x8] sm:$0xff]   ;;  %v2614_v1 = vmov 0.0   ;;  %v2719_v2 = vld [vmem:[%s3129_s1] sm:$0xff]   ;;  %vm2615_vm0 = vmmov 0   ;;  %s3155_s26 = smov (!%p431_p3, %s2179_s26), 1  ;;  %vm491_vm1 = vcmask 261120  }
   0xc   : > { %2294 = vmatprep.subr.bf16.mxu1 %v2614_v1  ;;  %2308 = vmatprep.subr.bf16.mxu0 %v2614_v1  ;;  %s3142_s14 = sshll.u32 %s3155_s26, 4  ;;  %v2748_v7 = vld [vmem:[%s3130_s2] ss:$0 sm:$0xff]  ;;  %vm540_vm2 = vcmask 64512   ;;  %vm590_vm3 = vcmask 130048   ;;  %s3143_s16 = smov 40  }
   0xd   : > { %2295 = vmatpush3.bf16.msra.mxu1 %v2711_v0  ;;  %2298 = vmatprep.mubr.msk.bf16.mxu1 %vm2615_vm0, %v2614_v1  ;;  %s435_s17 = scalar_lea.vmem %s3128_s0, %s3142_s14  ;;  %s3146_s19 = smov 8   ;;  %vm1058_vm4 = vcmask 195584   ;;  %vm1265_vm5 = vcmask 523264  }
   0xe   : > { %2296 = vmatprep.subr.bf16.mxu1 %v2614_v1  ;;  %2310 = vmatprep.mubr.msk.bf16.mxu0 %vm2615_vm0, %v2614_v1  ;;  %v2736_v3 = vld [vmem:[%s435_s17] sm:$0xff]  ;;  %v2738_v4 = vld [vmem:[%s435_s17 + $0x8] sm:$0xff]  ;;  %s3145_s17 = smov 16   ;;  %s3144_s18 = smov 24  }
   0xf   : > { %v472_v5 = vpack.c.bf16 %v2738_v4, %v2736_v3 }
  0x11   : > { %2297 = vmatpush3.bf16.msra.mxu1 %v2719_v2 }
  0x12   : > { %2302 = vmatprep.subr.bf16.mxu1 %v2614_v1 }
  0x14   : > { %2299 = vmatmul.mubr.msk.bf16.vlgmr.msra.gmra.mxu1 %vm491_vm1, %v472_v5 }
  0x15   : > { %2304 = vmatprep.mubr.msk.bf16.mxu1 %vm2615_vm0, %v2614_v1 }
  0xd4   : > { %v529_v6 = vpop.f32.mrf.mxu1 }
  0xd5   : > { %v530_v10 = vadd.f32 %v2748_v7, %v529_v6 }
  0xd6   : > { %v2300_v8 = vpop.f32.mrf.mxu1 }
  0xd8   : > { %v532_v9 = vpop.f32.mrf.mxu1 }
  0xd9   : > { %v533_v11 = vadd.f32 %v2748_v7, %v532_v9 }
  0xda   : > { %v2301_v12 = vpop.f32.mrf.mxu1 }
  0xdb   : > { %v2752_v13 = vpack.c.bf16 %v533_v11, %v530_v10 }
  0xdd   : > { %661 = vrot.lane.b32.xlu1 %v2752_v13, %s2616_s20  ;;  %538 = vrot.lane.b32.xlu0 %v2752_v13, %s2617_s21 }
  0xe1   : > { %786 = vrot.lane.b32.xlu1 %v2752_v13, %s2618_s22  ;;  %663 = vrot.lane.b32.xlu0 %v2752_v13, %s2619_s23 }
  0xe5   : > { %909 = vrot.lane.b32.xlu1 %v2752_v13, %s2620_s24  ;;  %784 = vrot.lane.b32.xlu0 %v2752_v13, %s2621_s27 }
  0xe9   : > { %907 = vrot.lane.b32.xlu0 %v2752_v13, %s2622_s28 }
 0x14f   : > { %v539_v14 = vpop.permute.xlu0 %538  ;;  %v662_v17 = vpop.permute.xlu1 %661 }
 0x150   : > { %v545_v15 = vsel %vm540_vm2, %v539_v14, 0 }
 0x151   : > { %2303 = vmatpush3.bf16.xpose.msra.mxu1 %v545_v15 }
 0x152   : > { %2314 = vmatprep.subr.bf16.mxu1 %v2614_v1 }
 0x153   : > { %v664_v16 = vpop.permute.xlu0 %663  ;;  %v787_v19 = vpop.permute.xlu1 %786 }
 0x154   : > { %v669_v18 = vsel %vm540_vm2, %v664_v16, 0  ;;  %v792_v20 = vsel %vm540_vm2, %v787_v19, 0 }
 0x157   : > { %v910_v21 = vpop.permute.xlu1 %909  ;;  %v785_v22 = vpop.permute.xlu0 %784 }
 0x158   : > { %2305 = vmatmul.mubr.msk.bf16.vlgmr.msra.gmra.mxu1 %vm540_vm2, %v2752_v13  ;;  %v915_v23 = vsel %vm540_vm2, %v910_v21, 0 }
 0x159   : > { %2315 = vmatpush3.bf16.xpose.msra.mxu1 %v669_v18  ;;  %2316 = vmatprep.mubr.msk.bf16.mxu1 %vm2615_vm0, %v2614_v1 }
 0x15a   : > { %2326 = vmatprep.subr.bf16.mxu1 %v2614_v1 }
 0x15b   : > { %v908_v24 = vpop.permute.xlu0 %907 }
 0x160   : > { %2317 = vmatmul.mubr.msk.bf16.vlgmr.msra.gmra.mxu1 %vm540_vm2, %v662_v17 }
 0x161   : > { %2327 = vmatpush3.bf16.xpose.msra.mxu1 %v792_v20  ;;  %2328 = vmatprep.mubr.msk.bf16.mxu1 %vm2615_vm0, %v2614_v1 }
 0x162   : > { %2338 = vmatprep.subr.bf16.mxu1 %v2614_v1 }
 0x168   : > { %2329 = vmatmul.mubr.msk.bf16.vlgmr.msra.gmra.mxu1 %vm540_vm2, %v785_v22 }
 0x169   : > { %2339 = vmatpush3.bf16.xpose.msra.mxu1 %v915_v23  ;;  %2340 = vmatprep.mubr.msk.bf16.mxu1 %vm2615_vm0, %v2614_v1 }
 0x16a   : > { %2350 = vmatprep.subr.bf16.mxu1 %v2614_v1 }
 0x170   : > { %2341 = vmatmul.mubr.msk.bf16.vlgmr.msra.gmra.mxu1 %vm540_vm2, %v908_v24 }
 0x171   : > { %2354 = vmatprep.mubr.msk.bf16.mxu1 %vm2615_vm0, %v2614_v1 }
 0x218   : > { %v581_v25 = vpop.f32.mrf.mxu1 }
 0x219   : > { %v588_v26 = vmul.f32 0.35355338, %v581_v25 }
 0x21a   : > { %v2306_v27 = vpop.f32.mrf.mxu1 }
 0x21b   : > { %v591_v28 = vsel %vm590_vm3, %v588_v26, -inf }
 0x21c   : > { %592 = vmax.xlane.f32.xlu1 %v591_v28  ;;  %v584_v29 = vpop.f32.mrf.mxu1 }
 0x21d   : > { %v589_v30 = vmul.f32 0.35355338, %v584_v29 }
 0x21e   : > { %v2307_v31 = vpop.f32.mrf.mxu1 }
 0x21f   : > { %v594_v32 = vsel %vm590_vm3, %v589_v30, -inf }
 0x220   : > { %595 = vmax.xlane.f32.xlu0 %v594_v32  ;;  %v705_v33 = vpop.f32.mrf.mxu1 }
 0x221   : > { %v712_v34 = vmul.f32 0.35355338, %v705_v33 }
 0x222   : > { %v2318_v35 = vpop.f32.mrf.mxu1 }
 0x223   : > { %v714_v36 = vsel %vm590_vm3, %v712_v34, -inf }
 0x224   : > { %715 = vmax.xlane.f32.xlu0 %v714_v36  ;;  %v708_v37 = vpop.f32.mrf.mxu1 }
 0x225   : > { %v713_v38 = vmul.f32 0.35355338, %v708_v37 }
 0x226   : > { %v2319_v39 = vpop.f32.mrf.mxu1 }
 0x227   : > { %v717_v40 = vsel %vm590_vm3, %v713_v38, -inf }
 0x228   : > { %718 = vmax.xlane.f32.xlu1 %v717_v40  ;;  %v828_v41 = vpop.f32.mrf.mxu1 }
 0x229   : > { %v835_v42 = vmul.f32 0.35355338, %v828_v41 }
 0x22a   : > { %v2330_v43 = vpop.f32.mrf.mxu1 }
 0x22b   : > { %v837_v44 = vsel %vm590_vm3, %v835_v42, -inf }
 0x22c   : > { %838 = vmax.xlane.f32.xlu0 %v837_v44  ;;  %v831_v45 = vpop.f32.mrf.mxu1 }
 0x22d   : > { %v836_v46 = vmul.f32 0.35355338, %v831_v45 }
 0x22e   : > { %v2331_v47 = vpop.f32.mrf.mxu1 }
 0x22f   : > { %v840_v48 = vsel %vm590_vm3, %v836_v46, -inf }
 0x230   : > { %841 = vmax.xlane.f32.xlu1 %v840_v48  ;;  %v951_v49 = vpop.f32.mrf.mxu1 }
 0x231   : > { %v958_v50 = vmul.f32 0.35355338, %v951_v49 }
 0x232   : > { %v2342_v51 = vpop.f32.mrf.mxu1 }
 0x233   : > { %v960_v52 = vsel %vm590_vm3, %v958_v50, -inf }
 0x234   : > { %961 = vmax.xlane.f32.xlu0 %v960_v52  ;;  %v954_v53 = vpop.f32.mrf.mxu1 }
 0x235   : > { %v959_v54 = vmul.f32 0.35355338, %v954_v53 }
 0x236   : > { %v2343_v55 = vpop.f32.mrf.mxu1 }
 0x237   : > { %v963_v56 = vsel %vm590_vm3, %v959_v54, -inf }
 0x238   : > { %964 = vmax.xlane.f32.xlu1 %v963_v56 }
 0x2a5   : > { %v593_v57 = vpop.xlane.xlu1 %592 }
 0x2a6   : > { %v597_v58 = vsub.f32 %v588_v26, %v593_v57 }
 0x2a8   : > { %v599_v59 = vmul.f32 1.442695, %v597_v58 }
 0x2a9   : > { %v596_v60 = vpop.xlane.xlu0 %595 }
 0x2aa   : > { %2526 = vpow2.f32 %v599_v59  ;;  %v598_v61 = vsub.f32 %v589_v30, %v596_v60 }
 0x2ac   : > { %v601_v62 = vmul.f32 1.442695, %v598_v61 }
 0x2ad   : > { %v716_v63 = vpop.xlane.xlu0 %715 }
 0x2ae   : > { %2528 = vpow2.f32 %v601_v62  ;;  %v720_v5 = vsub.f32 %v712_v34, %v716_v63 }
 0x2b0   : > { %v722_v6 = vmul.f32 1.442695, %v720_v5 }
 0x2b1   : > { %v719_v15 = vpop.xlane.xlu1 %718 }
 0x2b2   : > { %2530 = vpow2.f32 %v722_v6  ;;  %v721_v16 = vsub.f32 %v713_v38, %v719_v15 }
 0x2b4   : > { %v724_v20 = vmul.f32 1.442695, %v721_v16 }
 0x2b5   : > { %v839_v17 = vpop.xlane.xlu0 %838 }
 0x2b6   : > { %v843_v19 = vsub.f32 %v835_v42, %v839_v17  ;;  %2532 = vpow2.f32 %v724_v20 }
 0x2b7   : > { %v2527_v8 = vpop.eup %2526 }
 0x2b8   : > { %v603_v9 = vsel %vm590_vm3, %v2527_v8, 0.0  ;;  %v845_v24 = vmul.f32 1.442695, %v843_v19 }
 0x2b9   : > { %604 = vadd.xlane.f32.xlu0 %v603_v9  ;;  %v842_v18 = vpop.xlane.xlu1 %841 }
 0x2ba   : > { %v844_v21 = vsub.f32 %v836_v46, %v842_v18  ;;  %2534 = vpow2.f32 %v845_v24 }
 0x2bb   : > { %v2529_v10 = vpop.eup %2528 }
 0x2bc   : > { %v606_v11 = vsel %vm590_vm3, %v2529_v10, 0.0  ;;  %v847_v26 = vmul.f32 1.442695, %v844_v21  ;;  %v2840_v21 = vld [vmem:[%s3131_s3 + $0x8] sm:$0xff]  }
 0x2bd   : > { %607 = vadd.xlane.f32.xlu1 %v606_v11  ;;  %v962_v22 = vpop.xlane.xlu0 %961  ;;  %2351 = vmatpush3.bf16.msra.mxu1 %v2840_v21 }
 0x2be   : > { %v966_v25 = vsub.f32 %v958_v50, %v962_v22  ;;  %2536 = vpow2.f32 %v847_v26  ;;  %2352 = vmatprep.subr.bf16.mxu1 %v2614_v1  ;;  %v2848_v26 = vld [vmem:[%s3131_s3] sm:$0xff]  }
 0x2bf   : > { %v2799_v12 = vpop.eup %2530 }
 0x2c0   : > { %v726_v14 = vsel %vm590_vm3, %v2799_v12, 0.0  ;;  %v968_v28 = vmul.f32 1.442695, %v966_v25 }
 0x2c1   : > { %727 = vadd.xlane.f32.xlu0 %v726_v14  ;;  %v965_v23 = vpop.xlane.xlu1 %964  ;;  %2353 = vmatpush3.bf16.msra.mxu1 %v2848_v26 }
 0x2c2   : > { %v967_v27 = vsub.f32 %v959_v54, %v965_v23  ;;  %2538 = vpow2.f32 %v968_v28  ;;  %2366 = vmatprep.subr.bf16.mxu1 %v2614_v1 }
 0x2c3   : > { %v2533_v30 = vpop.eup %2532 }
 0x2c4   : > { %v970_v29 = vmul.f32 1.442695, %v967_v27  ;;  %v729_v32 = vsel %vm590_vm3, %v2533_v30, 0.0 }
 0x2c6   : > { %2540 = vpow2.f32 %v970_v29 }
 0x2c7   : > { %v2535_v31 = vpop.eup %2534 }
 0x2c8   : > { %v849_v35 = vsel %vm590_vm3, %v2535_v31, 0.0 }
 0x2cb   : > { %v2537_v33 = vpop.eup %2536 }
 0x2cc   : > { %v852_v36 = vsel %vm590_vm3, %v2537_v33, 0.0 }
 0x2ce   : > { %737 = vrot.lane.b32.xlu1 %v2752_v13, %s2623_s29 }
 0x2cf   : > { %v2808_v34 = vpop.eup %2538 }
 0x2d0   : > { %v972_v38 = vsel %vm590_vm3, %v2808_v34, 0.0 }
 0x2d3   : > { %v2541_v37 = vpop.eup %2540 }
 0x2d4   : > { %v975_v39 = vsel %vm590_vm3, %v2541_v37, 0.0 }
 0x2d7   : > { %614 = vrot.lane.b32.xlu0 %v2752_v13, %s2624_s30 }
 0x2f2   : > { %730 = vadd.xlane.f32.xlu1 %v729_v32 }
 0x2f6   : > { %850 = vadd.xlane.f32.xlu0 %v849_v35  ;;  %853 = vadd.xlane.f32.xlu1 %v852_v36 }
 0x2fa   : > { %973 = vadd.xlane.f32.xlu0 %v972_v38  ;;  %976 = vadd.xlane.f32.xlu1 %v975_v39 }
 0x30b   : > { %860 = vrot.lane.b32.xlu1 %v2752_v13, %s3147_s15 }
 0x310   : > { %983 = vrot.lane.b32.xlu0 %v2752_v13, %s3143_s16 }
 0x342   : > { %v605_v40 = vpop.xlane.xlu0 %604 }
 0x343   : > { %2542 = vrcp.f32 %v605_v40 }
 0x346   : > { %v608_v41 = vpop.xlane.xlu1 %607 }
 0x347   : > { %2544 = vrcp.f32 %v608_v41 }
 0x34a   : > { %v728_v42 = vpop.xlane.xlu0 %727  ;;  %v738_v49 = vpop.permute.xlu1 %737 }
 0x34b   : > { %2546 = vrcp.f32 %v728_v42 }
 0x34e   : > { %v615_v43 = vpop.permute.xlu0 %614 }
 0x34f   : > { %2309 = vmatpush3.bf16.msra.mxu0 %v615_v43 }
 0x350   : > { %2320 = vmatprep.subr.bf16.mxu0 %v2614_v1  ;;  %v2543_v44 = vpop.eup %2542 }
 0x351   : > { %v611_v46 = vmul.f32 %v2543_v44, %v2527_v8 }
 0x354   : > { %v2545_v45 = vpop.eup %2544 }
 0x355   : > { %v612_v47 = vmul.f32 %v2545_v45, %v2529_v10 }
 0x357   : > { %v613_v48 = vpack.c.bf16 %v612_v47, %v611_v46 }
 0x358   : > { %v2547_v54 = vpop.eup %2546 }
 0x359   : > { %2311 = vmatmul.mubr.msk.bf16.vlgmr.msra.gmra.mxu0 %vm590_vm3, %v613_v48  ;;  %v734_v56 = vmul.f32 %v2547_v54, %v2799_v12 }
 0x35a   : > { %2321 = vmatpush3.bf16.msra.mxu0 %v738_v49  ;;  %2322 = vmatprep.mubr.msk.bf16.mxu0 %vm2615_vm0, %v2614_v1 }
 0x35b   : > { %2332 = vmatprep.subr.bf16.mxu0 %v2614_v1 }
 0x37b   : > { %v731_v13 = vpop.xlane.xlu1 %730 }
 0x37c   : > { %2548 = vrcp.f32 %v731_v13 }
 0x37f   : > { %v851_v50 = vpop.xlane.xlu0 %850  ;;  %v854_v51 = vpop.xlane.xlu1 %853 }
 0x380   : > { %2550 = vrcp.f32 %v851_v50  ;;  %v2866_v50 = vld [vmem:[%s3132_s4] ss:$0 sm:$0xff] }
 0x381   : > { %2552 = vrcp.f32 %v854_v51 }
 0x383   : > { %v974_v52 = vpop.xlane.xlu0 %973  ;;  %v977_v53 = vpop.xlane.xlu1 %976 }
 0x384   : > { %2554 = vrcp.f32 %v974_v52 }
 0x385   : > { %2556 = vrcp.f32 %v977_v53 }
 0x387   : > { %v861_v61 = vpop.permute.xlu1 %860  ;;  %v984_v9 = vpop.permute.xlu0 %983 }
 0x389   : > { %v2549_v55 = vpop.eup %2548 }
 0x38a   : > { %v735_v57 = vmul.f32 %v2549_v55, %v2533_v30 }
 0x38c   : > { %v736_v58 = vpack.c.bf16 %v735_v57, %v734_v56 }
 0x38d   : > { %v2551_v59 = vpop.eup %2550 }
 0x38e   : > { %v2553_v60 = vpop.eup %2552  ;;  %2323 = vmatmul.mubr.msk.bf16.vlgmr.msra.gmra.mxu0 %vm590_vm3, %v736_v58  ;;  %v857_v62 = vmul.f32 %v2551_v59, %v2535_v31 }
 0x38f   : > { %2333 = vmatpush3.bf16.msra.mxu0 %v861_v61  ;;  %2334 = vmatprep.mubr.msk.bf16.mxu0 %vm2615_vm0, %v2614_v1  ;;  %v858_v63 = vmul.f32 %v2553_v60, %v2537_v33 }
 0x390   : > { %2344 = vmatprep.subr.bf16.mxu0 %v2614_v1 }
 0x391   : > { %v2555_v5 = vpop.eup %2554  ;;  %v859_v6 = vpack.c.bf16 %v858_v63, %v857_v62 }
 0x392   : > { %v2557_v8 = vpop.eup %2556  ;;  %v980_v10 = vmul.f32 %v2555_v5, %v2808_v34 }
 0x393   : > { %v981_v11 = vmul.f32 %v2557_v8, %v2541_v37 }
 0x395   : > { %v982_v12 = vpack.c.bf16 %v981_v11, %v980_v10 }
 0x396   : > { %2335 = vmatmul.mubr.msk.bf16.vlgmr.msra.gmra.mxu0 %vm590_vm3, %v859_v6 }
 0x397   : > { %2345 = vmatpush3.bf16.msra.mxu0 %v984_v9  ;;  %2346 = vmatprep.mubr.msk.bf16.mxu0 %vm2615_vm0, %v2614_v1 }
 0x398   : > { %2358 = vmatprep.subr.bf16.mxu0 %v2614_v1 }
 0x39e   : > { %2347 = vmatmul.mubr.msk.bf16.vlgmr.msra.gmra.mxu0 %vm590_vm3, %v982_v12  ;;  %v2885_v12 = vld [vmem:[%s3135_s7] sm:$0xff]  }
 0x39f   : > { %2362 = vmatprep.mubr.msk.bf16.mxu0 %vm2615_vm0, %v2614_v1 }
 0x419   : > { %v654_v14 = vpop.f32.mrf.mxu0 }
 0x41b   : > { %v2312_v15 = vpop.f32.mrf.mxu0 }
 0x41d   : > { %v657_v16 = vpop.f32.mrf.mxu0 }
 0x41f   : > { %v2313_v17 = vpop.f32.mrf.mxu0 }
 0x44e   : > { %v777_v18 = vpop.f32.mrf.mxu0 }
 0x450   : > { %v2324_v19 = vpop.f32.mrf.mxu0 }
 0x452   : > { %v780_v20 = vpop.f32.mrf.mxu0 }
 0x453   : > { %v2486_v22 = vpack.i.bf16 %v780_v20, %v777_v18 }
 0x454   : > { %v2325_v23 = vpop.f32.mrf.mxu0 }
 0x455   : > { %2487 = vrot.lane.b32.xlu1 %v2486_v22, %s3146_s19 }
 0x456   : > { %v900_v24 = vpop.f32.mrf.mxu0 }
 0x458   : > { %v2336_v25 = vpop.f32.mrf.mxu0 }
 0x45a   : > { %v903_v27 = vpop.f32.mrf.mxu0 }
 0x45b   : > { %v2491_v28 = vpack.i.bf16 %v903_v27, %v900_v24  ;;  %v2900_v24 = vld [vmem:[%s3133_s5] ss:$0 sm:$0xff] }
 0x45c   : > { %v2337_v29 = vpop.f32.mrf.mxu0 }
 0x45d   : > { %2492 = vrot.lane.b32.xlu0 %v2491_v28, %s3145_s17  ;;  %v2906_v29 = vld [vmem:[%s3134_s6] ss:$0 sm:$0xff] }
 0x45e   : > { %v1023_v30 = vpop.f32.mrf.mxu0 }
 0x460   : > { %v2348_v31 = vpop.f32.mrf.mxu0 }
 0x462   : > { %v1026_v32 = vpop.f32.mrf.mxu0 }
 0x463   : > { %v2496_v33 = vpack.i.bf16 %v1026_v32, %v1023_v30 }
 0x464   : > { %v2349_v34 = vpop.f32.mrf.mxu0 }
 0x465   : > { %2497 = vrot.lane.b32.xlu1 %v2496_v33, %s3144_s18  ;;  %v2921_v34 = vld [vmem:[%s3137_s9 + $0x10] sm:$0xff]  }
 0x4c7   : > { %v2488_v35 = vpop.permute.xlu1 %2487 }
 0x4c8   : > { %v2490_v37 = vunpack.i.h.bf16 %v2488_v35  ;;  %v2489_v38 = vunpack.i.l.bf16 %v2488_v35  ;;  %v2942_v35 = vld [vmem:[%s3136_s8] ss:$0 sm:$0xff] }
 0x4ca   : > { %v1055_v42 = vsel %vm540_vm2, %v657_v16, %v2490_v37  ;;  %v1054_v43 = vsel %vm540_vm2, %v654_v14, %v2489_v38  ;;  %v2893_v14 = vld [vmem:[%s3137_s9 + $0x18] sm:$0xff]  }
 0x4cf   : > { %v2493_v36 = vpop.permute.xlu0 %2492 }
 0x4d0   : > { %v2495_v39 = vunpack.i.h.bf16 %v2493_v36  ;;  %v2494_v40 = vunpack.i.l.bf16 %v2493_v36 }
 0x4d2   : > { %v1056_v46 = vsel %vm590_vm3, %v1054_v43, %v2494_v40  ;;  %v1057_v47 = vsel %vm590_vm3, %v1055_v42, %v2495_v39 }
 0x4d7   : > { %v2498_v41 = vpop.permute.xlu1 %2497 }
 0x4d8   : > { %v2500_v44 = vunpack.i.h.bf16 %v2498_v41  ;;  %v2499_v45 = vunpack.i.l.bf16 %v2498_v41 }
 0x4da   : > { %v1059_v48 = vsel %vm1058_vm4, %v1056_v46, %v2499_v45  ;;  %v1060_v49 = vsel %vm1058_vm4, %v1057_v47, %v2500_v44  ;;  %v2952_v45 = vld [vmem:[%s3138_s10] ss:$0 sm:$0xff] }
 0x4db   : > { %v1061_v13 = vpack.c.bf16 %v1060_v49, %v1059_v48 }
 0x4dd   : > { %2355 = vmatmul.mubr.msk.bf16.vlgmr.msra.gmra.mxu1 %vm491_vm1, %v1061_v13 }
 0x4de   : > { %2374 = vmatprep.mubr.msk.bf16.mxu1 %vm2615_vm0, %v2614_v1  ;;  %2367 = vmatpush3.bf16.msra.mxu1 %v2893_v14 }
 0x4df   : > { %2368 = vmatprep.subr.bf16.mxu1 %v2614_v1 }
 0x4e2   : > { %2369 = vmatpush3.bf16.msra.mxu1 %v2921_v34 }
 0x4e3   : > { %2370 = vmatprep.subr.bf16.mxu1 %v2614_v1 }
 0x59d   : > { %v1117_v51 = vpop.f32.mrf.mxu1 }
 0x59e   : > { %v1118_v52 = vadd.f32 %v2866_v50, %v1117_v51 }
 0x59f   : > { %v2356_v53 = vpop.f32.mrf.mxu1 }
 0x5a0   : > { %v1124_v54 = vadd.f32 %v1118_v52, %v2736_v3 }
 0x5a1   : > { %v1120_v55 = vpop.f32.mrf.mxu1 }
 0x5a2   : > { %v1121_v56 = vadd.f32 %v2866_v50, %v1120_v55  ;;  %v1126_v57 = vsel %vm491_vm1, %v1124_v54, 0.0 }
 0x5a3   : > { %1127 = vadd.xlane.f32.xlu0 %v1126_v57  ;;  %v2357_v58 = vpop.f32.mrf.mxu1 }
 0x5a4   : > { %v1125_v59 = vadd.f32 %v1121_v56, %v2738_v4  ;;  %v2879_v4 = vld [vmem:[%s3135_s7 + $0x8] sm:$0xff]  }
 0x5a5   : > { %2359 = vmatpush3.bf16.msra.mxu0 %v2879_v4 }
 0x5a6   : > { %v1129_v60 = vsel %vm491_vm1, %v1125_v59, 0.0  ;;  %2360 = vmatprep.subr.bf16.mxu0 %v2614_v1 }
 0x5a7   : > { %1130 = vadd.xlane.f32.xlu1 %v1129_v60 }
 0x5a9   : > { %2361 = vmatpush3.bf16.msra.mxu0 %v2885_v12 }
 0x5aa   : > { %2378 = vmatprep.subr.bf16.mxu0 %v2614_v1 }
 0x62c   : > { %v1128_v61 = vpop.xlane.xlu0 %1127 }
 0x62d   : > { %v1133_v62 = vmul.f32 0.03125, %v1128_v61 }
 0x62f   : > { %v1135_v63 = vsub.f32 %v1124_v54, %v1133_v62 }
 0x630   : > { %v1131_v5 = vpop.xlane.xlu1 %1130 }
 0x631   : > { %v1134_v6 = vmul.f32 0.03125, %v1131_v5  ;;  %v1137_v8 = vmul.f32 %v1135_v63, %v1135_v63 }
 0x633   : > { %v1136_v9 = vsub.f32 %v1125_v59, %v1134_v6  ;;  %v1139_v3 = vsel %vm491_vm1, %v1137_v8, 0.0 }
 0x634   : > { %1140 = vadd.xlane.f32.xlu0 %v1139_v3 }
 0x635   : > { %v1138_v10 = vmul.f32 %v1136_v9, %v1136_v9 }
 0x637   : > { %v1142_v11 = vsel %vm491_vm1, %v1138_v10, 0.0 }
 0x638   : > { %1143 = vadd.xlane.f32.xlu0 %v1142_v11 }
 0x6bd   : > { %v1141_v15 = vpop.xlane.xlu0 %1140 }
 0x6be   : > { %v1145_v16 = vmul.f32 0.03125, %v1141_v15 }
 0x6c0   : > { %v1147_v17 = vadd.f32 1e-05, %v1145_v16 }
 0x6c1   : > { %v1144_v18 = vpop.xlane.xlu0 %1143 }
 0x6c2   : > { %2558 = vrsqrt.f32 %v1147_v17  ;;  %v1146_v19 = vmul.f32 0.03125, %v1144_v18  ;;  %v2963_v18 = vld [vmem:[%s3139_s11] ss:$0 sm:$0xff] }
 0x6c4   : > { %v1148_v20 = vadd.f32 1e-05, %v1146_v19 }
 0x6c6   : > { %2560 = vrsqrt.f32 %v1148_v20 }
 0x6cf   : > { %v2559_v22 = vpop.eup %2558 }
 0x6d0   : > { %v1151_v23 = vmul.f32 %v2559_v22, %v1135_v63 }
 0x6d2   : > { %v1159_v28 = vmul.f32 %v2900_v24, %v1151_v23  ;;  %v2969_v23 = vld [vmem:[%s3140_s12] ss:$0 sm:$0xff] }
 0x6d3   : > { %v2561_v25 = vpop.eup %2560 }
 0x6d4   : > { %v1152_v27 = vmul.f32 %v2561_v25, %v1136_v9  ;;  %v1167_v31 = vadd.f32 %v2906_v29, %v1159_v28 }
 0x6d6   : > { %v1160_v30 = vmul.f32 %v2900_v24, %v1152_v27 }
 0x6d8   : > { %v1168_v32 = vadd.f32 %v2906_v29, %v1160_v30 }
 0x6da   : > { %v1169_v33 = vpack.c.bf16 %v1168_v32, %v1167_v31 }
 0x6dc   : > { %2363 = vmatmul.mubr.msk.bf16.vlgmr.msra.gmra.mxu0 %vm491_vm1, %v1169_v33 }
 0x6dd   : > { %2379 = vmatpush3.bf16.msra.mxu0 %v2711_v0  ;;  %2382 = vmatprep.mubr.msk.bf16.mxu0 %vm2615_vm0, %v2614_v1  ;;  %v2928_v0 = vld [vmem:[%s3137_s9 + $0x8] sm:$0xff]  }
 0x6de   : > { %2380 = vmatprep.subr.bf16.mxu0 %v2614_v1  ;;  %2371 = vmatpush3.bf16.msra.mxu1 %v2928_v0 }
 0x6df   : > { %2372 = vmatprep.subr.bf16.mxu1 %v2614_v1 }
 0x6e1   : > { %2381 = vmatpush3.bf16.msra.mxu0 %v2719_v2  ;;  %v2935_v2 = vld [vmem:[%s3137_s9] sm:$0xff]  }
 0x6e2   : > { %2386 = vmatprep.subr.bf16.mxu0 %v2614_v1  ;;  %2373 = vmatpush3.bf16.msra.mxu1 %v2935_v2 }
 0x6e3   : > { %2392 = vmatprep.subr.bf16.mxu1 %v2614_v1 }
 0x79c   : > { %v1225_v36 = vpop.f32.mrf.mxu0 }
 0x79d   : > { %v1226_v38 = vadd.f32 %v2942_v35, %v1225_v36 }
 0x79e   : > { %v2364_v37 = vpop.f32.mrf.mxu0 }
 0x79f   : > { %v1232_v42 = vmax.f32 %v1226_v38, 0.0 }
 0x7a0   : > { %v1228_v39 = vpop.f32.mrf.mxu0 }
 0x7a1   : > { %v1229_v40 = vadd.f32 %v2942_v35, %v1228_v39 }
 0x7a2   : > { %v2365_v41 = vpop.f32.mrf.mxu0 }
 0x7a3   : > { %v1233_v43 = vmax.f32 %v1229_v40, 0.0 }
 0x7a5   : > { %v1234_v44 = vpack.c.bf16 %v1233_v43, %v1232_v42 }
 0x7a7   : > { %2375 = vmatmul.mubr.msk.bf16.vlgmr.msra.gmra.mxu1 %vm1265_vm5, %v1234_v44 }
 0x7a8   : > { %2394 = vmatprep.mubr.msk.bf16.mxu1 %vm2615_vm0, %v2614_v1 }
 0x867   : > { %v1303_v46 = vpop.f32.mrf.mxu1 }
 0x868   : > { %v1304_v47 = vadd.f32 %v2952_v45, %v1303_v46 }
 0x869   : > { %v2376_v48 = vpop.f32.mrf.mxu1 }
 0x86a   : > { %v1310_v49 = vadd.f32 %v1304_v47, %v1167_v31 }
 0x86b   : > { %v1306_v13 = vpop.f32.mrf.mxu1 }
 0x86c   : > { %v1307_v51 = vadd.f32 %v2952_v45, %v1306_v13  ;;  %v1312_v52 = vsel %vm491_vm1, %v1310_v49, 0.0 }
 0x86d   : > { %1313 = vadd.xlane.f32.xlu1 %v1312_v52  ;;  %v2377_v53 = vpop.f32.mrf.mxu1 }
 0x86e   : > { %v1311_v54 = vadd.f32 %v1307_v51, %v1168_v32 }
 0x870   : > { %v1315_v55 = vsel %vm491_vm1, %v1311_v54, 0.0 }
 0x871   : > { %1316 = vadd.xlane.f32.xlu0 %v1315_v55 }
 0x8f6   : > { %v1314_v56 = vpop.xlane.xlu1 %1313 }
 0x8f7   : > { %v1318_v57 = vmul.f32 0.03125, %v1314_v56 }
 0x8f9   : > { %v1320_v58 = vsub.f32 %v1310_v49, %v1318_v57 }
 0x8fa   : > { %v1317_v59 = vpop.xlane.xlu0 %1316 }
 0x8fb   : > { %v1319_v60 = vmul.f32 0.03125, %v1317_v59  ;;  %v1322_v61 = vmul.f32 %v1320_v58, %v1320_v58 }
 0x8fd   : > { %v1321_v62 = vsub.f32 %v1311_v54, %v1319_v60  ;;  %v1324_v63 = vsel %vm491_vm1, %v1322_v61, 0.0 }
 0x8fe   : > { %1325 = vadd.xlane.f32.xlu1 %v1324_v63 }
 0x8ff   : > { %v1323_v5 = vmul.f32 %v1321_v62, %v1321_v62 }
 0x901   : > { %v1327_v6 = vsel %vm491_vm1, %v1323_v5, 0.0 }
 0x902   : > { %1328 = vadd.xlane.f32.xlu0 %v1327_v6 }
 0x987   : > { %v1326_v8 = vpop.xlane.xlu1 %1325 }
 0x988   : > { %v1330_v9 = vmul.f32 0.03125, %v1326_v8 }
 0x98a   : > { %v1332_v3 = vadd.f32 1e-05, %v1330_v9 }
 0x98b   : > { %v1329_v10 = vpop.xlane.xlu0 %1328 }
 0x98c   : > { %2562 = vrsqrt.f32 %v1332_v3  ;;  %v1331_v11 = vmul.f32 0.03125, %v1329_v10 }
 0x98e   : > { %v1333_v15 = vadd.f32 1e-05, %v1331_v11 }
 0x990   : > { %2564 = vrsqrt.f32 %v1333_v15 }
 0x999   : > { %v2563_v16 = vpop.eup %2562 }
 0x99a   : > { %v1336_v17 = vmul.f32 %v2563_v16, %v1320_v58 }
 0x99c   : > { %v1344_v22 = vmul.f32 %v2963_v18, %v1336_v17 }
 0x99d   : > { %v2565_v19 = vpop.eup %2564 }
 0x99e   : > { %v1337_v20 = vmul.f32 %v2565_v19, %v1321_v62  ;;  %v2973_v27 = vadd.f32 %v2969_v23, %v1344_v22 }
 0x9a0   : > { %v1345_v25 = vmul.f32 %v2963_v18, %v1337_v20 }
 0x9a2   : > { %v2976_v28 = vadd.f32 %v2969_v23, %v1345_v25 }
 0x9a4   : > { %v1354_v30 = vpack.c.bf16 %v2976_v28, %v2973_v27 }
 0x9a6   : > { %2383 = vmatmul.mubr.msk.bf16.vlgmr.msra.gmra.mxu0 %vm491_vm1, %v1354_v30 }
 0x9a7   : > { %2388 = vmatprep.mubr.msk.bf16.mxu0 %vm2615_vm0, %v2614_v1 }
 0xa66   : > { %v1392_v31 = vpop.f32.mrf.mxu0 }
 0xa67   : > { %v1393_v36 = vadd.f32 %v2748_v7, %v1392_v31 }
 0xa68   : > { %v2384_v32 = vpop.f32.mrf.mxu0 }
 0xa6a   : > { %v1395_v33 = vpop.f32.mrf.mxu0 }
 0xa6b   : > { %v1396_v37 = vadd.f32 %v2748_v7, %v1395_v33 }
 0xa6c   : > { %v2385_v38 = vpop.f32.mrf.mxu0 }
 0xa6d   : > { %v2985_v39 = vpack.c.bf16 %v1396_v37, %v1393_v36 }
 0xa6f   : > { %1524 = vrot.lane.b32.xlu0 %v2985_v39, %s2619_s23  ;;  %1401 = vrot.lane.b32.xlu1 %v2985_v39, %s2617_s21  ;;  %s3149_s21 = smov 40   ;;  %s3151_s23 = smov 16  }
 0xa73   : > { %1645 = vrot.lane.b32.xlu0 %v2985_v39, %s2621_s27  ;;  %1522 = vrot.lane.b32.xlu1 %v2985_v39, %s2616_s20  ;;  %s3148_s20 = smov 48   ;;  %s3153_s27 = sshll.u32 %s3155_s26, 4 }
 0xa77   : > { %1768 = vrot.lane.b32.xlu0 %v2985_v39, %s2622_s28  ;;  %1647 = vrot.lane.b32.xlu1 %v2985_v39, %s2618_s22  ;;  %s3150_s22 = smov 8  }
 0xa7b   : > { %1770 = vrot.lane.b32.xlu1 %v2985_v39, %s2620_s24  ;;  %s3152_s24 = smov 24  }
 0xae1   : > { %v1402_v7 = vpop.permute.xlu1 %1401  ;;  %v1525_v41 = vpop.permute.xlu0 %1524 }
 0xae2   : > { %v1407_v40 = vsel %vm540_vm2, %v1402_v7, 0  ;;  %v1530_v43 = vsel %vm540_vm2, %v1525_v41, 0 }
 0xae3   : > { %2387 = vmatpush3.bf16.xpose.msra.mxu0 %v1407_v40 }
 0xae4   : > { %2398 = vmatprep.subr.bf16.mxu0 %v2614_v1 }
 0xae5   : > { %v1523_v42 = vpop.permute.xlu1 %1522  ;;  %v1646_v48 = vpop.permute.xlu0 %1645 }
 0xae9   : > { %v1648_v44 = vpop.permute.xlu1 %1647  ;;  %v1769_v13 = vpop.permute.xlu0 %1768 }
 0xaea   : > { %2389 = vmatmul.mubr.msk.bf16.vlgmr.msra.gmra.mxu0 %vm540_vm2, %v2985_v39  ;;  %v1653_v46 = vsel %vm540_vm2, %v1648_v44, 0 }
 0xaeb   : > { %2399 = vmatpush3.bf16.xpose.msra.mxu0 %v1530_v43  ;;  %2400 = vmatprep.mubr.msk.bf16.mxu0 %vm2615_vm0, %v2614_v1 }
 0xaec   : > { %2410 = vmatprep.subr.bf16.mxu0 %v2614_v1 }
 0xaed   : > { %v1771_v47 = vpop.permute.xlu1 %1770 }
 0xaee   : > { %v1776_v49 = vsel %vm540_vm2, %v1771_v47, 0 }
 0xaf2   : > { %2401 = vmatmul.mubr.msk.bf16.vlgmr.msra.gmra.mxu0 %vm540_vm2, %v1523_v42 }
 0xaf3   : > { %2411 = vmatpush3.bf16.xpose.msra.mxu0 %v1653_v46  ;;  %2412 = vmatprep.mubr.msk.bf16.mxu0 %vm2615_vm0, %v2614_v1 }
 0xaf4   : > { %2422 = vmatprep.subr.bf16.mxu0 %v2614_v1 }
 0xafa   : > { %2413 = vmatmul.mubr.msk.bf16.vlgmr.msra.gmra.mxu0 %vm540_vm2, %v1646_v48 }
 0xafb   : > { %2423 = vmatpush3.bf16.xpose.msra.mxu0 %v1776_v49  ;;  %2424 = vmatprep.mubr.msk.bf16.mxu0 %vm2615_vm0, %v2614_v1 }
 0xafc   : > { %2434 = vmatprep.subr.bf16.mxu0 %v2614_v1 }
 0xb02   : > { %2425 = vmatmul.mubr.msk.bf16.vlgmr.msra.gmra.mxu0 %vm540_vm2, %v1769_v13 }
 0xb03   : > { %2435 = vmatpush3.bf16.msra.mxu0 %v2840_v21  ;;  %2438 = vmatprep.mubr.msk.bf16.mxu0 %vm2615_vm0, %v2614_v1 }
 0xb04   : > { %2436 = vmatprep.subr.bf16.mxu0 %v2614_v1 }
 0xb07   : > { %2437 = vmatpush3.bf16.msra.mxu0 %v2848_v26 }
 0xb08   : > { %2450 = vmatprep.subr.bf16.mxu0 %v2614_v1 }
 0xbaa   : > { %v1443_v51 = vpop.f32.mrf.mxu0 }
 0xbab   : > { %v1450_v52 = vmul.f32 0.35355338, %v1443_v51 }
 0xbac   : > { %v2390_v53 = vpop.f32.mrf.mxu0 }
 0xbad   : > { %v1452_v54 = vsel %vm590_vm3, %v1450_v52, -inf }
 0xbae   : > { %1453 = vmax.xlane.f32.xlu1 %v1452_v54  ;;  %v1446_v55 = vpop.f32.mrf.mxu0 }
 0xbaf   : > { %v1451_v56 = vmul.f32 0.35355338, %v1446_v55 }
 0xbb0   : > { %v2391_v57 = vpop.f32.mrf.mxu0 }
 0xbb1   : > { %v1455_v21 = vsel %vm590_vm3, %v1451_v56, -inf }
 0xbb2   : > { %1456 = vmax.xlane.f32.xlu0 %v1455_v21  ;;  %v1566_v58 = vpop.f32.mrf.mxu0 }
 0xbb3   : > { %v1573_v59 = vmul.f32 0.35355338, %v1566_v58 }
 0xbb4   : > { %v2402_v60 = vpop.f32.mrf.mxu0 }
 0xbb5   : > { %v1575_v61 = vsel %vm590_vm3, %v1573_v59, -inf }
 0xbb6   : > { %1576 = vmax.xlane.f32.xlu0 %v1575_v61  ;;  %v1569_v26 = vpop.f32.mrf.mxu0 }
 0xbb7   : > { %v1574_v62 = vmul.f32 0.35355338, %v1569_v26 }
 0xbb8   : > { %v2403_v63 = vpop.f32.mrf.mxu0 }
 0xbb9   : > { %v1578_v5 = vsel %vm590_vm3, %v1574_v62, -inf }
 0xbba   : > { %1579 = vmax.xlane.f32.xlu1 %v1578_v5  ;;  %v1689_v6 = vpop.f32.mrf.mxu0 }
 0xbbb   : > { %v1696_v8 = vmul.f32 0.35355338, %v1689_v6 }
 0xbbc   : > { %v2414_v9 = vpop.f32.mrf.mxu0 }
 0xbbd   : > { %v1698_v3 = vsel %vm590_vm3, %v1696_v8, -inf }
 0xbbe   : > { %1699 = vmax.xlane.f32.xlu0 %v1698_v3  ;;  %v1692_v10 = vpop.f32.mrf.mxu0 }
 0xbbf   : > { %v1697_v11 = vmul.f32 0.35355338, %v1692_v10 }
 0xbc0   : > { %v2415_v15 = vpop.f32.mrf.mxu0 }
 0xbc1   : > { %v1701_v16 = vsel %vm590_vm3, %v1697_v11, -inf }
 0xbc2   : > { %1702 = vmax.xlane.f32.xlu1 %v1701_v16  ;;  %v1812_v17 = vpop.f32.mrf.mxu0 }
 0xbc3   : > { %v1819_v19 = vmul.f32 0.35355338, %v1812_v17 }
 0xbc4   : > { %v2426_v20 = vpop.f32.mrf.mxu0 }
 0xbc5   : > { %v1821_v22 = vsel %vm590_vm3, %v1819_v19, -inf }
 0xbc6   : > { %1822 = vmax.xlane.f32.xlu0 %v1821_v22  ;;  %v1815_v25 = vpop.f32.mrf.mxu0 }
 0xbc7   : > { %v1820_v30 = vmul.f32 0.35355338, %v1815_v25 }
 0xbc8   : > { %v2427_v31 = vpop.f32.mrf.mxu0 }
 0xbc9   : > { %v1824_v32 = vsel %vm590_vm3, %v1820_v30, -inf }
 0xbca   : > { %1825 = vmax.xlane.f32.xlu1 %v1824_v32 }
 0xc37   : > { %v1454_v33 = vpop.xlane.xlu1 %1453 }
 0xc38   : > { %v1458_v36 = vsub.f32 %v1450_v52, %v1454_v33 }
 0xc3a   : > { %v1460_v37 = vmul.f32 1.442695, %v1458_v36 }
 0xc3b   : > { %v1457_v38 = vpop.xlane.xlu0 %1456 }
 0xc3c   : > { %2566 = vpow2.f32 %v1460_v37  ;;  %v1459_v7 = vsub.f32 %v1451_v56, %v1457_v38 }
 0xc3e   : > { %v1462_v40 = vmul.f32 1.442695, %v1459_v7 }
 0xc3f   : > { %v1577_v41 = vpop.xlane.xlu0 %1576 }
 0xc40   : > { %2568 = vpow2.f32 %v1462_v40  ;;  %v1581_v42 = vsub.f32 %v1573_v59, %v1577_v41 }
 0xc42   : > { %v1583_v43 = vmul.f32 1.442695, %v1581_v42 }
 0xc43   : > { %v1580_v51 = vpop.xlane.xlu1 %1579 }
 0xc44   : > { %2570 = vpow2.f32 %v1583_v43  ;;  %v1582_v52 = vsub.f32 %v1574_v62, %v1580_v51 }
 0xc46   : > { %v1585_v56 = vmul.f32 1.442695, %v1582_v52 }
 0xc47   : > { %v1700_v53 = vpop.xlane.xlu0 %1699 }
 0xc48   : > { %v1704_v55 = vsub.f32 %v1696_v8, %v1700_v53  ;;  %2572 = vpow2.f32 %v1585_v56 }
 0xc49   : > { %v2567_v44 = vpop.eup %2566 }
 0xc4a   : > { %v1464_v46 = vsel %vm590_vm3, %v2567_v44, 0.0  ;;  %v1706_v59 = vmul.f32 1.442695, %v1704_v55 }
 0xc4b   : > { %1465 = vadd.xlane.f32.xlu0 %v1464_v46  ;;  %v1703_v54 = vpop.xlane.xlu1 %1702 }
 0xc4c   : > { %v1705_v57 = vsub.f32 %v1697_v11, %v1703_v54  ;;  %2574 = vpow2.f32 %v1706_v59 }
 0xc4d   : > { %v2569_v47 = vpop.eup %2568 }
 0xc4e   : > { %v1467_v48 = vsel %vm590_vm3, %v2569_v47, 0.0  ;;  %v1708_v61 = vmul.f32 1.442695, %v1705_v57 }
 0xc4f   : > { %1468 = vadd.xlane.f32.xlu1 %v1467_v48  ;;  %v1823_v21 = vpop.xlane.xlu0 %1822 }
 0xc50   : > { %v1827_v60 = vsub.f32 %v1819_v19, %v1823_v21  ;;  %2576 = vpow2.f32 %v1708_v61 }
 0xc51   : > { %v3036_v49 = vpop.eup %2570 }
 0xc52   : > { %v1587_v13 = vsel %vm590_vm3, %v3036_v49, 0.0  ;;  %v1829_v63 = vmul.f32 1.442695, %v1827_v60 }
 0xc53   : > { %1588 = vadd.xlane.f32.xlu0 %v1587_v13  ;;  %v1826_v58 = vpop.xlane.xlu1 %1825 }
 0xc54   : > { %v1828_v26 = vsub.f32 %v1820_v30, %v1826_v58  ;;  %2578 = vpow2.f32 %v1829_v63 }
 0xc55   : > { %v2573_v6 = vpop.eup %2572 }
 0xc56   : > { %v1831_v5 = vmul.f32 1.442695, %v1828_v26  ;;  %v1590_v9 = vsel %vm590_vm3, %v2573_v6, 0.0 }
 0xc58   : > { %2580 = vpow2.f32 %v1831_v5 }
 0xc59   : > { %v2575_v62 = vpop.eup %2574 }
 0xc5a   : > { %v1710_v10 = vsel %vm590_vm3, %v2575_v62, 0.0 }
 0xc5d   : > { %v2577_v8 = vpop.eup %2576 }
 0xc5e   : > { %v1713_v11 = vsel %vm590_vm3, %v2577_v8, 0.0 }
 0xc60   : > { %1598 = vrot.lane.b32.xlu1 %v2985_v39, %s2623_s29 }
 0xc61   : > { %v2579_v3 = vpop.eup %2578 }
 0xc62   : > { %v1833_v16 = vsel %vm590_vm3, %v2579_v3, 0.0 }
 0xc65   : > { %v2581_v15 = vpop.eup %2580 }
 0xc66   : > { %v1836_v17 = vsel %vm590_vm3, %v2581_v15, 0.0 }
 0xc69   : > { %1475 = vrot.lane.b32.xlu0 %v2985_v39, %s2624_s30  ;;  %s440_s30 = scalar_lea.vmem %s3141_s13, %s3153_s27 }
 0xc84   : > { %1591 = vadd.xlane.f32.xlu1 %v1590_v9 }
 0xc88   : > { %1711 = vadd.xlane.f32.xlu0 %v1710_v10  ;;  %1714 = vadd.xlane.f32.xlu1 %v1713_v11 }
 0xc8c   : > { %1834 = vadd.xlane.f32.xlu0 %v1833_v16  ;;  %1837 = vadd.xlane.f32.xlu1 %v1836_v17 }
 0xc9d   : > { %1721 = vrot.lane.b32.xlu1 %v2985_v39, %s3148_s20 }
 0xca2   : > { %1844 = vrot.lane.b32.xlu0 %v2985_v39, %s3149_s21 }
 0xcd4   : > { %v1466_v19 = vpop.xlane.xlu0 %1465 }
 0xcd5   : > { %2582 = vrcp.f32 %v1466_v19 }
 0xcd8   : > { %v1469_v20 = vpop.xlane.xlu1 %1468 }
 0xcd9   : > { %2584 = vrcp.f32 %v1469_v20 }
 0xcdc   : > { %v1589_v22 = vpop.xlane.xlu0 %1588  ;;  %v1599_v37 = vpop.permute.xlu1 %1598 }
 0xcdd   : > { %2586 = vrcp.f32 %v1589_v22 }
 0xce0   : > { %v1476_v25 = vpop.permute.xlu0 %1475 }
 0xce1   : > { %2393 = vmatpush3.bf16.msra.mxu1 %v1476_v25 }
 0xce2   : > { %2404 = vmatprep.subr.bf16.mxu1 %v2614_v1  ;;  %v2583_v30 = vpop.eup %2582 }
 0xce3   : > { %v1472_v32 = vmul.f32 %v2583_v30, %v2567_v44 }
 0xce6   : > { %v2585_v31 = vpop.eup %2584 }
 0xce7   : > { %v1473_v33 = vmul.f32 %v2585_v31, %v2569_v47 }
 0xce9   : > { %v1474_v36 = vpack.c.bf16 %v1473_v33, %v1472_v32 }
 0xcea   : > { %v2587_v42 = vpop.eup %2586 }
 0xceb   : > { %2395 = vmatmul.mubr.msk.bf16.vlgmr.msra.gmra.mxu1 %vm590_vm3, %v1474_v36  ;;  %v1595_v44 = vmul.f32 %v2587_v42, %v3036_v49 }
 0xcec   : > { %2405 = vmatpush3.bf16.msra.mxu1 %v1599_v37  ;;  %2406 = vmatprep.mubr.msk.bf16.mxu1 %vm2615_vm0, %v2614_v1 }
 0xced   : > { %2416 = vmatprep.subr.bf16.mxu1 %v2614_v1 }
 0xd0d   : > { %v1592_v39 = vpop.xlane.xlu1 %1591 }
 0xd0e   : > { %2588 = vrcp.f32 %v1592_v39 }
 0xd11   : > { %v1712_v38 = vpop.xlane.xlu0 %1711  ;;  %v1715_v7 = vpop.xlane.xlu1 %1714 }
 0xd12   : > { %2590 = vrcp.f32 %v1712_v38 }
 0xd13   : > { %2592 = vrcp.f32 %v1715_v7 }
 0xd15   : > { %v1835_v40 = vpop.xlane.xlu0 %1834  ;;  %v1838_v41 = vpop.xlane.xlu1 %1837 }
 0xd16   : > { %2594 = vrcp.f32 %v1835_v40 }
 0xd17   : > { %2596 = vrcp.f32 %v1838_v41 }
 0xd19   : > { %v1722_v51 = vpop.permute.xlu1 %1721  ;;  %v1845_v57 = vpop.permute.xlu0 %1844 }
 0xd1b   : > { %v2589_v43 = vpop.eup %2588 }
 0xd1c   : > { %v1596_v46 = vmul.f32 %v2589_v43, %v2573_v6 }
 0xd1e   : > { %v1597_v47 = vpack.c.bf16 %v1596_v46, %v1595_v44 }
 0xd1f   : > { %v2591_v48 = vpop.eup %2590 }
 0xd20   : > { %v2593_v13 = vpop.eup %2592  ;;  %2407 = vmatmul.mubr.msk.bf16.vlgmr.msra.gmra.mxu1 %vm590_vm3, %v1597_v47  ;;  %v1718_v52 = vmul.f32 %v2591_v48, %v2575_v62 }
 0xd21   : > { %2417 = vmatpush3.bf16.msra.mxu1 %v1722_v51  ;;  %2418 = vmatprep.mubr.msk.bf16.mxu1 %vm2615_vm0, %v2614_v1  ;;  %v1719_v53 = vmul.f32 %v2593_v13, %v2577_v8 }
 0xd22   : > { %2428 = vmatprep.subr.bf16.mxu1 %v2614_v1 }
 0xd23   : > { %v2595_v54 = vpop.eup %2594  ;;  %v1720_v55 = vpack.c.bf16 %v1719_v53, %v1718_v52 }
 0xd24   : > { %v2597_v56 = vpop.eup %2596  ;;  %v1841_v49 = vmul.f32 %v2595_v54, %v2579_v3 }
 0xd25   : > { %v1842_v21 = vmul.f32 %v2597_v56, %v2581_v15 }
 0xd27   : > { %v1843_v58 = vpack.c.bf16 %v1842_v21, %v1841_v49 }
 0xd28   : > { %2419 = vmatmul.mubr.msk.bf16.vlgmr.msra.gmra.mxu1 %vm590_vm3, %v1720_v55 }
 0xd29   : > { %2429 = vmatpush3.bf16.msra.mxu1 %v1845_v57  ;;  %2430 = vmatprep.mubr.msk.bf16.mxu1 %vm2615_vm0, %v2614_v1 }
 0xd2a   : > { %2442 = vmatprep.subr.bf16.mxu1 %v2614_v1 }
 0xd30   : > { %2431 = vmatmul.mubr.msk.bf16.vlgmr.msra.gmra.mxu1 %vm590_vm3, %v1843_v58 }
 0xd31   : > { %2443 = vmatpush3.bf16.msra.mxu1 %v2879_v4  ;;  %2446 = vmatprep.mubr.msk.bf16.mxu1 %vm2615_vm0, %v2614_v1 }
 0xd32   : > { %2444 = vmatprep.subr.bf16.mxu1 %v2614_v1 }
 0xd35   : > { %2445 = vmatpush3.bf16.msra.mxu1 %v2885_v12 }
 0xdab   : > { %v1515_v59 = vpop.f32.mrf.mxu1 }
 0xdad   : > { %v2396_v60 = vpop.f32.mrf.mxu1 }
 0xdaf   : > { %v1518_v61 = vpop.f32.mrf.mxu1 }
 0xdb1   : > { %v2397_v26 = vpop.f32.mrf.mxu1 }
 0xde0   : > { %v1638_v63 = vpop.f32.mrf.mxu1 }
 0xde2   : > { %v2408_v5 = vpop.f32.mrf.mxu1 }
 0xde4   : > { %v1641_v6 = vpop.f32.mrf.mxu1 }
 0xde5   : > { %v2501_v62 = vpack.i.bf16 %v1641_v6, %v1638_v63 }
 0xde6   : > { %v2409_v9 = vpop.f32.mrf.mxu1 }
 0xde7   : > { %2502 = vrot.lane.b32.xlu1 %v2501_v62, %s3150_s22 }
 0xde8   : > { %v1761_v8 = vpop.f32.mrf.mxu1 }
 0xdea   : > { %v2420_v4 = vpop.f32.mrf.mxu1 }
 0xdec   : > { %v1764_v3 = vpop.f32.mrf.mxu1 }
 0xded   : > { %v2506_v10 = vpack.i.bf16 %v1764_v3, %v1761_v8 }
 0xdee   : > { %v2421_v11 = vpop.f32.mrf.mxu1 }
 0xdef   : > { %2507 = vrot.lane.b32.xlu0 %v2506_v10, %s3151_s23 }
 0xdf0   : > { %v1884_v15 = vpop.f32.mrf.mxu1 }
 0xdf2   : > { %v2432_v12 = vpop.f32.mrf.mxu1 }
 0xdf4   : > { %v1887_v16 = vpop.f32.mrf.mxu1 }
 0xdf5   : > { %v2511_v17 = vpack.i.bf16 %v1887_v16, %v1884_v15 }
 0xdf6   : > { %v2433_v19 = vpop.f32.mrf.mxu1 }
 0xdf7   : > { %2512 = vrot.lane.b32.xlu1 %v2511_v17, %s3152_s24 }
 0xe59   : > { %v2503_v20 = vpop.permute.xlu1 %2502 }
 0xe5a   : > { %v2505_v25 = vunpack.i.h.bf16 %v2503_v20  ;;  %v2504_v30 = vunpack.i.l.bf16 %v2503_v20 }
 0xe5c   : > { %v1916_v36 = vsel %vm540_vm2, %v1518_v61, %v2505_v25  ;;  %v1915_v37 = vsel %vm540_vm2, %v1515_v59, %v2504_v30 }
 0xe61   : > { %v2508_v22 = vpop.permute.xlu0 %2507 }
 0xe62   : > { %v2510_v31 = vunpack.i.h.bf16 %v2508_v22  ;;  %v2509_v32 = vunpack.i.l.bf16 %v2508_v22 }
 0xe64   : > { %v1918_v7 = vsel %vm590_vm3, %v1916_v36, %v2510_v31  ;;  %v1917_v40 = vsel %vm590_vm3, %v1915_v37, %v2509_v32 }
 0xe69   : > { %v2513_v33 = vpop.permute.xlu1 %2512 }
 0xe6a   : > { %v2515_v39 = vunpack.i.h.bf16 %v2513_v33  ;;  %v2514_v38 = vunpack.i.l.bf16 %v2513_v33 }
 0xe6c   : > { %v1920_v41 = vsel %vm1058_vm4, %v1918_v7, %v2515_v39  ;;  %v1919_v42 = vsel %vm1058_vm4, %v1917_v40, %v2514_v38 }
 0xe6d   : > { %v1921_v43 = vpack.c.bf16 %v1920_v41, %v1919_v42 }
 0xe6f   : > { %2439 = vmatmul.mubr.msk.bf16.vlgmr.msra.gmra.mxu0 %vm491_vm1, %v1921_v43 }
 0xe70   : > { %2451 = vmatpush3.bf16.msra.mxu0 %v2893_v14  ;;  %2458 = vmatprep.mubr.msk.bf16.mxu0 %vm2615_vm0, %v2614_v1 }
 0xe71   : > { %2452 = vmatprep.subr.bf16.mxu0 %v2614_v1 }
 0xe74   : > { %2453 = vmatpush3.bf16.msra.mxu0 %v2921_v34 }
 0xe75   : > { %2454 = vmatprep.subr.bf16.mxu0 %v2614_v1 }
 0xe78   : > { %2455 = vmatpush3.bf16.msra.mxu0 %v2928_v0 }
 0xe79   : > { %2456 = vmatprep.subr.bf16.mxu0 %v2614_v1 }
 0xe7c   : > { %2457 = vmatpush3.bf16.msra.mxu0 %v2935_v2 }
 0xf2f   : > { %v1959_v44 = vpop.f32.mrf.mxu0 }
 0xf30   : > { %v1960_v46 = vadd.f32 %v2866_v50, %v1959_v44 }
 0xf31   : > { %v2440_v47 = vpop.f32.mrf.mxu0 }
 0xf32   : > { %v1966_v14 = vadd.f32 %v1960_v46, %v2973_v27 }
 0xf33   : > { %v1962_v48 = vpop.f32.mrf.mxu0 }
 0xf34   : > { %v1963_v13 = vadd.f32 %v2866_v50, %v1962_v48  ;;  %v1968_v51 = vsel %vm491_vm1, %v1966_v14, 0.0 }
 0xf35   : > { %1969 = vadd.xlane.f32.xlu0 %v1968_v51  ;;  %v2441_v34 = vpop.f32.mrf.mxu0 }
 0xf36   : > { %v1967_v52 = vadd.f32 %v1963_v13, %v2976_v28 }
 0xf38   : > { %v1971_v0 = vsel %vm491_vm1, %v1967_v52, 0.0 }
 0xf39   : > { %1972 = vadd.xlane.f32.xlu1 %v1971_v0 }
 0xfbe   : > { %v1970_v1 = vpop.xlane.xlu0 %1969 }
 0xfbf   : > { %v1974_v2 = vmul.f32 0.03125, %v1970_v1 }
 0xfc1   : > { %v1976_v53 = vsub.f32 %v1966_v14, %v1974_v2 }
 0xfc2   : > { %v1973_v54 = vpop.xlane.xlu1 %1972 }
 0xfc3   : > { %v1975_v55 = vmul.f32 0.03125, %v1973_v54  ;;  %v1978_v56 = vmul.f32 %v1976_v53, %v1976_v53 }
 0xfc5   : > { %v1977_v57 = vsub.f32 %v1967_v52, %v1975_v55  ;;  %v1980_v27 = vsel %vm491_vm1, %v1978_v56, 0.0 }
 0xfc6   : > { %1981 = vadd.xlane.f32.xlu0 %v1980_v27 }
 0xfc7   : > { %v1979_v50 = vmul.f32 %v1977_v57, %v1977_v57 }
 0xfc9   : > { %v1983_v49 = vsel %vm491_vm1, %v1979_v50, 0.0 }
 0xfca   : > { %1984 = vadd.xlane.f32.xlu0 %v1983_v49 }
0x104f   : > { %v1982_v21 = vpop.xlane.xlu0 %1981 }
0x1050   : > { %v1986_v58 = vmul.f32 0.03125, %v1982_v21 }
0x1052   : > { %v1988_v28 = vadd.f32 1e-05, %v1986_v58 }
0x1053   : > { %v1985_v59 = vpop.xlane.xlu0 %1984 }
0x1054   : > { %2598 = vrsqrt.f32 %v1988_v28  ;;  %v1987_v60 = vmul.f32 0.03125, %v1985_v59 }
0x1056   : > { %v1989_v61 = vadd.f32 1e-05, %v1987_v60 }
0x1058   : > { %2600 = vrsqrt.f32 %v1989_v61 }
0x1061   : > { %v2599_v26 = vpop.eup %2598 }
0x1062   : > { %v1992_v63 = vmul.f32 %v2599_v26, %v1976_v53 }
0x1064   : > { %v1994_v62 = vmul.f32 %v2900_v24, %v1992_v63 }
0x1065   : > { %v2601_v5 = vpop.eup %2600 }
0x1066   : > { %v1993_v6 = vmul.f32 %v2601_v5, %v1977_v57  ;;  %v1996_v8 = vadd.f32 %v2906_v29, %v1994_v62 }
0x1068   : > { %v1995_v9 = vmul.f32 %v2900_v24, %v1993_v6 }
0x106a   : > { %v1997_v4 = vadd.f32 %v2906_v29, %v1995_v9 }
0x106c   : > { %v1998_v3 = vpack.c.bf16 %v1997_v4, %v1996_v8 }
0x106e   : > { %2447 = vmatmul.mubr.msk.bf16.vlgmr.msra.gmra.mxu1 %vm491_vm1, %v1998_v3 }
0x112e   : > { %v2036_v10 = vpop.f32.mrf.mxu1 }
0x112f   : > { %v2037_v15 = vadd.f32 %v2942_v35, %v2036_v10 }
0x1130   : > { %v2448_v11 = vpop.f32.mrf.mxu1 }
0x1131   : > { %v2043_v19 = vmax.f32 %v2037_v15, 0.0 }
0x1132   : > { %v2039_v12 = vpop.f32.mrf.mxu1 }
0x1133   : > { %v2040_v16 = vadd.f32 %v2942_v35, %v2039_v12 }
0x1134   : > { %v2449_v17 = vpop.f32.mrf.mxu1 }
0x1135   : > { %v2044_v20 = vmax.f32 %v2040_v16, 0.0 }
0x1137   : > { %v2045_v22 = vpack.c.bf16 %v2044_v20, %v2043_v19 }
0x1139   : > { %2459 = vmatmul.mubr.msk.bf16.vlgmr.msra.gmra.mxu0 %vm1265_vm5, %v2045_v22 }
0x11f9   : > { %v2083_v24 = vpop.f32.mrf.mxu0 }
0x11fa   : > { %v2084_v25 = vadd.f32 %v2952_v45, %v2083_v24 }
0x11fb   : > { %v2460_v29 = vpop.f32.mrf.mxu0 }
0x11fc   : > { %v2090_v30 = vadd.f32 %v2084_v25, %v1996_v8 }
0x11fd   : > { %v2086_v31 = vpop.f32.mrf.mxu0 }
0x11fe   : > { %v2087_v32 = vadd.f32 %v2952_v45, %v2086_v31  ;;  %v2092_v33 = vsel %vm491_vm1, %v2090_v30, 0.0 }
0x11ff   : > { %2093 = vadd.xlane.f32.xlu1 %v2092_v33  ;;  %v2461_v36 = vpop.f32.mrf.mxu0 }
0x1200   : > { %v2091_v37 = vadd.f32 %v2087_v32, %v1997_v4 }
0x1202   : > { %v2095_v35 = vsel %vm491_vm1, %v2091_v37, 0.0 }
0x1203   : > { %2096 = vadd.xlane.f32.xlu0 %v2095_v35 }
0x1288   : > { %v2094_v39 = vpop.xlane.xlu1 %2093 }
0x1289   : > { %v2098_v38 = vmul.f32 0.03125, %v2094_v39 }
0x128b   : > { %v2100_v7 = vsub.f32 %v2090_v30, %v2098_v38 }
0x128c   : > { %v2097_v40 = vpop.xlane.xlu0 %2096 }
0x128d   : > { %v2099_v41 = vmul.f32 0.03125, %v2097_v40  ;;  %v2102_v42 = vmul.f32 %v2100_v7, %v2100_v7 }
0x128f   : > { %v2101_v43 = vsub.f32 %v2091_v37, %v2099_v41  ;;  %v2104_v44 = vsel %vm491_vm1, %v2102_v42, 0.0 }
0x1290   : > { %2105 = vadd.xlane.f32.xlu1 %v2104_v44 }
0x1291   : > { %v2103_v45 = vmul.f32 %v2101_v43, %v2101_v43 }
0x1293   : > { %v2107_v46 = vsel %vm491_vm1, %v2103_v45, 0.0 }
0x1294   : > { %2108 = vadd.xlane.f32.xlu0 %v2107_v46 }
0x1319   : > { %v2106_v47 = vpop.xlane.xlu1 %2105 }
0x131a   : > { %v2110_v14 = vmul.f32 0.03125, %v2106_v47 }
0x131c   : > { %v2112_v48 = vadd.f32 1e-05, %v2110_v14 }
0x131d   : > { %v2109_v13 = vpop.xlane.xlu0 %2108 }
0x131e   : > { %2602 = vrsqrt.f32 %v2112_v48  ;;  %v2111_v51 = vmul.f32 0.03125, %v2109_v13 }
0x1320   : > { %v2113_v34 = vadd.f32 1e-05, %v2111_v51 }
0x1322   : > { %2604 = vrsqrt.f32 %v2113_v34 }
0x132b   : > { %v2603_v52 = vpop.eup %2602 }
0x132c   : > { %v2116_v0 = vmul.f32 %v2603_v52, %v2100_v7 }
0x132e   : > { %v2118_v1 = vmul.f32 %v2963_v18, %v2116_v0 }
0x132f   : > { %v2605_v2 = vpop.eup %2604 }
0x1330   : > { %v2120_v53 = vadd.f32 %v2969_v23, %v2118_v1  ;;  %v2117_v54 = vmul.f32 %v2605_v2, %v2101_v43 }
0x1332   : > { %2122 = vst.msk [vmem:[%s440_s30] sm:$0xff] %vm491_vm1, %v2120_v53  ;;  %v2119_v55 = vmul.f32 %v2963_v18, %v2117_v54 }
0x1334   : > { %v2121_v56 = vadd.f32 %v2969_v23, %v2119_v55 }
0x1336   : > { %2123 = vst.msk [vmem:[%s440_s30 + $0x8] sm:$0xff] %vm491_vm1, %v2121_v56 }
0x1337 PF: > { %s23_s25 = sadd.s32 1, %s2612_s25  }
0x1338   : > { %p20_p4 = scmp.ge.s32.totalorder %s23_s25, 4  }
0x133a   :  { %22 = sbr.rel (!%p20_p4) target bundleno = 1 (0x1), region = 102 }

// kernel: _lambda_.3
= control target key start
LH: loop header
LB: loop body
LE: loop exit
PB: predicated region body
PF: predicated region fallthrough
CT: control target
= control target key end

     0   :  { %s5673_s0 = inlined_call_operand.vmem [shape: f32[2,8,32], index: 0, kind: input, shape index: {}]   ;;  %s5674_s1 = inlined_call_operand.vmem [shape: f32[2,16,32], index: 1, kind: input, shape index: {}]   ;;  %s5675_s2 = inlined_call_operand.vmem [shape: f32[2,1,8], index: 2, kind: input, shape index: {}]   ;;  %s5676_s3 = inlined_call_operand.vmem [shape: bf16[32,96], index: 3, kind: input, shape index: {}]   ;;  %s5677_s4 = inlined_call_operand.vmem [shape: f32[1,96], index: 4, kind: input, shape index: {}]   ;;  %s5678_s5 = inlined_call_operand.vmem [shape: bf16[32,32], index: 5, kind: input, shape index: {}]   ;;  %s5679_s6 = inlined_call_operand.vmem [shape: f32[1,32], index: 6, kind: input, shape index: {}]   ;;  %s5680_s7 = inlined_call_operand.vmem [shape: f32[1,32], index: 7, kind: input, shape index: {}]   ;;  %s5681_s8 = inlined_call_operand.vmem [shape: f32[1,32], index: 8, kind: input, shape index: {}]   ;;  %s5682_s9 = inlined_call_operand.vmem [shape: bf16[32,32], index: 9, kind: input, shape index: {}]   ;;  %s5683_s10 = inlined_call_operand.vmem [shape: f32[1,32], index: 10, kind: input, shape index: {}]   ;;  %s5684_s11 = inlined_call_operand.vmem [shape: bf16[32,64], index: 11, kind: input, shape index: {}]   ;;  %s5685_s12 = inlined_call_operand.vmem [shape: f32[1,64], index: 12, kind: input, shape index: {}]   ;;  %s5686_s13 = inlined_call_operand.vmem [shape: bf16[32,32], index: 13, kind: input, shape index: {}]   ;;  %s5687_s14 = inlined_call_operand.vmem [shape: f32[1,32], index: 14, kind: input, shape index: {}]   ;;  %s5688_s15 = inlined_call_operand.vmem [shape: f32[1,32], index: 15, kind: input, shape index: {}]   ;;  %s5689_s16 = inlined_call_operand.vmem [shape: f32[1,32], index: 16, kind: input, shape index: {}]   ;;  %s5690_s17 = inlined_call_operand.vmem [shape: bf16[32,64], index: 17, kind: input, shape index: {}]   ;;  %s5691_s18 = inlined_call_operand.vmem [shape: f32[1,64], index: 18, kind: input, shape index: {}]   ;;  %s5692_s19 = inlined_call_operand.vmem [shape: bf16[64,32], index: 19, kind: input, shape index: {}]   ;;  %s5693_s20 = inlined_call_operand.vmem [shape: f32[1,32], index: 20, kind: input, shape index: {}]   ;;  %s5694_s21 = inlined_call_operand.vmem [shape: f32[1,32], index: 21, kind: input, shape index: {}]   ;;  %s5695_s22 = inlined_call_operand.vmem [shape: f32[1,32], index: 22, kind: input, shape index: {}]   ;;  %s5696_s23 = inlined_call_operand.vmem [shape: bf16[32,128], index: 23, kind: input, shape index: {}]   ;;  %s5697_s24 = inlined_call_operand.hbm [shape: f32[2,8,128], index: 24, kind: output, shape index: {0}]   ;;  %s5698_s25 = inlined_call_operand.vmem [shape: f32[2,2,8,64], index: 25, kind: output, shape index: {1}]  }
   0x1   :  { %5740 = sst [smem:[#allocation15_spill]] %s5673_s0 }
   0x2   :  { %5741 = sst [smem:[#allocation16_spill]] %s5674_s1 }
   0x3   :  { %5742 = sst [smem:[#allocation17_spill]] %s5675_s2 }
   0x4   :  { %5743 = sst [smem:[#allocation18_spill]] %s5676_s3 }
   0x5   :  { %5744 = sst [smem:[#allocation19_spill]] %s5677_s4 }
   0x6   :  { %5745 = sst [smem:[#allocation20_spill]] %s5678_s5 }
   0x7   :  { %5746 = sst [smem:[#allocation21_spill]] %s5679_s6 }
   0x8   :  { %5747 = sst [smem:[#allocation22_spill]] %s5680_s7 }
   0x9   :  { %5748 = sst [smem:[#allocation23_spill]] %s5681_s8 }
   0xa   :  { %5749 = sst [smem:[#allocation24_spill]] %s5682_s9 }
   0xb   :  { %5750 = sst [smem:[#allocation25_spill]] %s5683_s10 }
   0xc   :  { %5751 = sst [smem:[#allocation26_spill]] %s5684_s11 }
   0xd   :  { %5752 = sst [smem:[#allocation27_spill]] %s5685_s12 }
   0xe   :  { %5753 = sst [smem:[#allocation28_spill]] %s5687_s14 }
   0xf   :  { %5754 = sst [smem:[#allocation29_spill]] %s5696_s23 }
  0x10   :  { %5755 = sst [smem:[#allocation30_spill]] %s5697_s24 }
  0x11   :  { %5756 = sst [smem:[#allocation31_spill]] %s5698_s25 }
  0x12   :  { %31 = vsyncpa [#allocation3], 0 }
  0x13   :  { %33 = vsyncpa [#allocation3 + $0x1], 0  ;;  %s4888_s29 = smov 0   ;;  %s4890_s2 = smov 0  }
  0x14   :  { %s4892_s6 = smov 0   ;;  %s4894_s30 = smov 0  }
  0x15 LB: > { %5757 = sst [smem:[#allocation6_spill]] %s4726_s29  ;;  %s4909_s7 = sadd.s32 4294967295, %s4738_s30   ;;  %s4738_s30 = sphi %s4894_s30, %s5806_s30   ;;  %s4734_s6 = sphi %s4892_s6, %s5809_s6   ;;  %s4730_s2 = sphi %s4890_s2, %s5808_s2   ;;  %s4726_s29 = sphi %s4888_s29, %s5807_s29  }
  0x16   : > { %5758 = sst [smem:[#allocation7_spill]] %s4730_s2  ;;  %s3971_s3 = sadd.s32 4294967294, %s4738_s30  }
  0x17   : > { %5759 = sst [smem:[#allocation8_spill]] %s4734_s6  ;;  %s4913_s26 = sadd.s32 1, %s4738_s30  }
  0x18   : > { %5760 = sst [smem:[#allocation9_spill]] %s4738_s30  ;;  %s565_s1 = sadd.s32 1, %s4734_s6 }
  0x19   : > { %5761 = sst [smem:[#allocation10_spill]] %s4909_s7  ;;  %s562_s8 = ssub.s32 %s4738_s30, %s4913_s26 }
  0x1a   : > { %5762 = sst [smem:[#allocation11_spill]] %s4913_s26  ;;  %p575_p0 = scmp.ne.s32.totalorder %s4734_s6, %s4730_s2 }
  0x1b   : > { %p563_p1 = scmp.eq.s32.totalorder %s562_s8, 0  ;;  %p576_p2 = scmp.eq.s32.totalorder %s4909_s7, 1 }
  0x1c   : > { %p581_p3 = scmp.ne.s32.totalorder %s4730_s2, %s4726_s29  ;;  %p582_p4 = scmp.eq.s32.totalorder %s3971_s3, 1 }
  0x1d   : > { %s4924_s27 = scalar_select %p563_p1, %s4734_s6, %s565_s1  }
  0x1e   : > { %p4926_p5 = por %p576_p2, %p575_p0  ;;  %p4930_p6 = por %p582_p4, %p581_p3 }
  0x1f   : > { %5763 = sst [smem:[#allocation12_spill]] %s4924_s27  ;;  %p3974_p7 = scmp.ge.s32.totalorder %s4738_s30, 1 }
  0x20   : > { %s5764_s4 = scalar_select %p4926_p5, 1, 0 }
  0x21   : > { %s5766_s28 = scalar_select %p4930_p6, 1, 0 }
  0x22   : > { %5765 = sst [smem:[#allocation13_spill]] %s5764_s4  ;;  %p710_p8 = scmp.lt.s32.totalorder %s4738_s30, 3 }
  0x23   : > { %5767 = sst [smem:[#allocation14_spill]] %s5766_s28 }
  0x24   : > { %p711_p9 = pnand %p3974_p7, %p710_p8 }
  0x25   : > { %s5768_s0 = sld [smem:[#allocation18_spill]] (!%p711_p9)  ;;  %p789_p10 = scmp.lt.s32.totalorder (!%p711_p9), %s4909_s7, 1 }
  0x26   : > { %714 = sbr.rel (%p711_p9) target bundleno = 8415 (0x20df), region = 116  ;;  %s5769_s3 = sld [smem:[#allocation15_spill]] (!%p711_p9) }
  0x27   : > { %s5770_s11 = sld [smem:[#allocation26_spill]] (!%p711_p9)  ;;  %s5731_s29 = smov (!%p711_p9), 120  }
  0x28   : > { %s5771_s5 = sld [smem:[#allocation16_spill]] (!%p711_p9)  ;;  %s5708_s27 = smov (!%p711_p9), 96  }
  0x29   : > { %s5721_s6 = smov (!%p711_p9), 104   ;;  %s5773_s12 = sld [smem:[#allocation27_spill]] (!%p711_p9) }
  0x2a   : > { %s5727_s26 = smov (!%p711_p9), 8   ;;  %s5781_s10 = sld [smem:[#allocation25_spill]] (!%p711_p9) }
  0x2b   : > { %v4570_v0 = vld [vmem:[%s5768_s0 + $0x8] sm:$0xff]   ;;  %v4740_v1 = vmov 0.0   ;;  %v4571_v2 = vld [vmem:[%s5768_s0] sm:$0xff]   ;;  %vm4741_vm0 = vmmov 0   ;;  %s4951_s8 = scalar_select %p789_p10, %s4909_s7, 1  ;;  %vm843_vm1 = vcmask 261120   ;;  %v806_v36 = vlaneseq }
  0x2c   : > { %4210 = vmatprep.subr.bf16.mxu1 %v4740_v1  ;;  %4202 = vmatprep.subr.bf16.mxu0 %v4740_v1  ;;  %vm959_vm2 = vcmask 64512   ;;  %vm1025_vm4 = vcmask 1043456   ;;  %vm1418_vm5 = vcmask 130048   ;;  %vm1420_vm6 = vcmask 195584   ;;  %s5789_s24 = smov 16   ;;  %s5791_s14 = sld [smem:[#allocation28_spill]] }
  0x2d   : > { %4211 = vmatpush3.bf16.msra.mxu1 %v4570_v0  ;;  %4214 = vmatprep.mubr.msk.bf16.mxu1 %vm4741_vm0, %v4740_v1  ;;  %s3977_s9 = sshll.u32 %s4951_s8, 3  ;;  %v4572_v5 = vld [vmem:[%s5770_s11 + $0x8] sm:$0xff]   ;;  %s4091_s28 = sshll.u32 %s4951_s8, 4  ;;  %v4573_v6 = vld [vmem:[%s5770_s11] sm:$0xff]   ;;  %v807_v37 = vshrl.u32 %v806_v36, 7  ;;  %v809_v38 = vand.u32 127, %v806_v36 }
  0x2e   : > { %4212 = vmatprep.subr.bf16.mxu1 %v4740_v1  ;;  %4206 = vmatprep.mubr.msk.bf16.mxu0 %vm4741_vm0, %v4740_v1  ;;  %s792_s1 = scalar_lea.vmem %s5769_s3, %s3977_s9  ;;  %s797_s3 = scalar_lea.vmem %s5771_s5, %s4091_s28  ;;  %vm2039_vm7 = vcmask 523264   ;;  %vm2037_vm8 = vcmask 392192  }
  0x2f   : > { %v4958_v3 = vld [vmem:[%s792_s1] sm:$0xff]  ;;  %4203 = vmatpush3.bf16.msra.mxu0 %v4572_v5  ;;  %v804_v8 = vld [vmem:[%s797_s3 + $0x8] sm:$0xff]  ;;  %s5772_s28 = sld [smem:[#allocation19_spill]]  ;;  %s5719_s9 = smov 80   ;;  %vm810_vm3 = vcmp.gt.s32.totalorder %v809_v38, %v807_v37 }
  0x30   : > { %v892_v4 = vpack.c.bf16 %v4958_v3, %v4958_v3  ;;  %v803_v7 = vld [vmem:[%s797_s3] sm:$0xff]  ;;  %4204 = vmatprep.subr.bf16.mxu0 %v4740_v1  ;;  %s5710_s5 = smov 88   ;;  %s5712_s3 = smov 72   ;;  %v811_v40 = vsel %vm810_vm3, -1e+09, %v4740_v1 }
  0x31   : > { %4213 = vmatpush3.bf16.msra.mxu1 %v4571_v2  ;;  %v823_v9 = vpack.c.bf16 %v804_v8, %v803_v7  ;;  %s5729_s1 = smov 112   ;;  %v3981_v17 = vld [vmem:[%s5773_s12] ss:$0 sm:$0xff]  ;;  %s5779_s11 = sld [smem:[#allocation22_spill]] }
  0x32   : > { %4224 = vmatprep.subr.bf16.mxu1 %v4740_v1  ;;  %s5788_s12 = smov 8   ;;  %s5798_s25 = sld [smem:[#allocation10_spill]] }
  0x33   : > { %4205 = vmatpush3.bf16.msra.mxu0 %v4573_v6 }
  0x34   : > { %4215 = vmatmul.mubr.msk.bf16.vlgmr.msra.gmra.mxu1 %vm843_vm1, %v892_v4  ;;  %4218 = vmatprep.subr.bf16.mxu0 %v4740_v1 }
  0x35   : > { %4226 = vmatprep.mubr.msk.bf16.mxu1 %vm4741_vm0, %v4740_v1  ;;  %v3985_v10 = vld [vmem:[%s5772_s28] ss:$0 sm:$0xff] }
  0x36   : > { %4207 = vmatmul.mubr.msk.bf16.vlgmr.msra.gmra.mxu0 %vm843_vm1, %v823_v9 }
  0x37   : > { %4220 = vmatprep.mubr.msk.bf16.mxu0 %vm4741_vm0, %v4740_v1 }
  0x38   : > { %s4087_s4 = sshll.u32 %s5798_s25, 7 }
  0xf4   : > { %v949_v11 = vpop.f32.mrf.mxu1 }
  0xf5   : > { %v950_v12 = vadd.f32 %v3985_v10, %v949_v11 }
  0xf6   : > { %v4216_v13 = vpop.f32.mrf.mxu1  ;;  %v881_v18 = vpop.f32.mrf.mxu0 }
  0xf7   : > { %v4983_v14 = vpack.c.bf16 %v950_v12, %v950_v12  ;;  %v882_v20 = vadd.f32 %v3981_v17, %v881_v18 }
  0xf8   : > { %v952_v15 = vpop.f32.mrf.mxu1  ;;  %v4208_v19 = vpop.f32.mrf.mxu0 }
  0xf9   : > { %1069 = vrot.lane.b32.xlu1 %v4983_v14, %s5731_s29  ;;  %957 = vrot.lane.b32.xlu0 %v4983_v14, %s5708_s27  ;;  %s5715_s27 = smov 48  }
  0xfa   : > { %v4217_v16 = vpop.f32.mrf.mxu1  ;;  %v884_v21 = vpop.f32.mrf.mxu0 }
  0xfb   : > { %v885_v22 = vadd.f32 %v3981_v17, %v884_v21 }
  0xfc   : > { %v4209_v23 = vpop.f32.mrf.mxu0 }
  0xfd   : > { %1183 = vrot.lane.b32.xlu1 %v4983_v14, %s5719_s9  ;;  %1071 = vrot.lane.b32.xlu0 %v4983_v14, %s5710_s5  ;;  %v5002_v24 = vpack.c.bf16 %v885_v22, %v882_v20  ;;  %s5774_s5 = sld [smem:[#allocation17_spill]]  ;;  %s5777_s9 = smov 104  }
 0x101   : > { %1295 = vrot.lane.b32.xlu1 %v4983_v14, %s5712_s3  ;;  %1181 = vrot.lane.b32.xlu0 %v4983_v14, %s5729_s1 }
 0x103   : > { %s800_s3 = scalar_lea.vmem %s5774_s5, %s4951_s8  ;;  %s5717_s8 = smov 56  }
 0x104   : > { %v3980_v39 = vld [vmem:[%s800_s3] ss:$0 sm:$0xff]  ;;  %s5718_s5 = smov 64   ;;  %s5714_s3 = smov 40  }
 0x105   : > { %1293 = vrot.lane.b32.xlu0 %v4983_v14, %s5721_s6  ;;  %v5030_v41 = vadd.f32 %v3980_v39, %v811_v40  ;;  %s5725_s6 = smov 16  }
 0x16b   : > { %v958_v25 = vpop.permute.xlu0 %957  ;;  %v1070_v28 = vpop.permute.xlu1 %1069 }
 0x16c   : > { %v964_v26 = vsel %vm959_vm2, %v958_v25, 0 }
 0x16d   : > { %4219 = vmatpush3.bf16.xpose.msra.mxu0 %v964_v26 }
 0x16e   : > { %4230 = vmatprep.subr.bf16.mxu0 %v4740_v1 }
 0x16f   : > { %v1072_v27 = vpop.permute.xlu0 %1071  ;;  %v1184_v30 = vpop.permute.xlu1 %1183 }
 0x170   : > { %v1077_v29 = vsel %vm959_vm2, %v1072_v27, 0  ;;  %v1189_v31 = vsel %vm959_vm2, %v1184_v30, 0 }
 0x173   : > { %v1296_v32 = vpop.permute.xlu1 %1295  ;;  %v1182_v33 = vpop.permute.xlu0 %1181 }
 0x174   : > { %4221 = vmatmul.mubr.msk.bf16.vlgmr.msra.gmra.mxu0 %vm959_vm2, %v4983_v14  ;;  %v1301_v34 = vsel %vm959_vm2, %v1296_v32, 0 }
 0x175   : > { %4231 = vmatpush3.bf16.xpose.msra.mxu0 %v1077_v29  ;;  %4232 = vmatprep.mubr.msk.bf16.mxu0 %vm4741_vm0, %v4740_v1 }
 0x176   : > { %4242 = vmatprep.subr.bf16.mxu0 %v4740_v1 }
 0x177   : > { %v1294_v35 = vpop.permute.xlu0 %1293 }
 0x17c   : > { %4233 = vmatmul.mubr.msk.bf16.vlgmr.msra.gmra.mxu0 %vm959_vm2, %v1070_v28 }
 0x17d   : > { %4243 = vmatpush3.bf16.xpose.msra.mxu0 %v1189_v31  ;;  %4244 = vmatprep.mubr.msk.bf16.mxu0 %vm4741_vm0, %v4740_v1 }
 0x17e   : > { %4254 = vmatprep.subr.bf16.mxu0 %v4740_v1 }
 0x184   : > { %4245 = vmatmul.mubr.msk.bf16.vlgmr.msra.gmra.mxu0 %vm959_vm2, %v1182_v33 }
 0x185   : > { %4255 = vmatpush3.bf16.xpose.msra.mxu0 %v1301_v34  ;;  %4256 = vmatprep.mubr.msk.bf16.mxu0 %vm4741_vm0, %v4740_v1 }
 0x186   : > { %4266 = vmatprep.subr.bf16.mxu0 %v4740_v1 }
 0x18c   : > { %4257 = vmatmul.mubr.msk.bf16.vlgmr.msra.gmra.mxu0 %vm959_vm2, %v1294_v35 }
 0x18d   : > { %4270 = vmatprep.mubr.msk.bf16.mxu0 %vm4741_vm0, %v4740_v1 }
 0x234   : > { %v1000_v42 = vpop.f32.mrf.mxu0 }
 0x235   : > { %v1006_v43 = vmul.f32 0.35355338, %v1000_v42 }
 0x236   : > { %v4222_v44 = vpop.f32.mrf.mxu0 }
 0x237   : > { %v1007_v45 = vadd.f32 %v1006_v43, %v5030_v41 }
 0x238   : > { %v1003_v46 = vpop.f32.mrf.mxu0 }
 0x239   : > { %v1008_v47 = vsel %vm959_vm2, %v1007_v45, -inf }
 0x23a   : > { %1009 = vmax.xlane.f32.xlu1 %v1008_v47  ;;  %v4223_v48 = vpop.f32.mrf.mxu0 }
 0x23c   : > { %v1113_v49 = vpop.f32.mrf.mxu0 }
 0x23d   : > { %v1119_v50 = vmul.f32 0.35355338, %v1113_v49 }
 0x23e   : > { %v4234_v51 = vpop.f32.mrf.mxu0 }
 0x23f   : > { %v1120_v52 = vadd.f32 %v1119_v50, %v5030_v41 }
 0x240   : > { %v1116_v53 = vpop.f32.mrf.mxu0 }
 0x241   : > { %v1121_v54 = vsel %vm959_vm2, %v1120_v52, -inf }
 0x242   : > { %1122 = vmax.xlane.f32.xlu0 %v1121_v54  ;;  %v4235_v55 = vpop.f32.mrf.mxu0 }
 0x244   : > { %v1225_v56 = vpop.f32.mrf.mxu0 }
 0x245   : > { %v1231_v57 = vmul.f32 0.35355338, %v1225_v56 }
 0x246   : > { %v4246_v58 = vpop.f32.mrf.mxu0 }
 0x247   : > { %v1232_v59 = vadd.f32 %v1231_v57, %v5030_v41 }
 0x248   : > { %v1228_v60 = vpop.f32.mrf.mxu0 }
 0x249   : > { %v1233_v61 = vsel %vm959_vm2, %v1232_v59, -inf }
 0x24a   : > { %1234 = vmax.xlane.f32.xlu0 %v1233_v61  ;;  %v4247_v62 = vpop.f32.mrf.mxu0 }
 0x24c   : > { %v1337_v63 = vpop.f32.mrf.mxu0 }
 0x24d   : > { %v1343_v0 = vmul.f32 0.35355338, %v1337_v63 }
 0x24e   : > { %v4258_v2 = vpop.f32.mrf.mxu0 }
 0x24f   : > { %v1344_v4 = vadd.f32 %v1343_v0, %v5030_v41 }
 0x250   : > { %v1340_v5 = vpop.f32.mrf.mxu0 }
 0x251   : > { %v1345_v6 = vsel %vm959_vm2, %v1344_v4, -inf }
 0x252   : > { %1346 = vmax.xlane.f32.xlu1 %v1345_v6  ;;  %v4259_v7 = vpop.f32.mrf.mxu0 }
 0x2c3   : > { %v1010_v8 = vpop.xlane.xlu1 %1009 }
 0x2c4   : > { %v1011_v9 = vsub.f32 %v1007_v45, %v1010_v8 }
 0x2c6   : > { %v1012_v10 = vmul.f32 1.442695, %v1011_v9 }
 0x2c8   : > { %4602 = vpow2.f32 %v1012_v10 }
 0x2cb   : > { %v1123_v11 = vpop.xlane.xlu0 %1122 }
 0x2cc   : > { %v1124_v12 = vsub.f32 %v1120_v52, %v1123_v11 }
 0x2ce   : > { %v1125_v13 = vmul.f32 1.442695, %v1124_v12 }
 0x2d0   : > { %4604 = vpow2.f32 %v1125_v13 }
 0x2d3   : > { %v1235_v15 = vpop.xlane.xlu0 %1234 }
 0x2d4   : > { %v1236_v16 = vsub.f32 %v1232_v59, %v1235_v15 }
 0x2d5   : > { %v4603_v17 = vpop.eup %4602 }
 0x2d6   : > { %v1237_v18 = vmul.f32 1.442695, %v1236_v16  ;;  %v1014_v19 = vsel %vm959_vm2, %v4603_v17, 0.0 }
 0x2d7   : > { %1015 = vadd.xlane.f32.xlu0 %v1014_v19 }
 0x2d8   : > { %4606 = vpow2.f32 %v1237_v18  ;;  %v5089_v18 = vsel %vm959_vm2, %v5002_v24, 0 }
 0x2db   : > { %v1347_v25 = vpop.xlane.xlu1 %1346 }
 0x2dc   : > { %v1348_v26 = vsub.f32 %v1344_v4, %v1347_v25 }
 0x2dd   : > { %v4605_v20 = vpop.eup %4604 }
 0x2de   : > { %v1127_v21 = vsel %vm959_vm2, %v4605_v20, 0.0  ;;  %v1349_v27 = vmul.f32 1.442695, %v1348_v26 }
 0x2df   : > { %1128 = vadd.xlane.f32.xlu1 %v1127_v21 }
 0x2e0   : > { %4608 = vpow2.f32 %v1349_v27 }
 0x2e5   : > { %v4607_v22 = vpop.eup %4606 }
 0x2e6   : > { %v1239_v23 = vsel %vm959_vm2, %v4607_v22, 0.0 }
 0x2e7   : > { %1240 = vadd.xlane.f32.xlu0 %v1239_v23 }
 0x2ed   : > { %v4609_v28 = vpop.eup %4608 }
 0x2ee   : > { %v1351_v29 = vsel %vm959_vm2, %v4609_v28, 0.0 }
 0x2f0   : > { %1133 = vrot.lane.b32.xlu1 %v4983_v14, %s5717_s8  ;;  %s5775_s8 = sld [smem:[#allocation20_spill]] }
 0x2f6   : > { %v4574_v62 = vld [vmem:[%s5775_s8 + $0x8] sm:$0xff]   ;;  %v4575_v63 = vld [vmem:[%s5775_s8] sm:$0xff]  }
 0x2f7   : > { %4267 = vmatpush3.bf16.msra.mxu0 %v4574_v62 }
 0x2f8   : > { %4268 = vmatprep.subr.bf16.mxu0 %v4740_v1 }
 0x2fb   : > { %4269 = vmatpush3.bf16.msra.mxu0 %v4575_v63 }
 0x2fc   : > { %4282 = vmatprep.subr.bf16.mxu0 %v4740_v1 }
 0x2fd   : > { %1020 = vrot.lane.b32.xlu0 %v4983_v14, %s5718_s5  ;;  %s5784_s5 = smov 96  }
 0x301   : > { %1357 = vrot.lane.b32.xlu0 %v4983_v14, %s5714_s3  ;;  %s5723_s3 = smov 24  }
 0x314   : > { %1352 = vadd.xlane.f32.xlu1 %v1351_v29 }
 0x325   : > { %1245 = vrot.lane.b32.xlu1 %v4983_v14, %s5715_s27  ;;  %s5776_s27 = sld [smem:[#allocation21_spill]] }
 0x32b   : > { %v5098_v19 = vld [vmem:[%s5776_s27] ss:$0 sm:$0xff]  ;;  %s5785_s27 = smov 80  }
 0x360   : > { %v1016_v30 = vpop.xlane.xlu0 %1015 }
 0x361   : > { %4610 = vrcp.f32 %v1016_v30 }
 0x368   : > { %v1129_v31 = vpop.xlane.xlu1 %1128 }
 0x369   : > { %4612 = vrcp.f32 %v1129_v31 }
 0x36c   : > { %v1134_v37 = vpop.permute.xlu1 %1133 }
 0x36d   : > { %v1139_v40 = vsel %vm1025_vm4, %v1134_v37, 0 }
 0x36e   : > { %v4611_v32 = vpop.eup %4610 }
 0x36f   : > { %v1018_v34 = vmul.f32 %v4611_v32, %v4603_v17 }
 0x370   : > { %v1241_v33 = vpop.xlane.xlu0 %1240 }
 0x371   : > { %v1019_v38 = vpack.c.bf16 %v1018_v34, %v1018_v34  ;;  %4614 = vrcp.f32 %v1241_v33 }
 0x374   : > { %v1021_v35 = vpop.permute.xlu0 %1020 }
 0x375   : > { %v1027_v36 = vsel %vm1025_vm4, %v1021_v35, 0 }
 0x376   : > { %4225 = vmatpush3.bf16.msra.mxu1 %v1027_v36  ;;  %v4613_v39 = vpop.eup %4612 }
 0x377   : > { %4236 = vmatprep.subr.bf16.mxu1 %v4740_v1  ;;  %v1131_v14 = vmul.f32 %v4613_v39, %v4605_v20 }
 0x378   : > { %v1358_v48 = vpop.permute.xlu0 %1357 }
 0x379   : > { %4227 = vmatmul.mubr.msk.bf16.vlgmr.msra.gmra.mxu1 %vm959_vm2, %v1019_v38  ;;  %v1132_v42 = vpack.c.bf16 %v1131_v14, %v1131_v14  ;;  %v1363_v50 = vsel %vm1025_vm4, %v1358_v48, 0  ;;  %v5121_v38 = vld [vmem:[%s5779_s11] ss:$0 sm:$0xff]  ;;  %s5787_s11 = smov 88  }
 0x37a   : > { %4237 = vmatpush3.bf16.msra.mxu1 %v1139_v40  ;;  %4238 = vmatprep.mubr.msk.bf16.mxu1 %vm4741_vm0, %v4740_v1 }
 0x37b   : > { %4248 = vmatprep.subr.bf16.mxu1 %v4740_v1 }
 0x37e   : > { %v4615_v43 = vpop.eup %4614 }
 0x37f   : > { %v1243_v45 = vmul.f32 %v4615_v43, %v4607_v22 }
 0x381   : > { %4239 = vmatmul.mubr.msk.bf16.vlgmr.msra.gmra.mxu1 %vm959_vm2, %v1132_v42  ;;  %v1244_v49 = vpack.c.bf16 %v1243_v45, %v1243_v45 }
 0x382   : > { %4250 = vmatprep.mubr.msk.bf16.mxu1 %vm4741_vm0, %v4740_v1 }
 0x39d   : > { %v1353_v44 = vpop.xlane.xlu1 %1352 }
 0x39e   : > { %4616 = vrcp.f32 %v1353_v44  ;;  %v5140_v44 = vld [vmem:[%s5781_s10] ss:$0 sm:$0xff]  ;;  %s5790_s10 = smov 24  }
 0x3a1   : > { %v1246_v46 = vpop.permute.xlu1 %1245 }
 0x3a2   : > { %v1251_v47 = vsel %vm1025_vm4, %v1246_v46, 0 }
 0x3a3   : > { %4249 = vmatpush3.bf16.msra.mxu1 %v1251_v47 }
 0x3a4   : > { %4260 = vmatprep.subr.bf16.mxu1 %v4740_v1 }
 0x3a6   : > { %4251 = vmatmul.mubr.msk.bf16.vlgmr.msra.gmra.mxu1 %vm959_vm2, %v1244_v49 }
 0x3a7   : > { %4261 = vmatpush3.bf16.msra.mxu1 %v1363_v50  ;;  %4262 = vmatprep.mubr.msk.bf16.mxu1 %vm4741_vm0, %v4740_v1 }
 0x3a8   : > { %4274 = vmatprep.subr.bf16.mxu1 %v4740_v1 }
 0x3ab   : > { %v4617_v51 = vpop.eup %4616 }
 0x3ac   : > { %v1355_v52 = vmul.f32 %v4617_v51, %v4609_v28 }
 0x3ae   : > { %v1356_v53 = vpack.c.bf16 %v1355_v52, %v1355_v52 }
 0x3b0   : > { %4263 = vmatmul.mubr.msk.bf16.vlgmr.msra.gmra.mxu1 %vm959_vm2, %v1356_v53 }
 0x3b1   : > { %4278 = vmatprep.mubr.msk.bf16.mxu1 %vm4741_vm0, %v4740_v1 }
 0x439   : > { %v1063_v54 = vpop.f32.mrf.mxu1 }
 0x43b   : > { %v4228_v55 = vpop.f32.mrf.mxu1 }
 0x43d   : > { %v1066_v56 = vpop.f32.mrf.mxu1 }
 0x43f   : > { %v4229_v57 = vpop.f32.mrf.mxu1 }
 0x441   : > { %v1175_v58 = vpop.f32.mrf.mxu1 }
 0x442   : > { %1406 = vrot.lane.b32.xlu1 %v1175_v58, %s5727_s26  ;;  %s5783_s26 = smov 112  }
 0x443   : > { %v4240_v59 = vpop.f32.mrf.mxu1 }
 0x445   : > { %v1178_v60 = vpop.f32.mrf.mxu1 }
 0x447   : > { %v4241_v61 = vpop.f32.mrf.mxu1 }
 0x466   : > { %v1287_v0 = vpop.f32.mrf.mxu1 }
 0x467   : > { %1410 = vrot.lane.b32.xlu0 %v1287_v0, %s5725_s6  ;;  %s5780_s6 = sld [smem:[#allocation23_spill]] }
 0x468   : > { %v4252_v2 = vpop.f32.mrf.mxu1 }
 0x46a   : > { %v1290_v4 = vpop.f32.mrf.mxu1 }
 0x46c   : > { %v4253_v5 = vpop.f32.mrf.mxu1 }
 0x46d   : > { %v5126_v40 = vld [vmem:[%s5780_s6] ss:$0 sm:$0xff]  ;;  %s5786_s6 = smov 72  }
 0x470   : > { %v1399_v6 = vpop.f32.mrf.mxu1 }
 0x471   : > { %1414 = vrot.lane.b32.xlu1 %v1399_v6, %s5723_s3  ;;  %s5778_s3 = sld [smem:[#allocation24_spill]] }
 0x472   : > { %v4264_v7 = vpop.f32.mrf.mxu1 }
 0x474   : > { %v1402_v8 = vpop.f32.mrf.mxu1 }
 0x476   : > { %v4265_v9 = vpop.f32.mrf.mxu1 }
 0x477   : > { %v4576_v32 = vld [vmem:[%s5778_s3 + $0x8] sm:$0xff]   ;;  %v4577_v33 = vld [vmem:[%s5778_s3] sm:$0xff]  }
 0x478   : > { %4275 = vmatpush3.bf16.msra.mxu1 %v4576_v32 }
 0x479   : > { %4276 = vmatprep.subr.bf16.mxu1 %v4740_v1 }
 0x47c   : > { %4277 = vmatpush3.bf16.msra.mxu1 %v4577_v33 }
 0x47d   : > { %4288 = vmatprep.subr.bf16.mxu1 %v4740_v1 }
 0x4b4   : > { %v1407_v10 = vpop.permute.xlu1 %1406 }
 0x4b5   : > { %v1417_v12 = vsel %vm959_vm2, %v1063_v54, %v1407_v10 }
 0x4d9   : > { %v1411_v11 = vpop.permute.xlu0 %1410 }
 0x4da   : > { %v1419_v13 = vsel %vm1418_vm5, %v1417_v12, %v1411_v11 }
 0x4e3   : > { %v1415_v15 = vpop.permute.xlu1 %1414 }
 0x4e4   : > { %v1421_v16 = vsel %vm1420_vm6, %v1419_v13, %v1415_v15 }
 0x4e5   : > { %v1426_v17 = vpack.c.bf16 %v1421_v16, %v1421_v16 }
 0x4e7   : > { %4271 = vmatmul.mubr.msk.bf16.vlgmr.msra.gmra.mxu0 %vm843_vm1, %v1426_v17 }
 0x4e8   : > { %4283 = vmatpush3.bf16.xpose.msra.mxu0 %v5089_v18  ;;  %4284 = vmatprep.mubr.msk.bf16.mxu0 %vm4741_vm0, %v4740_v1 }
 0x4e9   : > { %4294 = vmatprep.subr.bf16.mxu0 %v4740_v1 }
 0x5a7   : > { %v1483_v20 = vpop.f32.mrf.mxu0 }
 0x5a8   : > { %v1484_v21 = vadd.f32 %v5098_v19, %v1483_v20 }
 0x5a9   : > { %v4272_v22 = vpop.f32.mrf.mxu0 }
 0x5aa   : > { %v1489_v23 = vadd.f32 %v1484_v21, %v4958_v3 }
 0x5ab   : > { %v1486_v25 = vpop.f32.mrf.mxu0 }
 0x5ac   : > { %v1492_v26 = vsel %vm843_vm1, %v1489_v23, 0.0 }
 0x5ad   : > { %1493 = vadd.xlane.f32.xlu0 %v1492_v26  ;;  %v4273_v27 = vpop.f32.mrf.mxu0 }
 0x5c3   : > { %1698 = vrot.lane.b32.xlu0 %v5002_v24, %s5731_s29 }
 0x5c7   : > { %1807 = vrot.lane.b32.xlu0 %v5002_v24, %s5729_s1  ;;  %s5782_s1 = smov 120  }
 0x5cb   : > { %1916 = vrot.lane.b32.xlu0 %v5002_v24, %s5777_s9 }
 0x636   : > { %v1494_v28 = vpop.xlane.xlu0 %1493 }
 0x637   : > { %v1496_v29 = vmul.f32 0.03125, %v1494_v28 }
 0x639   : > { %v1497_v30 = vsub.f32 %v1489_v23, %v1496_v29 }
 0x63a   : > { %v1699_v47 = vpop.permute.xlu0 %1698 }
 0x63b   : > { %v1498_v31 = vmul.f32 %v1497_v30, %v1497_v30  ;;  %v5144_v51 = vsel %vm959_vm2, %v1699_v47, 0 }
 0x63d   : > { %v1499_v3 = vsel %vm843_vm1, %v1498_v31, 0.0 }
 0x63e   : > { %1500 = vadd.xlane.f32.xlu1 %v1499_v3  ;;  %v1808_v53 = vpop.permute.xlu0 %1807 }
 0x63f   : > { %v5155_v55 = vsel %vm959_vm2, %v1808_v53, 0 }
 0x642   : > { %v1917_v56 = vpop.permute.xlu0 %1916 }
 0x643   : > { %v5163_v58 = vsel %vm959_vm2, %v1917_v56, 0 }
 0x6c7   : > { %v1501_v34 = vpop.xlane.xlu1 %1500 }
 0x6c8   : > { %v1502_v35 = vmul.f32 0.03125, %v1501_v34 }
 0x6ca   : > { %v1503_v36 = vadd.f32 1e-05, %v1502_v35 }
 0x6cc   : > { %4618 = vrsqrt.f32 %v1503_v36 }
 0x6d9   : > { %v4619_v37 = vpop.eup %4618 }
 0x6da   : > { %v1505_v39 = vmul.f32 %v4619_v37, %v1497_v30 }
 0x6dc   : > { %v1512_v14 = vmul.f32 %v5121_v38, %v1505_v39 }
 0x6de   : > { %v5130_v42 = vadd.f32 %v5126_v40, %v1512_v14 }
 0x6e0   : > { %v1524_v43 = vpack.c.bf16 %v5130_v42, %v5130_v42 }
 0x6e2   : > { %4279 = vmatmul.mubr.msk.bf16.vlgmr.msra.gmra.mxu1 %vm843_vm1, %v1524_v43 }
 0x6e3   : > { %4290 = vmatprep.mubr.msk.bf16.mxu1 %vm4741_vm0, %v4740_v1 }
 0x7a2   : > { %v1581_v45 = vpop.f32.mrf.mxu1 }
 0x7a3   : > { %v1582_v46 = vadd.f32 %v5140_v44, %v1581_v45 }
 0x7a4   : > { %v4280_v48 = vpop.f32.mrf.mxu1 }
 0x7a5   : > { %v1587_v49 = vpack.c.bf16 %v1582_v46, %v1582_v46 }
 0x7a6   : > { %v1584_v50 = vpop.f32.mrf.mxu1 }
 0x7a7   : > { %1696 = vrot.lane.b32.xlu1 %v1587_v49, %s5782_s1  ;;  %4285 = vmatmul.mubr.msk.bf16.vlgmr.msra.gmra.mxu0 %vm959_vm2, %v1587_v49 }
 0x7a8   : > { %4295 = vmatpush3.bf16.xpose.msra.mxu0 %v5144_v51  ;;  %v4281_v52 = vpop.f32.mrf.mxu1  ;;  %4296 = vmatprep.mubr.msk.bf16.mxu0 %vm4741_vm0, %v4740_v1 }
 0x7a9   : > { %4306 = vmatprep.subr.bf16.mxu0 %v4740_v1 }
 0x7ab   : > { %1805 = vrot.lane.b32.xlu1 %v1587_v49, %s5783_s26 }
 0x7af   : > { %1914 = vrot.lane.b32.xlu1 %v1587_v49, %s5777_s9 }
 0x819   : > { %v1697_v54 = vpop.permute.xlu1 %1696 }
 0x81a   : > { %4297 = vmatmul.mubr.msk.bf16.vlgmr.msra.gmra.mxu0 %vm959_vm2, %v1697_v54 }
 0x81b   : > { %4307 = vmatpush3.bf16.xpose.msra.mxu0 %v5155_v55  ;;  %4308 = vmatprep.mubr.msk.bf16.mxu0 %vm4741_vm0, %v4740_v1 }
 0x81c   : > { %4318 = vmatprep.subr.bf16.mxu0 %v4740_v1 }
 0x81d   : > { %v1806_v57 = vpop.permute.xlu1 %1805 }
 0x821   : > { %v1915_v59 = vpop.permute.xlu1 %1914 }
 0x822   : > { %4309 = vmatmul.mubr.msk.bf16.vlgmr.msra.gmra.mxu0 %vm959_vm2, %v1806_v57 }
 0x823   : > { %4319 = vmatpush3.bf16.xpose.msra.mxu0 %v5163_v58  ;;  %4320 = vmatprep.mubr.msk.bf16.mxu0 %vm4741_vm0, %v4740_v1 }
 0x824   : > { %4330 = vmatprep.subr.bf16.mxu0 %v4740_v1 }
 0x82a   : > { %4321 = vmatmul.mubr.msk.bf16.vlgmr.msra.gmra.mxu0 %vm959_vm2, %v1915_v59 }
 0x82b   : > { %4334 = vmatprep.mubr.msk.bf16.mxu0 %vm4741_vm0, %v4740_v1 }
 0x867   : > { %v1629_v60 = vpop.f32.mrf.mxu0 }
 0x868   : > { %v1635_v61 = vmul.f32 0.35355338, %v1629_v60 }
 0x869   : > { %v4286_v62 = vpop.f32.mrf.mxu0 }
 0x86a   : > { %v1636_v63 = vsel %vm1418_vm5, %v1635_v61, -inf }
 0x86b   : > { %1637 = vmax.xlane.f32.xlu0 %v1636_v63  ;;  %v1632_v0 = vpop.f32.mrf.mxu0 }
 0x86d   : > { %v4287_v2 = vpop.f32.mrf.mxu0 }
 0x8da   : > { %v1740_v4 = vpop.f32.mrf.mxu0 }
 0x8db   : > { %v1746_v5 = vmul.f32 0.35355338, %v1740_v4 }
 0x8dc   : > { %v4298_v6 = vpop.f32.mrf.mxu0 }
 0x8dd   : > { %v1747_v7 = vsel %vm1418_vm5, %v1746_v5, -inf }
 0x8de   : > { %1748 = vmax.xlane.f32.xlu1 %v1747_v7  ;;  %v1743_v8 = vpop.f32.mrf.mxu0 }
 0x8e0   : > { %v4299_v9 = vpop.f32.mrf.mxu0 }
 0x8e2   : > { %v1849_v10 = vpop.f32.mrf.mxu0 }
 0x8e3   : > { %v1855_v11 = vmul.f32 0.35355338, %v1849_v10 }
 0x8e4   : > { %v4310_v12 = vpop.f32.mrf.mxu0 }
 0x8e5   : > { %v1856_v13 = vsel %vm1418_vm5, %v1855_v11, -inf }
 0x8e6   : > { %1857 = vmax.xlane.f32.xlu0 %v1856_v13  ;;  %v1852_v15 = vpop.f32.mrf.mxu0  ;;  %v4578_v13 = vld [vmem:[%s5686_s13 + $0x8] sm:$0xff]  }
 0x8e7   : > { %4331 = vmatpush3.bf16.msra.mxu0 %v4578_v13 }
 0x8e8   : > { %v4311_v16 = vpop.f32.mrf.mxu0  ;;  %4332 = vmatprep.subr.bf16.mxu0 %v4740_v1 }
 0x8ea   : > { %v1958_v17 = vpop.f32.mrf.mxu0 }
 0x8eb   : > { %v1964_v20 = vmul.f32 0.35355338, %v1958_v17  ;;  %v4579_v17 = vld [vmem:[%s5686_s13] sm:$0xff]  }
 0x8ec   : > { %v4322_v21 = vpop.f32.mrf.mxu0  ;;  %4333 = vmatpush3.bf16.msra.mxu0 %v4579_v17  ;;  %v4585_v17 = vld [vmem:[%s5692_s19] sm:$0xff]  }
 0x8ed   : > { %v1965_v22 = vsel %vm1418_vm5, %v1964_v20, -inf  ;;  %4346 = vmatprep.subr.bf16.mxu0 %v4740_v1 }
 0x8ee   : > { %1966 = vmax.xlane.f32.xlu0 %v1965_v22  ;;  %v1961_v23 = vpop.f32.mrf.mxu0 }
 0x8f0   : > { %v4323_v25 = vpop.f32.mrf.mxu0 }
 0x8f4   : > { %v1638_v26 = vpop.xlane.xlu0 %1637 }
 0x8f5   : > { %v1639_v27 = vsub.f32 %v1635_v61, %v1638_v26 }
 0x8f7   : > { %v1640_v28 = vmul.f32 1.442695, %v1639_v27 }
 0x8f9   : > { %4620 = vpow2.f32 %v1640_v28 }
 0x906   : > { %v4621_v29 = vpop.eup %4620 }
 0x907   : > { %v1642_v30 = vsel %vm1418_vm5, %v4621_v29, 0.0 }
 0x908   : > { %1643 = vadd.xlane.f32.xlu1 %v1642_v30 }
 0x919   : > { %1649 = vrot.lane.b32.xlu1 %v5002_v24, %s5784_s5 }
 0x967   : > { %v1749_v31 = vpop.xlane.xlu1 %1748 }
 0x968   : > { %v1750_v3 = vsub.f32 %v1746_v5, %v1749_v31 }
 0x96a   : > { %v1751_v32 = vmul.f32 1.442695, %v1750_v3 }
 0x96c   : > { %4622 = vpow2.f32 %v1751_v32 }
 0x96f   : > { %v1858_v33 = vpop.xlane.xlu0 %1857 }
 0x970   : > { %v1859_v34 = vsub.f32 %v1855_v11, %v1858_v33 }
 0x972   : > { %v1860_v35 = vmul.f32 1.442695, %v1859_v34 }
 0x974   : > { %4624 = vpow2.f32 %v1860_v35 }
 0x977   : > { %v1967_v36 = vpop.xlane.xlu0 %1966 }
 0x978   : > { %v1968_v37 = vsub.f32 %v1964_v20, %v1967_v36 }
 0x979   : > { %v4623_v39 = vpop.eup %4622 }
 0x97a   : > { %v1969_v14 = vmul.f32 1.442695, %v1968_v37  ;;  %v1753_v43 = vsel %vm1418_vm5, %v4623_v39, 0.0  ;;  %v5253_v37 = vld [vmem:[%s5791_s14] ss:$0 sm:$0xff] }
 0x97b   : > { %1754 = vadd.xlane.f32.xlu0 %v1753_v43 }
 0x97c   : > { %4626 = vpow2.f32 %v1969_v14 }
 0x981   : > { %v4625_v45 = vpop.eup %4624 }
 0x982   : > { %v1862_v46 = vsel %vm1418_vm5, %v4625_v45, 0.0 }
 0x983   : > { %1863 = vadd.xlane.f32.xlu1 %v1862_v46 }
 0x989   : > { %v4627_v47 = vpop.eup %4626 }
 0x98a   : > { %v1971_v48 = vsel %vm1418_vm5, %v4627_v47, 0.0 }
 0x98b   : > { %1972 = vadd.xlane.f32.xlu0 %v1971_v48 }
 0x991   : > { %v1644_v49 = vpop.xlane.xlu1 %1643 }
 0x992   : > { %4628 = vrcp.f32 %v1644_v49 }
 0x994   : > { %1868 = vrot.lane.b32.xlu1 %v5002_v24, %s5785_s27 }
 0x995   : > { %v5185_v50 = vpop.permute.xlu1 %1649 }
 0x996   : > { %4289 = vmatpush3.bf16.msra.mxu1 %v5185_v50 }
 0x997   : > { %4300 = vmatprep.subr.bf16.mxu1 %v4740_v1 }
 0x998   : > { %1977 = vrot.lane.b32.xlu1 %v5002_v24, %s5786_s6 }
 0x99f   : > { %v4629_v52 = vpop.eup %4628 }
 0x9a0   : > { %v5191_v53 = vmul.f32 %v4629_v52, %v4621_v29 }
 0x9a1   : > { %1759 = vrot.lane.b32.xlu0 %v5002_v24, %s5787_s11 }
 0x9a2   : > { %v1647_v54 = vpack.c.bf16 %v5191_v53, %v5191_v53 }
 0x9a4   : > { %4291 = vmatmul.mubr.msk.bf16.vlgmr.msra.gmra.mxu1 %vm1418_vm5, %v1647_v54 }
 0x9a5   : > { %4302 = vmatprep.mubr.msk.bf16.mxu1 %vm4741_vm0, %v4740_v1 }
 0xa04   : > { %v1755_v56 = vpop.xlane.xlu0 %1754 }
 0xa05   : > { %4630 = vrcp.f32 %v1755_v56 }
 0xa0c   : > { %v1864_v57 = vpop.xlane.xlu1 %1863 }
 0xa0d   : > { %4632 = vrcp.f32 %v1864_v57 }
 0xa10   : > { %v5208_v0 = vpop.permute.xlu1 %1868 }
 0xa12   : > { %v4631_v59 = vpop.eup %4630 }
 0xa13   : > { %v5200_v61 = vmul.f32 %v4631_v59, %v4623_v39  ;;  %v4580_v59 = vld [vmem:[%s5690_s17 + $0x8] sm:$0xff]  }
 0xa14   : > { %v1973_v60 = vpop.xlane.xlu0 %1972  ;;  %v5219_v6 = vpop.permute.xlu1 %1977 }
 0xa15   : > { %4634 = vrcp.f32 %v1973_v60  ;;  %v1758_v24 = vpack.c.bf16 %v5200_v61, %v5200_v61  ;;  %v4582_v60 = vld [vmem:[%s5692_s19 + $0x18] sm:$0xff]  }
 0xa18   : > { %v5202_v62 = vpop.permute.xlu0 %1759 }
 0xa19   : > { %4301 = vmatpush3.bf16.msra.mxu1 %v5202_v62 }
 0xa1a   : > { %4312 = vmatprep.subr.bf16.mxu1 %v4740_v1  ;;  %v4633_v63 = vpop.eup %4632 }
 0xa1b   : > { %v5215_v2 = vmul.f32 %v4633_v63, %v4625_v45 }
 0xa1c   : > { %4303 = vmatmul.mubr.msk.bf16.vlgmr.msra.gmra.mxu1 %vm1418_vm5, %v1758_v24  ;;  %v4583_v24 = vld [vmem:[%s5692_s19 + $0x10] sm:$0xff]  }
 0xa1d   : > { %4313 = vmatpush3.bf16.msra.mxu1 %v5208_v0  ;;  %4314 = vmatprep.mubr.msk.bf16.mxu1 %vm4741_vm0, %v4740_v1  ;;  %v1867_v4 = vpack.c.bf16 %v5215_v2, %v5215_v2 }
 0xa1e   : > { %4324 = vmatprep.subr.bf16.mxu1 %v4740_v1 }
 0xa22   : > { %v4635_v5 = vpop.eup %4634 }
 0xa23   : > { %v5225_v7 = vmul.f32 %v4635_v5, %v4627_v47 }
 0xa24   : > { %4315 = vmatmul.mubr.msk.bf16.vlgmr.msra.gmra.mxu1 %vm1418_vm5, %v1867_v4 }
 0xa25   : > { %4325 = vmatpush3.bf16.msra.mxu1 %v5219_v6  ;;  %4326 = vmatprep.mubr.msk.bf16.mxu1 %vm4741_vm0, %v4740_v1  ;;  %v1976_v8 = vpack.c.bf16 %v5225_v7, %v5225_v7 }
 0xa26   : > { %4338 = vmatprep.subr.bf16.mxu1 %v4740_v1 }
 0xa2c   : > { %4327 = vmatmul.mubr.msk.bf16.vlgmr.msra.gmra.mxu1 %vm1418_vm5, %v1976_v8 }
 0xa2d   : > { %4342 = vmatprep.mubr.msk.bf16.mxu1 %vm4741_vm0, %v4740_v1  ;;  %4339 = vmatpush3.bf16.msra.mxu1 %v4580_v59  ;;  %v5331_v59 = vld [vmem:[%s5695_s22] ss:$0 sm:$0xff] }
 0xa2e   : > { %4340 = vmatprep.subr.bf16.mxu1 %v4740_v1 }
 0xa64   : > { %v1689_v9 = vpop.f32.mrf.mxu1 }
 0xa66   : > { %v4292_v10 = vpop.f32.mrf.mxu1 }
 0xa68   : > { %v1692_v11 = vpop.f32.mrf.mxu1 }
 0xa69   : > { %v5283_v11 = vld [vmem:[%s5689_s16] ss:$0 sm:$0xff] }
 0xa6a   : > { %v4293_v12 = vpop.f32.mrf.mxu1 }
 0xadc   : > { %v1799_v15 = vpop.f32.mrf.mxu1 }
 0xadd   : > { %2042 = vrot.lane.b32.xlu0 %v1799_v15, %s5788_s12 }
 0xade   : > { %v4304_v16 = vpop.f32.mrf.mxu1 }
 0xadf   : > { %v4584_v16 = vld [vmem:[%s5692_s19 + $0x8] sm:$0xff]  }
 0xae0   : > { %v1802_v20 = vpop.f32.mrf.mxu1 }
 0xae1   : > { %v5301_v20 = vld [vmem:[%s5691_s18] ss:$0 sm:$0xff] }
 0xae2   : > { %v4305_v21 = vpop.f32.mrf.mxu1 }
 0xae4   : > { %v1908_v22 = vpop.f32.mrf.mxu1 }
 0xae5   : > { %2046 = vrot.lane.b32.xlu1 %v1908_v22, %s5789_s24 }
 0xae6   : > { %v4316_v23 = vpop.f32.mrf.mxu1 }
 0xae8   : > { %v1911_v25 = vpop.f32.mrf.mxu1 }
 0xaea   : > { %v4317_v26 = vpop.f32.mrf.mxu1 }
 0xaec   : > { %v2017_v27 = vpop.f32.mrf.mxu1 }
 0xaed   : > { %2050 = vrot.lane.b32.xlu0 %v2017_v27, %s5790_s10 }
 0xaee   : > { %v4328_v28 = vpop.f32.mrf.mxu1 }
 0xaf0   : > { %v2020_v29 = vpop.f32.mrf.mxu1 }
 0xaf1   : > { %v5310_v29 = vld [vmem:[%s5693_s20] ss:$0 sm:$0xff] }
 0xaf2   : > { %v4329_v30 = vpop.f32.mrf.mxu1 }
 0xb4f   : > { %v2043_v31 = vpop.permute.xlu0 %2042 }
 0xb50   : > { %v2053_v32 = vsel %vm959_vm2, %v1689_v9, %v2043_v31  ;;  %v5278_v9 = vld [vmem:[%s5688_s15] ss:$0 sm:$0xff] }
 0xb57   : > { %v2047_v3 = vpop.permute.xlu1 %2046 }
 0xb58   : > { %v2054_v33 = vsel %vm1418_vm5, %v2053_v32, %v2047_v3 }
 0xb5f   : > { %v2051_v34 = vpop.permute.xlu0 %2050 }
 0xb60   : > { %v2055_v35 = vsel %vm1420_vm6, %v2054_v33, %v2051_v34 }
 0xb61   : > { %v2060_v36 = vpack.c.bf16 %v2055_v35, %v2055_v35 }
 0xb63   : > { %4335 = vmatmul.mubr.msk.bf16.vlgmr.msra.gmra.mxu0 %vm843_vm1, %v2060_v36 }
 0xb64   : > { %4354 = vmatprep.mubr.msk.bf16.mxu0 %vm4741_vm0, %v4740_v1  ;;  %4347 = vmatpush3.bf16.msra.mxu0 %v4582_v60 }
 0xb65   : > { %4348 = vmatprep.subr.bf16.mxu0 %v4740_v1 }
 0xb68   : > { %4349 = vmatpush3.bf16.msra.mxu0 %v4583_v24 }
 0xb69   : > { %4350 = vmatprep.subr.bf16.mxu0 %v4740_v1 }
 0xb6c   : > { %4351 = vmatpush3.bf16.msra.mxu0 %v4584_v16 }
 0xb6d   : > { %4352 = vmatprep.subr.bf16.mxu0 %v4740_v1 }
 0xb70   : > { %4353 = vmatpush3.bf16.msra.mxu0 %v4585_v17 }
 0xb71   : > { %4372 = vmatprep.subr.bf16.mxu0 %v4740_v1 }
 0xc23   : > { %v2117_v39 = vpop.f32.mrf.mxu0 }
 0xc24   : > { %v2118_v14 = vadd.f32 %v5253_v37, %v2117_v39 }
 0xc25   : > { %v4336_v43 = vpop.f32.mrf.mxu0 }
 0xc26   : > { %v2123_v45 = vadd.f32 %v2118_v14, %v5130_v42  ;;  %v4581_v42 = vld [vmem:[%s5690_s17] sm:$0xff]  }
 0xc27   : > { %v2120_v46 = vpop.f32.mrf.mxu0  ;;  %4341 = vmatpush3.bf16.msra.mxu1 %v4581_v42 }
 0xc28   : > { %v2126_v47 = vsel %vm843_vm1, %v2123_v45, 0.0  ;;  %4358 = vmatprep.subr.bf16.mxu1 %v4740_v1  ;;  %v4586_v46 = vld [vmem:[%s5768_s0 + $0x8] sm:$0xff]  }
 0xc29   : > { %2127 = vadd.xlane.f32.xlu1 %v2126_v47  ;;  %v4337_v48 = vpop.f32.mrf.mxu0  ;;  %v4587_v47 = vld [vmem:[%s5768_s0] sm:$0xff]  }
 0xcb2   : > { %v2128_v49 = vpop.xlane.xlu1 %2127 }
 0xcb3   : > { %v2129_v52 = vmul.f32 0.03125, %v2128_v49 }
 0xcb5   : > { %v2130_v54 = vsub.f32 %v2123_v45, %v2129_v52 }
 0xcb7   : > { %v2131_v56 = vmul.f32 %v2130_v54, %v2130_v54 }
 0xcb9   : > { %v2132_v57 = vsel %vm843_vm1, %v2131_v56, 0.0  ;;  %v5326_v56 = vld [vmem:[%s5694_s21] ss:$0 sm:$0xff] }
 0xcba   : > { %2133 = vadd.xlane.f32.xlu0 %v2132_v57 }
 0xd43   : > { %v2134_v63 = vpop.xlane.xlu0 %2133 }
 0xd44   : > { %v2135_v4 = vmul.f32 0.03125, %v2134_v63  ;;  %v4033_v63 = vld [vmem:[%s5772_s28] ss:$0 sm:$0xff] }
 0xd46   : > { %v2136_v5 = vadd.f32 1e-05, %v2135_v4 }
 0xd48   : > { %4636 = vrsqrt.f32 %v2136_v5 }
 0xd55   : > { %v4637_v8 = vpop.eup %4636 }
 0xd56   : > { %v2138_v10 = vmul.f32 %v4637_v8, %v2130_v54 }
 0xd58   : > { %v2145_v12 = vmul.f32 %v5278_v9, %v2138_v10 }
 0xd5a   : > { %v2152_v13 = vadd.f32 %v5283_v11, %v2145_v12 }
 0xd5c   : > { %v2157_v15 = vpack.c.bf16 %v2152_v13, %v2152_v13 }
 0xd5e   : > { %4343 = vmatmul.mubr.msk.bf16.vlgmr.msra.gmra.mxu1 %vm843_vm1, %v2157_v15 }
 0xd5f   : > { %4362 = vmatprep.mubr.msk.bf16.mxu1 %vm4741_vm0, %v4740_v1  ;;  %4359 = vmatpush3.bf16.msra.mxu1 %v4586_v46 }
 0xd60   : > { %4360 = vmatprep.subr.bf16.mxu1 %v4740_v1 }
 0xd63   : > { %4361 = vmatpush3.bf16.msra.mxu1 %v4587_v47 }
 0xd64   : > { %4366 = vmatprep.subr.bf16.mxu1 %v4740_v1 }
 0xe1e   : > { %v2214_v21 = vpop.f32.mrf.mxu1 }
 0xe1f   : > { %v2215_v22 = vadd.f32 %v5301_v20, %v2214_v21 }
 0xe20   : > { %v4344_v23 = vpop.f32.mrf.mxu1 }
 0xe21   : > { %v2220_v25 = vmax.f32 %v2215_v22, 0.0 }
 0xe22   : > { %v2217_v26 = vpop.f32.mrf.mxu1 }
 0xe23   : > { %v2229_v27 = vpack.c.bf16 %v2220_v25, %v2220_v25 }
 0xe24   : > { %v4345_v28 = vpop.f32.mrf.mxu1 }
 0xe25   : > { %4355 = vmatmul.mubr.msk.bf16.vlgmr.msra.gmra.mxu0 %vm2039_vm7, %v2229_v27 }
 0xe26   : > { %4374 = vmatprep.mubr.msk.bf16.mxu0 %vm4741_vm0, %v4740_v1 }
 0xee5   : > { %v2298_v30 = vpop.f32.mrf.mxu0 }
 0xee6   : > { %v2299_v31 = vadd.f32 %v5310_v29, %v2298_v30 }
 0xee7   : > { %v4356_v3 = vpop.f32.mrf.mxu0 }
 0xee8   : > { %v2304_v32 = vadd.f32 %v2299_v31, %v2152_v13 }
 0xee9   : > { %v2301_v33 = vpop.f32.mrf.mxu0 }
 0xeea   : > { %v2307_v34 = vsel %vm843_vm1, %v2304_v32, 0.0 }
 0xeeb   : > { %2308 = vadd.xlane.f32.xlu0 %v2307_v34  ;;  %v4357_v35 = vpop.f32.mrf.mxu0 }
 0xf74   : > { %v2309_v36 = vpop.xlane.xlu0 %2308 }
 0xf75   : > { %v2310_v39 = vmul.f32 0.03125, %v2309_v36 }
 0xf77   : > { %v2311_v14 = vsub.f32 %v2304_v32, %v2310_v39 }
 0xf79   : > { %v2312_v43 = vmul.f32 %v2311_v14, %v2311_v14 }
 0xf7b   : > { %v2313_v45 = vsel %vm843_vm1, %v2312_v43, 0.0 }
 0xf7c   : > { %2314 = vadd.xlane.f32.xlu1 %v2313_v45 }
0x1005   : > { %v2315_v48 = vpop.xlane.xlu1 %2314 }
0x1006   : > { %v2316_v49 = vmul.f32 0.03125, %v2315_v48 }
0x1008   : > { %v2317_v52 = vadd.f32 1e-05, %v2316_v49 }
0x100a   : > { %4638 = vrsqrt.f32 %v2317_v52 }
0x1017   : > { %v4639_v54 = vpop.eup %4638 }
0x1018   : > { %v2319_v57 = vmul.f32 %v4639_v54, %v2311_v14 }
0x101a   : > { %v2326_v42 = vmul.f32 %v5326_v56, %v2319_v57 }
0x101c   : > { %v5335_v60 = vadd.f32 %v5331_v59, %v2326_v42 }
0x101e   : > { %v2338_v24 = vpack.c.bf16 %v5335_v60, %v5335_v60 }
0x1020   : > { %4363 = vmatmul.mubr.msk.bf16.vlgmr.msra.gmra.mxu1 %vm843_vm1, %v2338_v24 }
0x1021   : > { %4368 = vmatprep.mubr.msk.bf16.mxu1 %vm4741_vm0, %v4740_v1 }
0x10e0   : > { %v2395_v4 = vpop.f32.mrf.mxu1 }
0x10e1   : > { %v2396_v5 = vadd.f32 %v4033_v63, %v2395_v4 }
0x10e2   : > { %v4364_v8 = vpop.f32.mrf.mxu1 }
0x10e3   : > { %v5345_v10 = vpack.c.bf16 %v2396_v5, %v2396_v5 }
0x10e4   : > { %v2398_v12 = vpop.f32.mrf.mxu1 }
0x10e5   : > { %2515 = vrot.lane.b32.xlu1 %v5345_v10, %s5787_s11  ;;  %2403 = vrot.lane.b32.xlu0 %v5345_v10, %s5784_s5  ;;  %s5792_s5 = smov 64   ;;  %s5795_s11 = smov 40  }
0x10e6   : > { %v4365_v13 = vpop.f32.mrf.mxu1 }
0x10e9   : > { %2513 = vrot.lane.b32.xlu1 %v5345_v10, %s5782_s1  ;;  %2627 = vrot.lane.b32.xlu0 %v5345_v10, %s5785_s27  ;;  %s5793_s27 = smov 56  }
0x10ed   : > { %2625 = vrot.lane.b32.xlu1 %v5345_v10, %s5783_s26  ;;  %2739 = vrot.lane.b32.xlu0 %v5345_v10, %s5786_s6  ;;  %s5794_s6 = smov 48  }
0x10f1   : > { %2737 = vrot.lane.b32.xlu1 %v5345_v10, %s5777_s9 }
0x1157   : > { %v2404_v15 = vpop.permute.xlu0 %2403  ;;  %v2516_v17 = vpop.permute.xlu1 %2515 }
0x1158   : > { %v2409_v16 = vsel %vm959_vm2, %v2404_v15, 0  ;;  %v2521_v21 = vsel %vm959_vm2, %v2516_v17, 0 }
0x1159   : > { %4367 = vmatpush3.bf16.xpose.msra.mxu1 %v2409_v16 }
0x115a   : > { %4378 = vmatprep.subr.bf16.mxu1 %v4740_v1 }
0x115b   : > { %v2628_v22 = vpop.permute.xlu0 %2627  ;;  %v2514_v23 = vpop.permute.xlu1 %2513 }
0x115c   : > { %v2633_v25 = vsel %vm959_vm2, %v2628_v22, 0 }
0x115f   : > { %v2740_v26 = vpop.permute.xlu0 %2739  ;;  %v2626_v27 = vpop.permute.xlu1 %2625 }
0x1160   : > { %4369 = vmatmul.mubr.msk.bf16.vlgmr.msra.gmra.mxu1 %vm959_vm2, %v5345_v10  ;;  %v2745_v28 = vsel %vm959_vm2, %v2740_v26, 0 }
0x1161   : > { %4379 = vmatpush3.bf16.xpose.msra.mxu1 %v2521_v21  ;;  %4380 = vmatprep.mubr.msk.bf16.mxu1 %vm4741_vm0, %v4740_v1 }
0x1162   : > { %4390 = vmatprep.subr.bf16.mxu1 %v4740_v1 }
0x1163   : > { %v2738_v30 = vpop.permute.xlu1 %2737 }
0x1168   : > { %4381 = vmatmul.mubr.msk.bf16.vlgmr.msra.gmra.mxu1 %vm959_vm2, %v2514_v23 }
0x1169   : > { %4391 = vmatpush3.bf16.xpose.msra.mxu1 %v2633_v25  ;;  %4392 = vmatprep.mubr.msk.bf16.mxu1 %vm4741_vm0, %v4740_v1 }
0x116a   : > { %4402 = vmatprep.subr.bf16.mxu1 %v4740_v1 }
0x1170   : > { %4393 = vmatmul.mubr.msk.bf16.vlgmr.msra.gmra.mxu1 %vm959_vm2, %v2626_v27 }
0x1171   : > { %4403 = vmatpush3.bf16.xpose.msra.mxu1 %v2745_v28  ;;  %4404 = vmatprep.mubr.msk.bf16.mxu1 %vm4741_vm0, %v4740_v1 }
0x1172   : > { %4414 = vmatprep.subr.bf16.mxu1 %v4740_v1 }
0x1178   : > { %4405 = vmatmul.mubr.msk.bf16.vlgmr.msra.gmra.mxu1 %vm959_vm2, %v2738_v30 }
0x1179   : > { %4418 = vmatprep.mubr.msk.bf16.mxu1 %vm4741_vm0, %v4740_v1 }
0x1220   : > { %v2445_v31 = vpop.f32.mrf.mxu1 }
0x1221   : > { %v2451_v3 = vmul.f32 0.35355338, %v2445_v31 }
0x1222   : > { %v4370_v32 = vpop.f32.mrf.mxu1 }
0x1223   : > { %v2452_v33 = vadd.f32 %v2451_v3, %v5030_v41 }
0x1224   : > { %v2448_v34 = vpop.f32.mrf.mxu1 }
0x1225   : > { %v2453_v35 = vsel %vm959_vm2, %v2452_v33, -inf }
0x1226   : > { %2454 = vmax.xlane.f32.xlu0 %v2453_v35  ;;  %v4371_v36 = vpop.f32.mrf.mxu1 }
0x1228   : > { %v2557_v39 = vpop.f32.mrf.mxu1 }
0x1229   : > { %v2563_v14 = vmul.f32 0.35355338, %v2557_v39 }
0x122a   : > { %v4382_v43 = vpop.f32.mrf.mxu1 }
0x122b   : > { %v2564_v45 = vadd.f32 %v2563_v14, %v5030_v41 }
0x122c   : > { %v2560_v46 = vpop.f32.mrf.mxu1 }
0x122d   : > { %v2565_v47 = vsel %vm959_vm2, %v2564_v45, -inf }
0x122e   : > { %2566 = vmax.xlane.f32.xlu1 %v2565_v47  ;;  %v4383_v48 = vpop.f32.mrf.mxu1 }
0x1230   : > { %v2669_v49 = vpop.f32.mrf.mxu1 }
0x1231   : > { %v2675_v52 = vmul.f32 0.35355338, %v2669_v49 }
0x1232   : > { %v4394_v54 = vpop.f32.mrf.mxu1 }
0x1233   : > { %v2676_v57 = vadd.f32 %v2675_v52, %v5030_v41 }
0x1234   : > { %v2672_v42 = vpop.f32.mrf.mxu1 }
0x1235   : > { %v2677_v24 = vsel %vm959_vm2, %v2676_v57, -inf }
0x1236   : > { %2678 = vmax.xlane.f32.xlu0 %v2677_v24  ;;  %v4395_v63 = vpop.f32.mrf.mxu1 }
0x1238   : > { %v2781_v4 = vpop.f32.mrf.mxu1 }
0x1239   : > { %v2787_v5 = vmul.f32 0.35355338, %v2781_v4 }
0x123a   : > { %v4406_v8 = vpop.f32.mrf.mxu1 }
0x123b   : > { %v2788_v12 = vadd.f32 %v2787_v5, %v5030_v41 }
0x123c   : > { %v2784_v13 = vpop.f32.mrf.mxu1 }
0x123d   : > { %v2789_v15 = vsel %vm959_vm2, %v2788_v12, -inf }
0x123e   : > { %2790 = vmax.xlane.f32.xlu0 %v2789_v15  ;;  %v4407_v16 = vpop.f32.mrf.mxu1 }
0x12af   : > { %v2455_v17 = vpop.xlane.xlu0 %2454 }
0x12b0   : > { %v2456_v21 = vsub.f32 %v2452_v33, %v2455_v17 }
0x12b2   : > { %v2457_v22 = vmul.f32 1.442695, %v2456_v21 }
0x12b4   : > { %4640 = vpow2.f32 %v2457_v22 }
0x12b7   : > { %v2567_v23 = vpop.xlane.xlu1 %2566 }
0x12b8   : > { %v2568_v25 = vsub.f32 %v2564_v45, %v2567_v23 }
0x12ba   : > { %v2569_v26 = vmul.f32 1.442695, %v2568_v25 }
0x12bc   : > { %4642 = vpow2.f32 %v2569_v26 }
0x12bf   : > { %v2679_v30 = vpop.xlane.xlu0 %2678 }
0x12c0   : > { %v2680_v36 = vsub.f32 %v2676_v57, %v2679_v30 }
0x12c1   : > { %v4641_v27 = vpop.eup %4640 }
0x12c2   : > { %v2459_v28 = vsel %vm959_vm2, %v4641_v27, 0.0  ;;  %v2681_v39 = vmul.f32 1.442695, %v2680_v36 }
0x12c3   : > { %2460 = vadd.xlane.f32.xlu1 %v2459_v28 }
0x12c7   : > { %v2791_v31 = vpop.xlane.xlu0 %2790 }
0x12c8   : > { %v2792_v41 = vsub.f32 %v2788_v12, %v2791_v31 }
0x12c9   : > { %v4643_v3 = vpop.eup %4642 }
0x12ca   : > { %v2793_v32 = vmul.f32 1.442695, %v2792_v41  ;;  %v2571_v34 = vsel %vm959_vm2, %v4643_v3, 0.0 }
0x12cb   : > { %2572 = vadd.xlane.f32.xlu0 %v2571_v34  ;;  %v4588_v34 = vld [vmem:[%s5775_s8 + $0x8] sm:$0xff]  }
0x12cc   : > { %4644 = vpow2.f32 %v2793_v32  ;;  %4415 = vmatpush3.bf16.msra.mxu1 %v4588_v34 }
0x12cd   : > { %4646 = vpow2.f32 %v2681_v39  ;;  %4416 = vmatprep.subr.bf16.mxu1 %v4740_v1 }
0x12d4   : > { %2465 = vrot.lane.b32.xlu1 %v5345_v10, %s5792_s5  ;;  %s5797_s5 = sld [smem:[#allocation29_spill]] }
0x12d9   : > { %v4645_v33 = vpop.eup %4644 }
0x12da   : > { %v2795_v35 = vsel %vm959_vm2, %v4645_v33, 0.0  ;;  %v4647_v14 = vpop.eup %4646 }
0x12db   : > { %2796 = vadd.xlane.f32.xlu0 %v2795_v35  ;;  %v2683_v43 = vsel %vm959_vm2, %v4647_v14, 0.0 }
0x12f1   : > { %2577 = vrot.lane.b32.xlu0 %v5345_v10, %s5793_s27 }
0x12f8   : > { %2684 = vadd.xlane.f32.xlu1 %v2683_v43 }
0x1309   : > { %2689 = vrot.lane.b32.xlu1 %v5345_v10, %s5794_s6 }
0x130d   : > { %2801 = vrot.lane.b32.xlu1 %v5345_v10, %s5795_s11 }
0x134c   : > { %v2461_v45 = vpop.xlane.xlu1 %2460 }
0x134d   : > { %4648 = vrcp.f32 %v2461_v45 }
0x1350   : > { %v2466_v46 = vpop.permute.xlu1 %2465 }
0x1351   : > { %v2471_v47 = vsel %vm1025_vm4, %v2466_v46, 0 }
0x1352   : > { %4373 = vmatpush3.bf16.msra.mxu0 %v2471_v47 }
0x1353   : > { %4384 = vmatprep.subr.bf16.mxu0 %v4740_v1 }
0x1354   : > { %v2573_v48 = vpop.xlane.xlu0 %2572 }
0x1355   : > { %4650 = vrcp.f32 %v2573_v48 }
0x135a   : > { %v4649_v49 = vpop.eup %4648 }
0x135b   : > { %v2463_v52 = vmul.f32 %v4649_v49, %v4641_v27 }
0x135d   : > { %v2464_v54 = vpack.c.bf16 %v2463_v52, %v2463_v52 }
0x135f   : > { %4375 = vmatmul.mubr.msk.bf16.vlgmr.msra.gmra.mxu0 %vm959_vm2, %v2464_v54 }
0x1360   : > { %4386 = vmatprep.mubr.msk.bf16.mxu0 %vm4741_vm0, %v4740_v1 }
0x1362   : > { %v4651_v57 = vpop.eup %4650 }
0x1363   : > { %v2575_v42 = vmul.f32 %v4651_v57, %v4643_v3 }
0x1364   : > { %v2797_v10 = vpop.xlane.xlu0 %2796 }
0x1365   : > { %v2576_v4 = vpack.c.bf16 %v2575_v42, %v2575_v42 }
0x1368   : > { %v2578_v24 = vpop.permute.xlu0 %2577 }
0x1369   : > { %v2583_v63 = vsel %vm1025_vm4, %v2578_v24, 0 }
0x136a   : > { %4385 = vmatpush3.bf16.msra.mxu0 %v2583_v63 }
0x136b   : > { %4396 = vmatprep.subr.bf16.mxu0 %v4740_v1 }
0x136d   : > { %4387 = vmatmul.mubr.msk.bf16.vlgmr.msra.gmra.mxu0 %vm959_vm2, %v2576_v4 }
0x136e   : > { %4398 = vmatprep.mubr.msk.bf16.mxu0 %vm4741_vm0, %v4740_v1 }
0x1381   : > { %v2685_v5 = vpop.xlane.xlu1 %2684 }
0x1382   : > { %4652 = vrcp.f32 %v2685_v5 }
0x1383   : > { %4654 = vrcp.f32 %v2797_v10 }
0x1385   : > { %v2690_v8 = vpop.permute.xlu1 %2689 }
0x1386   : > { %v2695_v12 = vsel %vm1025_vm4, %v2690_v8, 0 }
0x1387   : > { %4397 = vmatpush3.bf16.msra.mxu0 %v2695_v12 }
0x1388   : > { %4408 = vmatprep.subr.bf16.mxu0 %v4740_v1 }
0x1389   : > { %v2802_v16 = vpop.permute.xlu1 %2801 }
0x138a   : > { %v2807_v22 = vsel %vm1025_vm4, %v2802_v16, 0 }
0x138f   : > { %v4653_v13 = vpop.eup %4652 }
0x1390   : > { %v2687_v15 = vmul.f32 %v4653_v13, %v4647_v14  ;;  %v4655_v21 = vpop.eup %4654 }
0x1391   : > { %v2799_v23 = vmul.f32 %v4655_v21, %v4645_v33  ;;  %v4589_v33 = vld [vmem:[%s5775_s8] sm:$0xff]  }
0x1392   : > { %v2688_v17 = vpack.c.bf16 %v2687_v15, %v2687_v15  ;;  %4417 = vmatpush3.bf16.msra.mxu1 %v4589_v33 }
0x1393   : > { %v2800_v25 = vpack.c.bf16 %v2799_v23, %v2799_v23  ;;  %4430 = vmatprep.subr.bf16.mxu1 %v4740_v1 }
0x1394   : > { %4399 = vmatmul.mubr.msk.bf16.vlgmr.msra.gmra.mxu0 %vm959_vm2, %v2688_v17 }
0x1395   : > { %4409 = vmatpush3.bf16.msra.mxu0 %v2807_v22  ;;  %4410 = vmatprep.mubr.msk.bf16.mxu0 %vm4741_vm0, %v4740_v1  ;;  %v4590_v22 = vld [vmem:[%s5778_s3 + $0x8] sm:$0xff]  }
0x1396   : > { %4422 = vmatprep.subr.bf16.mxu0 %v4740_v1 }
0x139c   : > { %4411 = vmatmul.mubr.msk.bf16.vlgmr.msra.gmra.mxu0 %vm959_vm2, %v2800_v25 }
0x139d   : > { %4426 = vmatprep.mubr.msk.bf16.mxu0 %vm4741_vm0, %v4740_v1  ;;  %4423 = vmatpush3.bf16.msra.mxu0 %v4590_v22 }
0x139e   : > { %4424 = vmatprep.subr.bf16.mxu0 %v4740_v1 }
0x141f   : > { %v2507_v26 = vpop.f32.mrf.mxu0 }
0x1421   : > { %v4376_v27 = vpop.f32.mrf.mxu0 }
0x1423   : > { %v2510_v28 = vpop.f32.mrf.mxu0 }
0x1425   : > { %v4377_v30 = vpop.f32.mrf.mxu0 }
0x142d   : > { %v2619_v31 = vpop.f32.mrf.mxu0 }
0x142e   : > { %2850 = vrot.lane.b32.xlu0 %v2619_v31, %s5788_s12 }
0x142f   : > { %v4388_v41 = vpop.f32.mrf.mxu0 }
0x1431   : > { %v2622_v3 = vpop.f32.mrf.mxu0 }
0x1433   : > { %v4389_v32 = vpop.f32.mrf.mxu0 }
0x1454   : > { %v2731_v35 = vpop.f32.mrf.mxu0 }
0x1455   : > { %2854 = vrot.lane.b32.xlu1 %v2731_v35, %s5789_s24 }
0x1456   : > { %v4400_v36 = vpop.f32.mrf.mxu0 }
0x1458   : > { %v2734_v39 = vpop.f32.mrf.mxu0 }
0x145a   : > { %v4401_v14 = vpop.f32.mrf.mxu0 }
0x145c   : > { %v2843_v43 = vpop.f32.mrf.mxu0 }
0x145d   : > { %2858 = vrot.lane.b32.xlu0 %v2843_v43, %s5790_s10 }
0x145e   : > { %v4412_v45 = vpop.f32.mrf.mxu0 }
0x1460   : > { %v2846_v46 = vpop.f32.mrf.mxu0 }
0x1462   : > { %v4413_v47 = vpop.f32.mrf.mxu0 }
0x14a0   : > { %v2851_v48 = vpop.permute.xlu0 %2850 }
0x14a1   : > { %v2861_v52 = vsel %vm959_vm2, %v2507_v26, %v2851_v48 }
0x14c7   : > { %v2855_v49 = vpop.permute.xlu1 %2854 }
0x14c8   : > { %v2862_v54 = vsel %vm1418_vm5, %v2861_v52, %v2855_v49 }
0x14cf   : > { %v2859_v57 = vpop.permute.xlu0 %2858 }
0x14d0   : > { %v2863_v10 = vsel %vm1420_vm6, %v2862_v54, %v2859_v57 }
0x14d1   : > { %v2868_v42 = vpack.c.bf16 %v2863_v10, %v2863_v10 }
0x14d3   : > { %4419 = vmatmul.mubr.msk.bf16.vlgmr.msra.gmra.mxu1 %vm843_vm1, %v2868_v42 }
0x14d4   : > { %4431 = vmatpush3.bf16.xpose.msra.mxu1 %v5089_v18  ;;  %4432 = vmatprep.mubr.msk.bf16.mxu1 %vm4741_vm0, %v4740_v1 }
0x14d5   : > { %4442 = vmatprep.subr.bf16.mxu1 %v4740_v1 }
0x1593   : > { %v2925_v24 = vpop.f32.mrf.mxu1 }
0x1594   : > { %v2926_v63 = vadd.f32 %v5098_v19, %v2925_v24  ;;  %v4591_v19 = vld [vmem:[%s5778_s3] sm:$0xff]  }
0x1595   : > { %v4420_v4 = vpop.f32.mrf.mxu1  ;;  %4425 = vmatpush3.bf16.msra.mxu0 %v4591_v19 }
0x1596   : > { %v2931_v5 = vadd.f32 %v2926_v63, %v5335_v60  ;;  %4436 = vmatprep.subr.bf16.mxu0 %v4740_v1 }
0x1597   : > { %v2928_v8 = vpop.f32.mrf.mxu1 }
0x1598   : > { %v2934_v12 = vsel %vm843_vm1, %v2931_v5, 0.0 }
0x1599   : > { %2935 = vadd.xlane.f32.xlu1 %v2934_v12  ;;  %v4421_v13 = vpop.f32.mrf.mxu1 }
0x1622   : > { %v2936_v15 = vpop.xlane.xlu1 %2935 }
0x1623   : > { %v2937_v16 = vmul.f32 0.03125, %v2936_v15 }
0x1625   : > { %v2938_v17 = vsub.f32 %v2931_v5, %v2937_v16 }
0x1627   : > { %v2939_v18 = vmul.f32 %v2938_v17, %v2938_v17 }
0x1629   : > { %v2940_v21 = vsel %vm843_vm1, %v2939_v18, 0.0 }
0x162a   : > { %2941 = vadd.xlane.f32.xlu0 %v2940_v21 }
0x16b3   : > { %v2942_v60 = vpop.xlane.xlu0 %2941 }
0x16b4   : > { %v2943_v23 = vmul.f32 0.03125, %v2942_v60 }
0x16b6   : > { %v2944_v25 = vadd.f32 1e-05, %v2943_v23 }
0x16b8   : > { %4656 = vrsqrt.f32 %v2944_v25 }
0x16c5   : > { %v4657_v26 = vpop.eup %4656 }
0x16c6   : > { %v2946_v27 = vmul.f32 %v4657_v26, %v2938_v17 }
0x16c8   : > { %v2953_v28 = vmul.f32 %v5121_v38, %v2946_v27 }
0x16ca   : > { %v5455_v30 = vadd.f32 %v5126_v40, %v2953_v28 }
0x16cc   : > { %v2965_v31 = vpack.c.bf16 %v5455_v30, %v5455_v30 }
0x16ce   : > { %4427 = vmatmul.mubr.msk.bf16.vlgmr.msra.gmra.mxu0 %vm843_vm1, %v2965_v31 }
0x16cf   : > { %4437 = vmatpush3.bf16.msra.mxu0 %v5185_v50  ;;  %4438 = vmatprep.mubr.msk.bf16.mxu0 %vm4741_vm0, %v4740_v1 }
0x16d0   : > { %4448 = vmatprep.subr.bf16.mxu0 %v4740_v1 }
0x178e   : > { %v3022_v41 = vpop.f32.mrf.mxu0 }
0x178f   : > { %v3023_v3 = vadd.f32 %v5140_v44, %v3022_v41 }
0x1790   : > { %v4428_v32 = vpop.f32.mrf.mxu0 }
0x1791   : > { %v3028_v38 = vpack.c.bf16 %v3023_v3, %v3023_v3 }
0x1792   : > { %v3025_v34 = vpop.f32.mrf.mxu0 }
0x1793   : > { %3230 = vrot.lane.b32.xlu1 %v3028_v38, %s5783_s26  ;;  %3129 = vrot.lane.b32.xlu0 %v3028_v38, %s5782_s1  ;;  %s4756_s1 = smov 32  }
0x1794   : > { %4433 = vmatmul.mubr.msk.bf16.vlgmr.msra.gmra.mxu1 %vm959_vm2, %v3028_v38  ;;  %v4429_v40 = vpop.f32.mrf.mxu0 }
0x1795   : > { %4443 = vmatpush3.bf16.xpose.msra.mxu1 %v5144_v51  ;;  %4444 = vmatprep.mubr.msk.bf16.mxu1 %vm4741_vm0, %v4740_v1 }
0x1796   : > { %4454 = vmatprep.subr.bf16.mxu1 %v4740_v1 }
0x1797   : > { %3331 = vrot.lane.b32.xlu1 %v3028_v38, %s5777_s9  ;;  %s5796_s9 = sld [smem:[#allocation7_spill]] }
0x179d   : > { %s5600_s27 = sand.u32 1, %s5796_s9   ;;  %s5800_s9 = sld [smem:[#allocation30_spill]] }
0x179e   : > { %s3975_s14 = sshll.u32 %s5600_s27, 3 }
0x179f   : > { %s782_s29 = scalar_lea.vmem [#allocation2], %s3975_s14 }
0x17a0   : > { %s3821_s7 = sshll.u32 %s782_s29, 4  ;;  %s5620_s7 = int_to_ptr.vmem [resolvable:$true] %s3821_s7 }
0x17a1   : > { %s4678_s26 = scalar_lea.vmem %s5620_s7, 128 }
0x17a2   : > { %p4679_p11 = scmp.ne.s32.totalorder %s5620_s7, %s4678_s26 }
0x17a4   : > { %p4680_p12 = pnand %p4679_p11, %p4926_p5 }
0x17a6   : > { %p4681_p13 = pneg %p4680_p12 }
0x1805   : > { %v3130_v44 = vpop.permute.xlu0 %3129  ;;  %v3231_v50 = vpop.permute.xlu1 %3230 }
0x1806   : > { %4445 = vmatmul.mubr.msk.bf16.vlgmr.msra.gmra.mxu1 %vm959_vm2, %v3130_v44 }
0x1807   : > { %4455 = vmatpush3.bf16.xpose.msra.mxu1 %v5155_v55  ;;  %4456 = vmatprep.mubr.msk.bf16.mxu1 %vm4741_vm0, %v4740_v1 }
0x1808   : > { %4466 = vmatprep.subr.bf16.mxu1 %v4740_v1 }
0x1809   : > { %v3332_v51 = vpop.permute.xlu1 %3331 }
0x180e   : > { %4457 = vmatmul.mubr.msk.bf16.vlgmr.msra.gmra.mxu1 %vm959_vm2, %v3231_v50 }
0x180f   : > { %4467 = vmatpush3.bf16.xpose.msra.mxu1 %v5163_v58  ;;  %4468 = vmatprep.mubr.msk.bf16.mxu1 %vm4741_vm0, %v4740_v1 }
0x1810   : > { %4478 = vmatprep.subr.bf16.mxu1 %v4740_v1 }
0x1816   : > { %4469 = vmatmul.mubr.msk.bf16.vlgmr.msra.gmra.mxu1 %vm959_vm2, %v3332_v51 }
0x1817   : > { %4482 = vmatprep.mubr.msk.bf16.mxu1 %vm4741_vm0, %v4740_v1 }
0x1854   : > { %v3066_v55 = vpop.f32.mrf.mxu1 }
0x1855   : > { %v3072_v33 = vmul.f32 0.35355338, %v3066_v55 }
0x1856   : > { %v4434_v35 = vpop.f32.mrf.mxu1 }
0x1857   : > { %v3073_v36 = vsel %vm1418_vm5, %v3072_v33, -inf }
0x1858   : > { %3074 = vmax.xlane.f32.xlu0 %v3073_v36  ;;  %v3069_v39 = vpop.f32.mrf.mxu1 }
0x185a   : > { %v4435_v14 = vpop.f32.mrf.mxu1 }
0x18c6   : > { %v3168_v58 = vpop.f32.mrf.mxu1 }
0x18c7   : > { %v3174_v43 = vmul.f32 0.35355338, %v3168_v58 }
0x18c8   : > { %v4446_v45 = vpop.f32.mrf.mxu1 }
0x18c9   : > { %v3175_v46 = vsel %vm1418_vm5, %v3174_v43, -inf }
0x18ca   : > { %3176 = vmax.xlane.f32.xlu1 %v3175_v46  ;;  %v3171_v47 = vpop.f32.mrf.mxu1 }
0x18cc   : > { %v4447_v48 = vpop.f32.mrf.mxu1 }
0x18ce   : > { %v3269_v49 = vpop.f32.mrf.mxu1 }
0x18cf   : > { %v3275_v52 = vmul.f32 0.35355338, %v3269_v49 }
0x18d0   : > { %v4458_v54 = vpop.f32.mrf.mxu1 }
0x18d1   : > { %v3276_v57 = vsel %vm1418_vm5, %v3275_v52, -inf }
0x18d2   : > { %3277 = vmax.xlane.f32.xlu0 %v3276_v57  ;;  %v3272_v10 = vpop.f32.mrf.mxu1 }
0x18d4   : > { %v4459_v42 = vpop.f32.mrf.mxu1 }
0x18d5   : > { %v4593_v42 = vld [vmem:[%s5686_s13] sm:$0xff]  }
0x18d6   : > { %v3370_v24 = vpop.f32.mrf.mxu1 }
0x18d7   : > { %v3376_v63 = vmul.f32 0.35355338, %v3370_v24 }
0x18d8   : > { %v4470_v4 = vpop.f32.mrf.mxu1 }
0x18d9   : > { %v3377_v5 = vsel %vm1418_vm5, %v3376_v63, -inf }
0x18da   : > { %3378 = vmax.xlane.f32.xlu0 %v3377_v5  ;;  %v3373_v8 = vpop.f32.mrf.mxu1 }
0x18dc   : > { %v4471_v12 = vpop.f32.mrf.mxu1 }
0x18e1   : > { %v3075_v13 = vpop.xlane.xlu0 %3074 }
0x18e2   : > { %v3076_v15 = vsub.f32 %v3072_v33, %v3075_v13 }
0x18e4   : > { %v3077_v16 = vmul.f32 1.442695, %v3076_v15 }
0x18e6   : > { %4658 = vpow2.f32 %v3077_v16 }
0x18f3   : > { %v4659_v17 = vpop.eup %4658 }
0x18f4   : > { %v3079_v18 = vsel %vm1418_vm5, %v4659_v17, 0.0 }
0x18f5   : > { %3080 = vadd.xlane.f32.xlu1 %v3079_v18 }
0x1953   : > { %v3177_v21 = vpop.xlane.xlu1 %3176 }
0x1954   : > { %v3178_v22 = vsub.f32 %v3174_v43, %v3177_v21 }
0x1956   : > { %v3179_v19 = vmul.f32 1.442695, %v3178_v22 }
0x1958   : > { %4660 = vpow2.f32 %v3179_v19 }
0x195b   : > { %v3278_v60 = vpop.xlane.xlu0 %3277 }
0x195c   : > { %v3279_v23 = vsub.f32 %v3275_v52, %v3278_v60  ;;  %v4592_v52 = vld [vmem:[%s5686_s13 + $0x8] sm:$0xff]  }
0x195d   : > { %4479 = vmatpush3.bf16.msra.mxu1 %v4592_v52 }
0x195e   : > { %v3280_v25 = vmul.f32 1.442695, %v3279_v23  ;;  %4480 = vmatprep.subr.bf16.mxu1 %v4740_v1 }
0x1960   : > { %4662 = vpow2.f32 %v3280_v25 }
0x1961   : > { %4481 = vmatpush3.bf16.msra.mxu1 %v4593_v42 }
0x1962   : > { %4494 = vmatprep.subr.bf16.mxu1 %v4740_v1 }
0x1963   : > { %v3379_v26 = vpop.xlane.xlu0 %3378 }
0x1964   : > { %v3380_v27 = vsub.f32 %v3376_v63, %v3379_v26 }
0x1965   : > { %v4661_v28 = vpop.eup %4660 }
0x1966   : > { %v3381_v31 = vmul.f32 1.442695, %v3380_v27  ;;  %v3181_v41 = vsel %vm1418_vm5, %v4661_v28, 0.0 }
0x1967   : > { %3182 = vadd.xlane.f32.xlu0 %v3181_v41 }
0x1968   : > { %4664 = vpow2.f32 %v3381_v31 }
0x196d   : > { %v4663_v3 = vpop.eup %4662 }
0x196e   : > { %v3282_v32 = vsel %vm1418_vm5, %v4663_v3, 0.0 }
0x196f   : > { %3283 = vadd.xlane.f32.xlu1 %v3282_v32 }
0x1975   : > { %v4665_v38 = vpop.eup %4664 }
0x1976   : > { %v3383_v34 = vsel %vm1418_vm5, %v4665_v38, 0.0 }
0x1977   : > { %3384 = vadd.xlane.f32.xlu0 %v3383_v34 }
0x197e   : > { %v3081_v40 = vpop.xlane.xlu1 %3080 }
0x197f   : > { %4666 = vrcp.f32 %v3081_v40 }
0x198c   : > { %v4667_v44 = vpop.eup %4666 }
0x198d   : > { %v5494_v50 = vmul.f32 %v4667_v44, %v4659_v17 }
0x198f   : > { %v3084_v51 = vpack.c.bf16 %v5494_v50, %v5494_v50 }
0x1991   : > { %4439 = vmatmul.mubr.msk.bf16.vlgmr.msra.gmra.mxu0 %vm1418_vm5, %v3084_v51  ;;  %v4594_v51 = vld [vmem:[%s5690_s17 + $0x8] sm:$0xff]  }
0x1992   : > { %4449 = vmatpush3.bf16.msra.mxu0 %v5202_v62  ;;  %4450 = vmatprep.mubr.msk.bf16.mxu0 %vm4741_vm0, %v4740_v1 }
0x1993   : > { %4460 = vmatprep.subr.bf16.mxu0 %v4740_v1 }
0x19f0   : > { %v3183_v55 = vpop.xlane.xlu0 %3182 }
0x19f1   : > { %4668 = vrcp.f32 %v3183_v55  ;;  %v4597_v55 = vld [vmem:[%s5692_s19 + $0x10] sm:$0xff]  }
0x19f8   : > { %v3284_v33 = vpop.xlane.xlu1 %3283 }
0x19f9   : > { %4670 = vrcp.f32 %v3284_v33 }
0x19fe   : > { %v4669_v35 = vpop.eup %4668 }
0x19ff   : > { %v5503_v36 = vmul.f32 %v4669_v35, %v4661_v28 }
0x1a00   : > { %v3385_v39 = vpop.xlane.xlu0 %3384 }
0x1a01   : > { %4672 = vrcp.f32 %v3385_v39  ;;  %v3186_v14 = vpack.c.bf16 %v5503_v36, %v5503_v36 }
0x1a03   : > { %4451 = vmatmul.mubr.msk.bf16.vlgmr.msra.gmra.mxu0 %vm1418_vm5, %v3186_v14 }
0x1a04   : > { %4461 = vmatpush3.bf16.msra.mxu0 %v5208_v0  ;;  %4462 = vmatprep.mubr.msk.bf16.mxu0 %vm4741_vm0, %v4740_v1 }
0x1a05   : > { %4472 = vmatprep.subr.bf16.mxu0 %v4740_v1 }
0x1a06   : > { %v4671_v62 = vpop.eup %4670 }
0x1a07   : > { %v5512_v58 = vmul.f32 %v4671_v62, %v4663_v3 }
0x1a09   : > { %v3287_v43 = vpack.c.bf16 %v5512_v58, %v5512_v58 }
0x1a0b   : > { %4463 = vmatmul.mubr.msk.bf16.vlgmr.msra.gmra.mxu0 %vm1418_vm5, %v3287_v43 }
0x1a0c   : > { %4473 = vmatpush3.bf16.msra.mxu0 %v5219_v6  ;;  %4474 = vmatprep.mubr.msk.bf16.mxu0 %vm4741_vm0, %v4740_v1 }
0x1a0d   : > { %4486 = vmatprep.subr.bf16.mxu0 %v4740_v1 }
0x1a0e   : > { %v4673_v0 = vpop.eup %4672 }
0x1a0f   : > { %v5521_v45 = vmul.f32 %v4673_v0, %v4665_v38 }
0x1a11   : > { %v3388_v46 = vpack.c.bf16 %v5521_v45, %v5521_v45 }
0x1a13   : > { %4475 = vmatmul.mubr.msk.bf16.vlgmr.msra.gmra.mxu0 %vm1418_vm5, %v3388_v46 }
0x1a14   : > { %4490 = vmatprep.mubr.msk.bf16.mxu0 %vm4741_vm0, %v4740_v1  ;;  %4487 = vmatpush3.bf16.msra.mxu0 %v4594_v51 }
0x1a15   : > { %4488 = vmatprep.subr.bf16.mxu0 %v4740_v1 }
0x1a51   : > { %v3122_v47 = vpop.f32.mrf.mxu0 }
0x1a53   : > { %v4440_v48 = vpop.f32.mrf.mxu0 }
0x1a54   : > { %v4599_v48 = vld [vmem:[%s5692_s19] sm:$0xff]  }
0x1a55   : > { %v3125_v49 = vpop.f32.mrf.mxu0 }
0x1a57   : > { %v4441_v6 = vpop.f32.mrf.mxu0 }
0x1ac3   : > { %v3224_v54 = vpop.f32.mrf.mxu0 }
0x1ac4   : > { %3450 = vrot.lane.b32.xlu1 %v3224_v54, %s5788_s12  ;;  %s4757_s12 = smov [#allocation2]  }
0x1ac5   : > { %v4452_v57 = vpop.f32.mrf.mxu0 }
0x1ac7   : > { %v3227_v10 = vpop.f32.mrf.mxu0 }
0x1ac9   : > { %v4453_v24 = vpop.f32.mrf.mxu0 }
0x1acb   : > { %v3325_v63 = vpop.f32.mrf.mxu0 }
0x1acc   : > { %3454 = vrot.lane.b32.xlu0 %v3325_v63, %s5789_s24 }
0x1acd   : > { %v4464_v4 = vpop.f32.mrf.mxu0 }
0x1acf   : > { %v3328_v5 = vpop.f32.mrf.mxu0 }
0x1ad1   : > { %v4465_v8 = vpop.f32.mrf.mxu0 }
0x1ad3   : > { %v3426_v12 = vpop.f32.mrf.mxu0 }
0x1ad4   : > { %3458 = vrot.lane.b32.xlu1 %v3426_v12, %s5790_s10  ;;  %s4682_s10 = sshll.u32 %s4757_s12, 4  ;;  %s4683_s10 = int_to_ptr.vmem [resolvable:$false] %s4682_s10 }
0x1ad5   : > { %v4476_v13 = vpop.f32.mrf.mxu0  ;;  %p4685_p0 = scmp.lt.s32.totalorder %s5620_s7, %s4683_s10 }
0x1ad7   : > { %v3429_v15 = vpop.f32.mrf.mxu0 }
0x1ad9   : > { %v4477_v16 = vpop.f32.mrf.mxu0 }
0x1b36   : > { %v3451_v17 = vpop.permute.xlu1 %3450 }
0x1b37   : > { %v3461_v21 = vsel %vm959_vm2, %v3122_v47, %v3451_v17  ;;  %v4598_v47 = vld [vmem:[%s5692_s19 + $0x8] sm:$0xff]  }
0x1b3e   : > { %v3455_v18 = vpop.permute.xlu0 %3454 }
0x1b3f   : > { %v3462_v22 = vsel %vm1418_vm5, %v3461_v21, %v3455_v18 }
0x1b46   : > { %v3459_v19 = vpop.permute.xlu1 %3458 }
0x1b47   : > { %v3463_v60 = vsel %vm1420_vm6, %v3462_v22, %v3459_v19 }
0x1b48   : > { %v3468_v23 = vpack.c.bf16 %v3463_v60, %v3463_v60 }
0x1b4a   : > { %4483 = vmatmul.mubr.msk.bf16.vlgmr.msra.gmra.mxu1 %vm843_vm1, %v3468_v23 }
0x1b4b   : > { %4502 = vmatprep.mubr.msk.bf16.mxu1 %vm4741_vm0, %v4740_v1 }
0x1c0a   : > { %v3525_v25 = vpop.f32.mrf.mxu1 }
0x1c0b   : > { %v3526_v26 = vadd.f32 %v5253_v37, %v3525_v25  ;;  %v4595_v37 = vld [vmem:[%s5690_s17] sm:$0xff]  }
0x1c0c   : > { %v4484_v27 = vpop.f32.mrf.mxu1  ;;  %4489 = vmatpush3.bf16.msra.mxu0 %v4595_v37 }
0x1c0d   : > { %v3531_v28 = vadd.f32 %v3526_v26, %v5455_v30  ;;  %4506 = vmatprep.subr.bf16.mxu0 %v4740_v1  ;;  %v4596_v30 = vld [vmem:[%s5692_s19 + $0x18] sm:$0xff]  }
0x1c0e   : > { %v3528_v31 = vpop.f32.mrf.mxu1  ;;  %4495 = vmatpush3.bf16.msra.mxu1 %v4596_v30 }
0x1c0f   : > { %v3534_v41 = vsel %vm843_vm1, %v3531_v28, 0.0  ;;  %4496 = vmatprep.subr.bf16.mxu1 %v4740_v1 }
0x1c10   : > { %3535 = vadd.xlane.f32.xlu1 %v3534_v41  ;;  %v4485_v3 = vpop.f32.mrf.mxu1 }
0x1c12   : > { %4497 = vmatpush3.bf16.msra.mxu1 %v4597_v55 }
0x1c13   : > { %4498 = vmatprep.subr.bf16.mxu1 %v4740_v1 }
0x1c16   : > { %4499 = vmatpush3.bf16.msra.mxu1 %v4598_v47 }
0x1c17   : > { %4500 = vmatprep.subr.bf16.mxu1 %v4740_v1 }
0x1c1a   : > { %4501 = vmatpush3.bf16.msra.mxu1 %v4599_v48 }
0x1c99   : > { %v3536_v32 = vpop.xlane.xlu1 %3535 }
0x1c9a   : > { %v3537_v38 = vmul.f32 0.03125, %v3536_v32 }
0x1c9c   : > { %v3538_v34 = vsub.f32 %v3531_v28, %v3537_v38 }
0x1c9e   : > { %v3539_v40 = vmul.f32 %v3538_v34, %v3538_v34 }
0x1ca0   : > { %v3540_v44 = vsel %vm843_vm1, %v3539_v40, 0.0 }
0x1ca1   : > { %3541 = vadd.xlane.f32.xlu0 %v3540_v44 }
0x1d2a   : > { %v3542_v33 = vpop.xlane.xlu0 %3541 }
0x1d2b   : > { %v3543_v35 = vmul.f32 0.03125, %v3542_v33 }
0x1d2d   : > { %v3544_v39 = vadd.f32 1e-05, %v3543_v35 }
0x1d2f   : > { %4674 = vrsqrt.f32 %v3544_v39 }
0x1d3c   : > { %v4675_v14 = vpop.eup %4674 }
0x1d3d   : > { %v3546_v62 = vmul.f32 %v4675_v14, %v3538_v34 }
0x1d3f   : > { %v3553_v43 = vmul.f32 %v5278_v9, %v3546_v62 }
0x1d41   : > { %v3560_v0 = vadd.f32 %v5283_v11, %v3553_v43 }
0x1d43   : > { %v3565_v46 = vpack.c.bf16 %v3560_v0, %v3560_v0 }
0x1d45   : > { %4491 = vmatmul.mubr.msk.bf16.vlgmr.msra.gmra.mxu0 %vm843_vm1, %v3565_v46 }
0x1d46   : > { %4510 = vmatprep.mubr.msk.bf16.mxu0 %vm4741_vm0, %v4740_v1 }
0x1e05   : > { %v3622_v9 = vpop.f32.mrf.mxu0 }
0x1e06   : > { %v3623_v11 = vadd.f32 %v5301_v20, %v3622_v9 }
0x1e07   : > { %v4492_v49 = vpop.f32.mrf.mxu0 }
0x1e08   : > { %v3628_v6 = vmax.f32 %v3623_v11, 0.0 }
0x1e09   : > { %v3625_v52 = vpop.f32.mrf.mxu0 }
0x1e0a   : > { %v3637_v54 = vpack.c.bf16 %v3628_v6, %v3628_v6 }
0x1e0b   : > { %v4493_v57 = vpop.f32.mrf.mxu0 }
0x1e0c   : > { %4503 = vmatmul.mubr.msk.bf16.vlgmr.msra.gmra.mxu1 %vm2039_vm7, %v3637_v54 }
0x1ecc   : > { %v3706_v10 = vpop.f32.mrf.mxu1 }
0x1ecd   : > { %v3707_v42 = vadd.f32 %v5310_v29, %v3706_v10 }
0x1ece   : > { %v4504_v24 = vpop.f32.mrf.mxu1 }
0x1ecf   : > { %v3712_v63 = vadd.f32 %v3707_v42, %v3560_v0 }
0x1ed0   : > { %v3709_v4 = vpop.f32.mrf.mxu1 }
0x1ed1   : > { %v3715_v5 = vsel %vm843_vm1, %v3712_v63, 0.0 }
0x1ed2   : > { %3716 = vadd.xlane.f32.xlu0 %v3715_v5  ;;  %v4505_v8 = vpop.f32.mrf.mxu1 }
0x1ee8   : > { %2024 = vrot.lane.b32.xlu0 %v5200_v61, %s5789_s24  ;;  %v4600_v61 = vld [vmem:[%s5797_s5 + $0x8] sm:$0xff]  }
0x1ee9   : > { %4507 = vmatpush3.bf16.msra.mxu0 %v4600_v61 }
0x1eea   : > { %4508 = vmatprep.subr.bf16.mxu0 %v4740_v1 }
0x1eec   : > { %3433 = vrot.lane.b32.xlu0 %v5503_v36, %s5789_s24  ;;  %v4601_v36 = vld [vmem:[%s5797_s5] sm:$0xff]   ;;  %s3804_s24 = scalar_lea.sflag [#allocation3], %s5600_s27 }
0x1eed   : > { %4509 = vmatpush3.bf16.msra.mxu0 %v4601_v36 }
0x1ef0   : > { %3441 = vrot.lane.b32.xlu0 %v5521_v45, %s5794_s6 }
0x1f5b   : > { %v3717_v20 = vpop.xlane.xlu0 %3716 }
0x1f5c   : > { %v3718_v12 = vmul.f32 0.03125, %v3717_v20 }
0x1f5e   : > { %v3719_v13 = vsub.f32 %v3712_v63, %v3718_v12 }
0x1f5f   : > { %v2025_v16 = vpop.permute.xlu0 %2024 }
0x1f60   : > { %v3720_v29 = vmul.f32 %v3719_v13, %v3719_v13  ;;  %v2035_v17 = vsel %vm1418_vm5, %v5191_v53, %v2025_v16 }
0x1f62   : > { %v3721_v15 = vsel %vm843_vm1, %v3720_v29, 0.0 }
0x1f63   : > { %3722 = vadd.xlane.f32.xlu1 %v3721_v15  ;;  %v3434_v18 = vpop.permute.xlu0 %3433 }
0x1f64   : > { %v3444_v19 = vsel %vm1418_vm5, %v5494_v50, %v3434_v18 }
0x1f67   : > { %v3442_v23 = vpop.permute.xlu0 %3441 }
0x1f74   : > { %2028 = vrot.lane.b32.xlu1 %v5215_v2, %s4756_s1 }
0x1f78   : > { %2032 = vrot.lane.b32.xlu1 %v5225_v7, %s5794_s6  ;;  %s3976_s6 = sshll.u32 %s5600_s27, 4 }
0x1f79   : > { %s5606_s11 = scalar_lea.vmem [#allocation4], %s3976_s6  ;;  %s4684_s6 = scalar_lea.vmem %s4683_s10, 256 }
0x1f7a   : > { %p4686_p1 = scmp.lt.s32.totalorder %s4684_s6, %s4678_s26 }
0x1f7c   : > { %3437 = vrot.lane.b32.xlu1 %v5512_v58, %s4756_s1  ;;  %s5625_s1 = scalar_lea.hbm %s5800_s9, %s4087_s4  ;;  %p4687_p2 = por %p4686_p1, %p4685_p0 }
0x1f7e   : > { %p4688_p3 = pnand %p4687_p2, %p4681_p13 }
0x1fec   : > { %v3723_v45 = vpop.xlane.xlu1 %3722 }
0x1fed   : > { %v3724_v2 = vmul.f32 0.03125, %v3723_v45 }
0x1fef   : > { %v3725_v7 = vadd.f32 1e-05, %v3724_v2 }
0x1ff0   : > { %v2029_v58 = vpop.permute.xlu1 %2028 }
0x1ff1   : > { %4676 = vrsqrt.f32 %v3725_v7  ;;  %v2036_v21 = vsel %vm843_vm1, %v2035_v17, %v2029_v58 }
0x1ff4   : > { %v2033_v22 = vpop.permute.xlu1 %2032 }
0x1ff5   : > { %v2038_v1 = vsel %vm2037_vm8, %v2036_v21, %v2033_v22 }
0x1ff6   : > { %2040 = vst.msk [vmem:[%s5606_s11] sm:$0xff] %vm2039_vm7, %v2038_v1 }
0x1ff8   : > { %v3438_v60 = vpop.permute.xlu1 %3437 }
0x1ff9   : > { %v3445_v53 = vsel %vm843_vm1, %v3444_v19, %v3438_v60 }
0x1ffa   : > { %v3446_v25 = vsel %vm2037_vm8, %v3445_v53, %v3442_v23 }
0x1ffb   : > { %4063 = vst.msk [vmem:[%s5606_s11 + $0x8] sm:$0xff] %vm2039_vm7, %v3446_v25 }
0x1ffe   : > { %v4677_v26 = vpop.eup %4676 }
0x1fff   : > { %v3727_v27 = vmul.f32 %v4677_v26, %v3719_v13 }
0x2001   : > { %v3734_v28 = vmul.f32 %v5326_v56, %v3727_v27 }
0x2003   : > { %v3741_v31 = vadd.f32 %v5331_v59, %v3734_v28 }
0x2005   : > { %v3746_v41 = vpack.c.bf16 %v3741_v31, %v3741_v31 }
0x2007   : > { %4511 = vmatmul.mubr.msk.bf16.vlgmr.msra.gmra.mxu0 %vm843_vm1, %v3746_v41 }
0x20c7   : > { %v3796_v56 = vpop.f32.mrf.mxu0 }
0x20c8   : > { %3802 = vst [vmem:[%s782_s29] sm:$0xff] %v3796_v56 }
0x20c9   : > { %v4512_v59 = vpop.f32.mrf.mxu0 }
0x20ca   : > { %4691 = shalt.err (!%p4688_p3)
}
0x20cb   : > { %s4692_s25 = scalar_lea.hbm %s5625_s1, 128  ;;  %s4696_s29 = scalar_lea.hbm %s5800_s9, 256 }
0x20cc   : > { %p4693_p4 = scmp.ne.s32.totalorder %s5625_s1, %s4692_s25  ;;  %p4697_p9 = scmp.lt.s32.totalorder %s5625_s1, %s5800_s9 }
0x20cd   : > { %p4698_p10 = scmp.lt.s32.totalorder %s4696_s29, %s4692_s25 }
0x20ce   : > { %p4694_p7 = pnand %p4693_p4, %p4926_p5 }
0x20cf   : > { %p4699_p11 = por %p4698_p10, %p4697_p9 }
0x20d0   : > { %p4695_p8 = pneg %p4694_p7 }
0x20d2   : > { %p4700_p12 = pnand %p4699_p11, %p4695_p8 }
0x20d4   : > { %4703 = shalt.err (!%p4700_p12)
}
0x20d5   : > { %4514 = dma.vmem_to_hbm [thread:$0]  (%p4926_p5), %s5620_s7, 128, %s5625_s1, %s3804_s24   ;;  %v3799_v50 = vpop.f32.mrf.mxu0  ;;  %v3860_v32 = vld [vmem:[%s5606_s11] sm:$0xff] (%p4926_p5)  ;;  %v3862_v38 = vld [vmem:[%s5606_s11 + $0x8] sm:$0xff] (%p4926_p5) }
0x20d6   : > { %3827 = sbr.rel (!%p4926_p5) target bundleno = 8415 (0x20df), region = 124  ;;  %s5801_s2 = sld [smem:[#allocation10_spill]] (%p4926_p5) }
0x20d7   : > { %v4513_v3 = vpop.f32.mrf.mxu0  ;;  %s5802_s6 = sld [smem:[#allocation31_spill]] (%p4926_p5) }
0x20dc   : > { %s4088_s26 = sshll.u32 %s5801_s2, 3 }
0x20dd   : > { %s3829_s25 = scalar_lea.vmem %s5802_s6, %s4088_s26 }
0x20de   : > { %3861 = vst [vmem:[%s3829_s25] sm:$0xff] %v3860_v32  ;;  %3863 = vst [vmem:[%s3829_s25 + $0x10] sm:$0xff] %v3862_v38 }
0x20df PF: > { %s5803_s7 = sld [smem:[#allocation9_spill]] }
0x20e0   : > { %s5804_s1 = sld [smem:[#allocation6_spill]] }
0x20e5   : > { %p4520_p13 = scmp.ge.s32.totalorder %s5803_s7, 2 }
0x20e6   : > { %s3875_s30 = sand.u32 1, %s5804_s1  }
0x20e7   : > { %p4517_p5 = pnand %p4520_p13, %p4930_p6  ;;  %s3876_s27 = scalar_lea.sflag [#allocation3], %s3875_s30 }
0x20e9   : > { %p4518_p0 = pneg %p4517_p5 }
0x20eb   : > { %4721 = dma.done.wait (%p4518_p0), %s3876_s27, 128  }
0x20ec   : > { %4723 = vsyncadd (%p4518_p0), %s3876_s27, 4294967168  ;;  %s5806_s30 = sld [smem:[#allocation11_spill]] }
0x20ed   : > { %s5807_s29 = sld [smem:[#allocation7_spill]] }
0x20ee   : > { %s5808_s2 = sld [smem:[#allocation8_spill]] }
0x20ef   : > { %s5809_s6 = sld [smem:[#allocation12_spill]] }
0x20f2   : > { %p36_p1 = scmp.ge.s32.totalorder %s5806_s30, 4  }
0x20f4   :  { %38 = sbr.rel (!%p36_p1) target bundleno = 21 (0x15), region = 208 }
0x20f9   :  { %3888 = vsyncpa [#allocation3], 1 }
0x20fa   :  { %3890 = vsyncpa [#allocation3 + $0x1], 1 }

</bundles_post_ra>
